<compile_context>
chip_gen: v7x
topology: tpu7x:2x2x1
jax: 0.10.0
libtpu: 0.0.40
codegen_flags: <defaults>
</compile_context>

<pallas_src>
import functools
import math

import jax
import jax.numpy as jnp
from jax.experimental import pallas as pl
from jax.experimental.pallas import tpu as pltpu


NEG_INF = -1e30  # additive mask sentinel; softmax math stays f32, so this is safe


# ----------------------------------------------------------------------------- kernel

def graph_star_fused_kernel(
        x_raw_ref, conv_bias_ref, star_kbias_ref,
        fl_w_ref, fl_b_ref,
        init_wq_ref, init_wkv_ref, init_g_ref, init_b_ref,
        conv_wqkv_ref, conv_g_ref, conv_b_ref,
        satt_wq_ref, satt_wkv_ref, satt_g_ref, satt_b_ref,
        out_ref, h_ref,
        *, num_node, num_star, hid, heads, head_dim, num_layers, n_total):
    f32 = jnp.float32
    bf16 = jnp.bfloat16

    def softmax_rows(s):
        m = jnp.max(s, axis=-1, keepdims=True)
        e = jnp.exp(s - m)                                   # masked cols underflow to 0
        return e * pl.reciprocal(jnp.sum(e, axis=-1, keepdims=True), approx=True)

    def layer_norm(y, g, b):
        mu = jnp.mean(y, axis=-1, keepdims=True)
        var = jnp.mean(jnp.square(y - mu), axis=-1, keepdims=True)
        return (y - mu) * jax.lax.rsqrt(var + f32(1e-5)) * g + b

    def mha_heads(q_bf, k_bf, v_bf, bias):
        # q/k/v bf16 with heads on contiguous lane slices of width head_dim.
        # Scale is pre-folded into the Q weights at init time.
        outs = []
        for hh in range(heads):
            sl = slice(hh * head_dim, (hh + 1) * head_dim)
            s = jax.lax.dot_general(q_bf[:, sl], k_bf[:, sl],
                                    (((1,), (1,)), ((), ())),
                                    preferred_element_type=f32) + bias
            p = softmax_rows(s)
            outs.append(jnp.dot(p.astype(bf16), v_bf[:, sl],
                                preferred_element_type=f32))
        # Head combine = lay the per-head outputs onto contiguous lanes.
        return jnp.concatenate(outs, axis=-1)                # [Rq, heads*head_dim]

    # ---- fl + ReLU (one_hot_node=False path) -------------------------------
    x0 = jnp.dot(x_raw_ref[...].astype(bf16), fl_w_ref[...],
                 preferred_element_type=f32) + fl_b_ref[...]
    x0 = jnp.maximum(x0, f32(0.0))                           # [num_node, hid]
    x0_bf = x0.astype(bf16)

    # ---- star_init: StarAttn(heads=num_star, head_dim=hid), no residual ----
    # star_seed = gap(x, batch) — single graph => mean over nodes.
    star_seed = jnp.mean(x0, axis=0, keepdims=True)          # [1, hid]
    q_i = jnp.dot(star_seed.astype(bf16), init_wq_ref[...],
                  preferred_element_type=f32).astype(bf16)   # [1, num_star*hid]
    kv_i = jnp.dot(x0_bf, init_wkv_ref[...],
                   preferred_element_type=f32).astype(bf16)  # [num_node, 2*num_star*hid]
    parts = []
    for hh in range(num_star):
        slk = slice(hh * hid, (hh + 1) * hid)
        slv = slice(num_star * hid + hh * hid, num_star * hid + (hh + 1) * hid)
        s = jax.lax.dot_general(q_i[:, slk], kv_i[:, slk],
                                (((1,), (1,)), ((), ())),
                                preferred_element_type=f32)  # [1, num_node], unmasked
        p = softmax_rows(s)
        parts.append(jnp.dot(p.astype(bf16), kv_i[:, slv],
                             preferred_element_type=f32))     # [1, hid]
    o3 = jnp.concatenate(parts, axis=0)                       # [num_star, hid]
    # LayerNorm over the concatenated num_star*hid feature set (grouped LN).
    mu = jnp.mean(o3, keepdims=True)
    var = jnp.mean(jnp.square(o3 - mu), keepdims=True)
    stars = (o3 - mu) * jax.lax.rsqrt(var + f32(1e-5)) * init_g_ref[...] + init_b_ref[...]

    # ---- persistent node+star activation buffer (sublane padded) -----------
    h_ref[...] = jnp.zeros(h_ref.shape, f32)                  # pad rows stay zero
    h_ref[0:num_node, :] = x0
    h_ref[num_node:n_total, :] = stars

    conv_bias = conv_bias_ref[...]       # [n_pad, n_pad] additive edge-mask bias
    star_kbias = star_kbias_ref[...]     # [1, n_pad]     masks pad key columns

    x_new = h_ref[...]
    for l in range(num_layers):
        h_in = h_ref[...]                                     # [n_pad, hid]
        stars_prev = h_in[num_node:n_total, :]                # [num_star, hid]
        h_bf = h_in.astype(bf16)                              # cast once per layer

        # GraphStarConv: fused QKV projection + edge-masked MHA + residual + LN.
        qkv = jnp.dot(h_bf, conv_wqkv_ref[l], preferred_element_type=f32)
        qkv_bf = qkv.astype(bf16)                             # one cast, reused by Q/K/V
        a = mha_heads(qkv_bf[:, 0:hid], qkv_bf[:, hid:2 * hid],
                      qkv_bf[:, 2 * hid:3 * hid], conv_bias)
        x_new = layer_norm(a + h_in, conv_g_ref[l], conv_b_ref[l])   # [n_pad, hid]

        # StarAttn: previous star state attends over the conv output (+res+LN).
        x_bf = x_new.astype(bf16)
        q_s = jnp.dot(stars_prev.astype(bf16), satt_wq_ref[l],
                      preferred_element_type=f32).astype(bf16)       # [num_star, hid]
        kv_s = jnp.dot(x_bf, satt_wkv_ref[l],
                       preferred_element_type=f32).astype(bf16)      # [n_pad, 2*hid]
        s2 = mha_heads(q_s, kv_s[:, 0:hid], kv_s[:, hid:2 * hid], star_kbias)
        stars = layer_norm(s2 + stars_prev, satt_g_ref[l], satt_b_ref[l])

        # Next layer's input: ref stores into the persistent buffer (no concat).
        h_ref[0:num_node, :] = x_new[0:num_node, :]
        h_ref[num_node:n_total, :] = stars

    # ---- epilogue: direct stores, no lane-pad slab --------------------------
    # Note: rows n_total-num_star..n_total of x hold the conv-updated star rows
    # while the tail holds the StarAttn-updated ones (matches the reference
    # return of (x, stars)).
    out_ref[0:n_total, :] = x_new[0:n_total, :]
    out_ref[n_total:n_total + num_star, :] = stars


# ----------------------------------------------------------------------------- graph glue

def add_self_loop_edge(edge_index, edge_type, x_size, self_loop_type):
    tmp = jnp.arange(0, x_size, dtype=edge_index.dtype)
    tmp = jnp.stack([tmp, tmp], axis=0)
    edge_index = jnp.concatenate([edge_index, tmp], axis=1)
    edge_type = jnp.concatenate(
        [edge_type, jnp.full((x_size,), self_loop_type, dtype=edge_type.dtype)])
    return edge_index, edge_type


def add_star_edge(edge_index, edge_type, x_size, batch, num_star, node_to_star_type):
    row = jnp.arange(0, x_size, dtype=edge_index.dtype)
    b1 = batch.astype(edge_index.dtype) * num_star + x_size
    for i in range(num_star):
        col = b1 + i
        edge_index = jnp.concatenate([edge_index, jnp.stack([row, col], axis=0)], axis=1)
        edge_type = jnp.concatenate(
            [edge_type, jnp.full((x_size,), node_to_star_type, dtype=edge_type.dtype)])
    return edge_index, edge_type


# ----------------------------------------------------------------------------- parameters

def init_params(key, num_features, hid, num_star, heads, num_layers):
    head_dim = hid // heads
    s = 0.1
    bf16 = jnp.bfloat16
    ks = jax.random.split(key, 6)
    p = {}
    p["fl_w"] = (jax.random.normal(ks[0], (num_features, hid)) * s).astype(bf16)
    p["fl_b"] = jnp.zeros((1, hid), jnp.float32)

    # star_init (heads=num_star, head_dim=hid): 1/sqrt(hid) folded into Q weights.
    init_scale = 1.0 / math.sqrt(hid)
    p["init_wq"] = (jax.random.normal(ks[1], (hid, num_star * hid)) * s * init_scale).astype(bf16)
    p["init_wkv"] = (jax.random.normal(ks[2], (hid, 2 * num_star * hid)) * s).astype(bf16)
    p["init_g"] = jnp.ones((num_star, hid), jnp.float32)
    p["init_b"] = jnp.zeros((num_star, hid), jnp.float32)

    # Per-layer fused projections; 1/sqrt(head_dim) folded into the Q section.
    h_scale = 1.0 / math.sqrt(head_dim)
    kc = jax.random.split(ks[3], 3)
    conv_wq = jax.random.normal(kc[0], (num_layers, hid, hid)) * s * h_scale
    conv_wk = jax.random.normal(kc[1], (num_layers, hid, hid)) * s
    conv_wv = jax.random.normal(kc[2], (num_layers, hid, hid)) * s
    p["conv_wqkv"] = jnp.concatenate([conv_wq, conv_wk, conv_wv], axis=-1).astype(bf16)
    p["conv_g"] = jnp.ones((num_layers, 1, hid), jnp.float32)
    p["conv_b"] = jnp.zeros((num_layers, 1, hid), jnp.float32)

    ksa = jax.random.split(ks[4], 3)
    p["satt_wq"] = (jax.random.normal(ksa[0], (num_layers, hid, hid)) * s * h_scale).astype(bf16)
    p["satt_wkv"] = jnp.concatenate(
        [jax.random.normal(ksa[1], (num_layers, hid, hid)) * s,
         jax.random.normal(ksa[2], (num_layers, hid, hid)) * s], axis=-1).astype(bf16)
    p["satt_g"] = jnp.ones((num_layers, 1, hid), jnp.float32)
    p["satt_b"] = jnp.zeros((num_layers, 1, hid), jnp.float32)
    return p


# ----------------------------------------------------------------------------- forward

def graph_star_forward(p, x_raw, edge_index, edge_type, batch, *, hid, num_star,
                       heads, num_layers, self_loop_type, node_to_star_type):
    num_node = x_raw.shape[0]
    num_graph = 1  # matches the reference forward

    # Edge-index bookkeeping (pure index glue, as in the torch module).
    edge_index, edge_type = add_self_loop_edge(edge_index, edge_type, num_node,
                                               self_loop_type)
    edge_index, edge_type = add_star_edge(edge_index, edge_type, num_node, batch,
                                          num_star, node_to_star_type)
    n_total = num_node + num_star * num_graph
    # Row-pad to a bf16-friendly sublane multiple; pad rows are masked out.
    n_pad = ((n_total + 15) // 16) * 16

    # Dense adjacency -> single additive f32 mask bias (built once, no per-layer where).
    adj = jnp.zeros((n_pad, n_pad), jnp.bool_).at[edge_index[1], edge_index[0]].set(True)
    pad_ids = jnp.arange(n_total, n_pad)
    adj = adj.at[pad_ids, pad_ids].set(True)   # keep pad-row softmax well-defined
    conv_bias = jnp.where(adj, 0.0, NEG_INF).astype(jnp.float32)
    star_kbias = jnp.where(jnp.arange(n_pad)[None, :] < n_total,
                           0.0, NEG_INF).astype(jnp.float32)

    out_rows = n_total + num_star
    kern = functools.partial(
        graph_star_fused_kernel,
        num_node=num_node, num_star=num_star, hid=hid, heads=heads,
        head_dim=hid // heads, num_layers=num_layers, n_total=n_total)

    args = (x_raw, conv_bias, star_kbias, p["fl_w"], p["fl_b"],
            p["init_wq"], p["init_wkv"], p["init_g"], p["init_b"],
            p["conv_wqkv"], p["conv_g"], p["conv_b"],
            p["satt_wq"], p["satt_wkv"], p["satt_g"], p["satt_b"])

    # grid=() -> whole arrays in VMEM, copied exactly once (no double buffering),
    # the entire forward runs inside a single kernel invocation.
    out = pl.pallas_call(
        kern,
        out_shape=jax.ShapeDtypeStruct((out_rows, hid), jnp.float32),
        scratch_shapes=[pltpu.VMEM((n_pad, hid), jnp.float32)],
    )(*args)

    x_out = out[:n_total]
    stars_out = out[n_total:].reshape(num_graph, num_star, hid)
    # cross_layer=False in this configuration -> return (x, stars), as the module does.
    return x_out, stars_out


# ----------------------------------------------------------------------------- main

if __name__ == "__main__":
    key = jax.random.PRNGKey(0)
    N, F, HID, NUM_STAR, HEADS, LAYERS = 16, 8, 32, 4, 4, 3
    SELF_LOOP_TYPE, NODE_TO_STAR_TYPE = 1, 2

    k_x, k_src, k_dst, k_param = jax.random.split(key, 4)
    x_raw = jax.random.normal(k_x, (N, F), jnp.float32)
    E = 24
    src = jax.random.randint(k_src, (E,), 0, N, dtype=jnp.int32)
    dst = jax.random.randint(k_dst, (E,), 0, N, dtype=jnp.int32)
    edge_index = jnp.stack([src, dst], axis=0)          # [2, E]
    edge_type = jnp.zeros((E,), jnp.int32)
    batch = jnp.zeros((N,), jnp.int32)                  # single graph

    params = init_params(k_param, F, HID, NUM_STAR, HEADS, LAYERS)

    fwd = jax.jit(functools.partial(
        graph_star_forward,
        hid=HID, num_star=NUM_STAR, heads=HEADS, num_layers=LAYERS,
        self_loop_type=SELF_LOOP_TYPE, node_to_star_type=NODE_TO_STAR_TYPE))

    x_out, stars_out = fwd(params, x_raw, edge_index, edge_type, batch)
    jax.block_until_ready((x_out, stars_out))

    assert x_out.shape == (N + NUM_STAR, HID)
    assert stars_out.shape == (1, NUM_STAR, HID)
    assert bool(jnp.all(jnp.isfinite(x_out))) and bool(jnp.all(jnp.isfinite(stars_out)))
    print("KERNEL_OK")
</pallas_src>

<mosaic_0001>
module attributes {stable_mosaic.version = 11 : i64} {
  func.func @graph_star_fused_kernel(%arg0: memref<16x8xf32, #tpu.memory_space<vmem>>, %arg1: memref<32x32xf32, #tpu.memory_space<vmem>>, %arg2: memref<1x32xf32, #tpu.memory_space<vmem>>, %arg3: memref<8x32xbf16, #tpu.memory_space<vmem>>, %arg4: memref<1x32xf32, #tpu.memory_space<vmem>>, %arg5: memref<32x128xbf16, #tpu.memory_space<vmem>>, %arg6: memref<32x256xbf16, #tpu.memory_space<vmem>>, %arg7: memref<4x32xf32, #tpu.memory_space<vmem>>, %arg8: memref<4x32xf32, #tpu.memory_space<vmem>>, %arg9: memref<3x32x96xbf16, #tpu.memory_space<vmem>>, %arg10: memref<3x1x32xf32, #tpu.memory_space<vmem>>, %arg11: memref<3x1x32xf32, #tpu.memory_space<vmem>>, %arg12: memref<3x32x32xbf16, #tpu.memory_space<vmem>>, %arg13: memref<3x32x64xbf16, #tpu.memory_space<vmem>>, %arg14: memref<3x1x32xf32, #tpu.memory_space<vmem>>, %arg15: memref<3x1x32xf32, #tpu.memory_space<vmem>>, %arg16: memref<24x32xf32, #tpu.memory_space<vmem>>, %arg17: memref<32x32xf32, #tpu.memory_space<vmem>>) attributes {dimension_semantics = [], scalar_prefetch = 0 : i64, scratch_operands = 1 : i64, tpu.core_type = #tpu.core_type<tc>} {
    %c0 = arith.constant 0 : index
    %c0_0 = arith.constant 0 : index
    %0 = vector.load %arg0[%c0, %c0_0] : memref<16x8xf32, #tpu.memory_space<vmem>>, vector<16x8xf32>
    %1 = arith.truncf %0 : vector<16x8xf32> to vector<16x8xbf16>
    %c0_1 = arith.constant 0 : index
    %c0_2 = arith.constant 0 : index
    %2 = vector.load %arg3[%c0_1, %c0_2] : memref<8x32xbf16, #tpu.memory_space<vmem>>, vector<8x32xbf16>
    %cst = arith.constant dense<0.000000e+00> : vector<16x32xf32>
    %3 = tpu.matmul %1, %2, %cst {dimension_numbers = #tpu.dot_dimension_numbers<[1], [0], [0], [1], [0, 0, 1, 1], [], []>} : vector<16x8xbf16>, vector<8x32xbf16>, vector<16x32xf32> -> vector<16x32xf32>
    %c0_3 = arith.constant 0 : index
    %c0_4 = arith.constant 0 : index
    %4 = vector.load %arg4[%c0_3, %c0_4] : memref<1x32xf32, #tpu.memory_space<vmem>>, vector<1x32xf32>
    %5 = vector.broadcast %4 : vector<1x32xf32> to vector<16x32xf32>
    %6 = arith.addf %3, %5 : vector<16x32xf32>
    %cst_5 = arith.constant 0.000000e+00 : f32
    %7 = vector.broadcast %cst_5 : f32 to vector<16x32xf32>
    %8 = arith.maximumf %6, %7 : vector<16x32xf32>
    %9 = arith.truncf %8 : vector<16x32xf32> to vector<16x32xbf16>
    %cst_6 = arith.constant dense<0.000000e+00> : vector<32xf32>
    %10 = vector.multi_reduction <add>, %8, %cst_6 [0] : vector<16x32xf32> to vector<32xf32>
    %11 = vector.shape_cast %10 : vector<32xf32> to vector<1x32xf32>
    %cst_7 = arith.constant 1.600000e+01 : f32
    %12 = vector.broadcast %cst_7 : f32 to vector<1x32xf32>
    %13 = arith.divf %11, %12 : vector<1x32xf32>
    %14 = arith.truncf %13 : vector<1x32xf32> to vector<1x32xbf16>
    %c0_8 = arith.constant 0 : index
    %c0_9 = arith.constant 0 : index
    %15 = vector.load %arg5[%c0_8, %c0_9] : memref<32x128xbf16, #tpu.memory_space<vmem>>, vector<32x128xbf16>
    %cst_10 = arith.constant dense<0.000000e+00> : vector<1x128xf32>
    %16 = tpu.matmul %14, %15, %cst_10 {dimension_numbers = #tpu.dot_dimension_numbers<[1], [0], [0], [1], [0, 0, 1, 1], [], []>} : vector<1x32xbf16>, vector<32x128xbf16>, vector<1x128xf32> -> vector<1x128xf32>
    %17 = arith.truncf %16 : vector<1x128xf32> to vector<1x128xbf16>
    %c0_11 = arith.constant 0 : index
    %c0_12 = arith.constant 0 : index
    %18 = vector.load %arg6[%c0_11, %c0_12] : memref<32x256xbf16, #tpu.memory_space<vmem>>, vector<32x256xbf16>
    %cst_13 = arith.constant dense<0.000000e+00> : vector<16x256xf32>
    %19 = tpu.matmul %9, %18, %cst_13 {dimension_numbers = #tpu.dot_dimension_numbers<[1], [0], [0], [1], [0, 0, 1, 1], [], []>} : vector<16x32xbf16>, vector<32x256xbf16>, vector<16x256xf32> -> vector<16x256xf32>
    %20 = arith.truncf %19 : vector<16x256xf32> to vector<16x256xbf16>
    %21 = vector.extract_strided_slice %17 {offsets = [0, 0], sizes = [1, 32], strides = [1, 1]} : vector<1x128xbf16> to vector<1x32xbf16>
    %22 = vector.extract_strided_slice %20 {offsets = [0, 0], sizes = [16, 32], strides = [1, 1]} : vector<16x256xbf16> to vector<16x32xbf16>
    %cst_14 = arith.constant dense<0.000000e+00> : vector<1x16xf32>
    %23 = tpu.matmul %21, %22, %cst_14 {dimension_numbers = #tpu.dot_dimension_numbers<[1], [1], [0], [0], [0, 0, 1, 0], [], []>} : vector<1x32xbf16>, vector<16x32xbf16>, vector<1x16xf32> -> vector<1x16xf32>
    %cst_15 = arith.constant dense<0xFF800000> : vector<1xf32>
    %24 = vector.multi_reduction <maximumf>, %23, %cst_15 [1] : vector<1x16xf32> to vector<1xf32>
    %25 = vector.shape_cast %24 : vector<1xf32> to vector<1x1xf32>
    %26 = vector.broadcast %25 : vector<1x1xf32> to vector<1x16xf32>
    %27 = arith.subf %23, %26 : vector<1x16xf32>
    %28 = math.exp %27 : vector<1x16xf32>
    %cst_16 = arith.constant dense<0.000000e+00> : vector<1xf32>
    %29 = vector.multi_reduction <add>, %28, %cst_16 [1] : vector<1x16xf32> to vector<1xf32>
    %30 = vector.shape_cast %29 : vector<1xf32> to vector<1x1xf32>
    %31 = tpu.reciprocal %30 {approx = true} : vector<1x1xf32> -> vector<1x1xf32>
    %32 = vector.broadcast %31 : vector<1x1xf32> to vector<1x16xf32>
    %33 = arith.mulf %28, %32 : vector<1x16xf32>
    %34 = arith.truncf %33 : vector<1x16xf32> to vector<1x16xbf16>
    %35 = vector.extract_strided_slice %20 {offsets = [0, 128], sizes = [16, 32], strides = [1, 1]} : vector<16x256xbf16> to vector<16x32xbf16>
    %cst_17 = arith.constant dense<0.000000e+00> : vector<1x32xf32>
    %36 = tpu.matmul %34, %35, %cst_17 {dimension_numbers = #tpu.dot_dimension_numbers<[1], [0], [0], [1], [0, 0, 1, 1], [], []>} : vector<1x16xbf16>, vector<16x32xbf16>, vector<1x32xf32> -> vector<1x32xf32>
    %37 = vector.extract_strided_slice %17 {offsets = [0, 32], sizes = [1, 32], strides = [1, 1]} : vector<1x128xbf16> to vector<1x32xbf16>
    %38 = vector.extract_strided_slice %20 {offsets = [0, 32], sizes = [16, 32], strides = [1, 1]} : vector<16x256xbf16> to vector<16x32xbf16>
    %cst_18 = arith.constant dense<0.000000e+00> : vector<1x16xf32>
    %39 = tpu.matmul %37, %38, %cst_18 {dimension_numbers = #tpu.dot_dimension_numbers<[1], [1], [0], [0], [0, 0, 1, 0], [], []>} : vector<1x32xbf16>, vector<16x32xbf16>, vector<1x16xf32> -> vector<1x16xf32>
    %cst_19 = arith.constant dense<0xFF800000> : vector<1xf32>
    %40 = vector.multi_reduction <maximumf>, %39, %cst_19 [1] : vector<1x16xf32> to vector<1xf32>
    %41 = vector.shape_cast %40 : vector<1xf32> to vector<1x1xf32>
    %42 = vector.broadcast %41 : vector<1x1xf32> to vector<1x16xf32>
    %43 = arith.subf %39, %42 : vector<1x16xf32>
    %44 = math.exp %43 : vector<1x16xf32>
    %cst_20 = arith.constant dense<0.000000e+00> : vector<1xf32>
    %45 = vector.multi_reduction <add>, %44, %cst_20 [1] : vector<1x16xf32> to vector<1xf32>
    %46 = vector.shape_cast %45 : vector<1xf32> to vector<1x1xf32>
    %47 = tpu.reciprocal %46 {approx = true} : vector<1x1xf32> -> vector<1x1xf32>
    %48 = vector.broadcast %47 : vector<1x1xf32> to vector<1x16xf32>
    %49 = arith.mulf %44, %48 : vector<1x16xf32>
    %50 = arith.truncf %49 : vector<1x16xf32> to vector<1x16xbf16>
    %51 = vector.extract_strided_slice %20 {offsets = [0, 160], sizes = [16, 32], strides = [1, 1]} : vector<16x256xbf16> to vector<16x32xbf16>
    %cst_21 = arith.constant dense<0.000000e+00> : vector<1x32xf32>
    %52 = tpu.matmul %50, %51, %cst_21 {dimension_numbers = #tpu.dot_dimension_numbers<[1], [0], [0], [1], [0, 0, 1, 1], [], []>} : vector<1x16xbf16>, vector<16x32xbf16>, vector<1x32xf32> -> vector<1x32xf32>
    %53 = vector.extract_strided_slice %17 {offsets = [0, 64], sizes = [1, 32], strides = [1, 1]} : vector<1x128xbf16> to vector<1x32xbf16>
    %54 = vector.extract_strided_slice %20 {offsets = [0, 64], sizes = [16, 32], strides = [1, 1]} : vector<16x256xbf16> to vector<16x32xbf16>
    %cst_22 = arith.constant dense<0.000000e+00> : vector<1x16xf32>
    %55 = tpu.matmul %53, %54, %cst_22 {dimension_numbers = #tpu.dot_dimension_numbers<[1], [1], [0], [0], [0, 0, 1, 0], [], []>} : vector<1x32xbf16>, vector<16x32xbf16>, vector<1x16xf32> -> vector<1x16xf32>
    %cst_23 = arith.constant dense<0xFF800000> : vector<1xf32>
    %56 = vector.multi_reduction <maximumf>, %55, %cst_23 [1] : vector<1x16xf32> to vector<1xf32>
    %57 = vector.shape_cast %56 : vector<1xf32> to vector<1x1xf32>
    %58 = vector.broadcast %57 : vector<1x1xf32> to vector<1x16xf32>
    %59 = arith.subf %55, %58 : vector<1x16xf32>
    %60 = math.exp %59 : vector<1x16xf32>
    %cst_24 = arith.constant dense<0.000000e+00> : vector<1xf32>
    %61 = vector.multi_reduction <add>, %60, %cst_24 [1] : vector<1x16xf32> to vector<1xf32>
    %62 = vector.shape_cast %61 : vector<1xf32> to vector<1x1xf32>
    %63 = tpu.reciprocal %62 {approx = true} : vector<1x1xf32> -> vector<1x1xf32>
    %64 = vector.broadcast %63 : vector<1x1xf32> to vector<1x16xf32>
    %65 = arith.mulf %60, %64 : vector<1x16xf32>
    %66 = arith.truncf %65 : vector<1x16xf32> to vector<1x16xbf16>
    %67 = vector.extract_strided_slice %20 {offsets = [0, 192], sizes = [16, 32], strides = [1, 1]} : vector<16x256xbf16> to vector<16x32xbf16>
    %cst_25 = arith.constant dense<0.000000e+00> : vector<1x32xf32>
    %68 = tpu.matmul %66, %67, %cst_25 {dimension_numbers = #tpu.dot_dimension_numbers<[1], [0], [0], [1], [0, 0, 1, 1], [], []>} : vector<1x16xbf16>, vector<16x32xbf16>, vector<1x32xf32> -> vector<1x32xf32>
    %69 = vector.extract_strided_slice %17 {offsets = [0, 96], sizes = [1, 32], strides = [1, 1]} : vector<1x128xbf16> to vector<1x32xbf16>
    %70 = vector.extract_strided_slice %20 {offsets = [0, 96], sizes = [16, 32], strides = [1, 1]} : vector<16x256xbf16> to vector<16x32xbf16>
    %cst_26 = arith.constant dense<0.000000e+00> : vector<1x16xf32>
    %71 = tpu.matmul %69, %70, %cst_26 {dimension_numbers = #tpu.dot_dimension_numbers<[1], [1], [0], [0], [0, 0, 1, 0], [], []>} : vector<1x32xbf16>, vector<16x32xbf16>, vector<1x16xf32> -> vector<1x16xf32>
    %cst_27 = arith.constant dense<0xFF800000> : vector<1xf32>
    %72 = vector.multi_reduction <maximumf>, %71, %cst_27 [1] : vector<1x16xf32> to vector<1xf32>
    %73 = vector.shape_cast %72 : vector<1xf32> to vector<1x1xf32>
    %74 = vector.broadcast %73 : vector<1x1xf32> to vector<1x16xf32>
    %75 = arith.subf %71, %74 : vector<1x16xf32>
    %76 = math.exp %75 : vector<1x16xf32>
    %cst_28 = arith.constant dense<0.000000e+00> : vector<1xf32>
    %77 = vector.multi_reduction <add>, %76, %cst_28 [1] : vector<1x16xf32> to vector<1xf32>
    %78 = vector.shape_cast %77 : vector<1xf32> to vector<1x1xf32>
    %79 = tpu.reciprocal %78 {approx = true} : vector<1x1xf32> -> vector<1x1xf32>
    %80 = vector.broadcast %79 : vector<1x1xf32> to vector<1x16xf32>
    %81 = arith.mulf %76, %80 : vector<1x16xf32>
    %82 = arith.truncf %81 : vector<1x16xf32> to vector<1x16xbf16>
    %83 = vector.extract_strided_slice %20 {offsets = [0, 224], sizes = [16, 32], strides = [1, 1]} : vector<16x256xbf16> to vector<16x32xbf16>
    %cst_29 = arith.constant dense<0.000000e+00> : vector<1x32xf32>
    %84 = tpu.matmul %82, %83, %cst_29 {dimension_numbers = #tpu.dot_dimension_numbers<[1], [0], [0], [1], [0, 0, 1, 1], [], []>} : vector<1x16xbf16>, vector<16x32xbf16>, vector<1x32xf32> -> vector<1x32xf32>
    %85 = tpu.concatenate %36, %52, %68, %84 in 0 : vector<1x32xf32>, vector<1x32xf32>, vector<1x32xf32>, vector<1x32xf32> -> vector<4x32xf32>
    %86 = vector.shape_cast %85 : vector<4x32xf32> to vector<1x4x32xf32>
    %cst_30 = arith.constant dense<0.000000e+00> : vector<1xf32>
    %87 = vector.multi_reduction <add>, %86, %cst_30 [1, 2] : vector<1x4x32xf32> to vector<1xf32>
    %88 = vector.shape_cast %87 : vector<1xf32> to vector<1x1x1xf32>
    %89 = vector.extract %88[0, 0, 0] : f32 from vector<1x1x1xf32>
    %90 = vector.broadcast %89 : f32 to vector<1x1xf32>
    %cst_31 = arith.constant 1.280000e+02 : f32
    %91 = vector.broadcast %cst_31 : f32 to vector<1x1xf32>
    %92 = arith.divf %90, %91 : vector<1x1xf32>
    %93 = vector.broadcast %92 : vector<1x1xf32> to vector<4x32xf32>
    %94 = arith.subf %85, %93 : vector<4x32xf32>
    %95 = arith.mulf %94, %94 : vector<4x32xf32>
    %96 = vector.shape_cast %95 : vector<4x32xf32> to vector<1x4x32xf32>
    %cst_32 = arith.constant dense<0.000000e+00> : vector<1xf32>
    %97 = vector.multi_reduction <add>, %96, %cst_32 [1, 2] : vector<1x4x32xf32> to vector<1xf32>
    %98 = vector.shape_cast %97 : vector<1xf32> to vector<1x1x1xf32>
    %99 = vector.extract %98[0, 0, 0] : f32 from vector<1x1x1xf32>
    %100 = vector.broadcast %99 : f32 to vector<1x1xf32>
    %cst_33 = arith.constant 1.280000e+02 : f32
    %101 = vector.broadcast %cst_33 : f32 to vector<1x1xf32>
    %102 = arith.divf %100, %101 : vector<1x1xf32>
    %103 = vector.broadcast %92 : vector<1x1xf32> to vector<4x32xf32>
    %104 = arith.subf %85, %103 : vector<4x32xf32>
    %cst_34 = arith.constant 9.99999974E-6 : f32
    %105 = vector.broadcast %cst_34 : f32 to vector<1x1xf32>
    %106 = arith.addf %102, %105 : vector<1x1xf32>
    %107 = math.rsqrt %106 : vector<1x1xf32>
    %108 = vector.broadcast %107 : vector<1x1xf32> to vector<4x32xf32>
    %109 = arith.mulf %104, %108 : vector<4x32xf32>
    %c0_35 = arith.constant 0 : index
    %c0_36 = arith.constant 0 : index
    %110 = vector.load %arg7[%c0_35, %c0_36] : memref<4x32xf32, #tpu.memory_space<vmem>>, vector<4x32xf32>
    %111 = arith.mulf %109, %110 : vector<4x32xf32>
    %c0_37 = arith.constant 0 : index
    %c0_38 = arith.constant 0 : index
    %112 = vector.load %arg8[%c0_37, %c0_38] : memref<4x32xf32, #tpu.memory_space<vmem>>, vector<4x32xf32>
    %113 = arith.addf %111, %112 : vector<4x32xf32>
    %cst_39 = arith.constant 0.000000e+00 : f32
    %114 = vector.broadcast %cst_39 : f32 to vector<32x32xf32>
    %c0_40 = arith.constant 0 : index
    %c0_41 = arith.constant 0 : index
    %115 = vector.load %arg17[%c0_40, %c0_41] : memref<32x32xf32, #tpu.memory_space<vmem>>, vector<32x32xf32>
    tpu.vector_store %arg17[%c0_40, %c0_41], %114 {strides = array<i32>} : memref<32x32xf32, #tpu.memory_space<vmem>>, vector<32x32xf32>,
    %c0_42 = arith.constant 0 : index
    %c0_43 = arith.constant 0 : index
    %116 = vector.load %arg17[%c0_42, %c0_43] : memref<32x32xf32, #tpu.memory_space<vmem>>, vector<16x32xf32>
    tpu.vector_store %arg17[%c0_42, %c0_43], %8 {strides = array<i32>} : memref<32x32xf32, #tpu.memory_space<vmem>>, vector<16x32xf32>,
    %c16 = arith.constant 16 : index
    %c0_44 = arith.constant 0 : index
    %117 = vector.load %arg17[%c16, %c0_44] : memref<32x32xf32, #tpu.memory_space<vmem>>, vector<4x32xf32>
    tpu.vector_store %arg17[%c16, %c0_44], %113 {strides = array<i32>} : memref<32x32xf32, #tpu.memory_space<vmem>>, vector<4x32xf32>,
    %c0_45 = arith.constant 0 : index
    %c0_46 = arith.constant 0 : index
    %118 = vector.load %arg1[%c0_45, %c0_46] : memref<32x32xf32, #tpu.memory_space<vmem>>, vector<32x32xf32>
    %c0_47 = arith.constant 0 : index
    %c0_48 = arith.constant 0 : index
    %119 = vector.load %arg2[%c0_47, %c0_48] : memref<1x32xf32, #tpu.memory_space<vmem>>, vector<1x32xf32>
    %c0_49 = arith.constant 0 : index
    %c0_50 = arith.constant 0 : index
    %120 = vector.load %arg17[%c0_49, %c0_50] : memref<32x32xf32, #tpu.memory_space<vmem>>, vector<32x32xf32>
    %121 = vector.extract_strided_slice %120 {offsets = [16, 0], sizes = [4, 32], strides = [1, 1]} : vector<32x32xf32> to vector<4x32xf32>
    %122 = arith.truncf %120 : vector<32x32xf32> to vector<32x32xbf16>
    %c0_51 = arith.constant 0 : index
    %c0_52 = arith.constant 0 : index
    %c0_53 = arith.constant 0 : index
    %123 = vector.load %arg9[%c0_51, %c0_52, %c0_53] : memref<3x32x96xbf16, #tpu.memory_space<vmem>>, vector<1x32x96xbf16>
    %124 = vector.shape_cast %123 : vector<1x32x96xbf16> to vector<32x96xbf16>
    %cst_54 = arith.constant dense<0.000000e+00> : vector<32x96xf32>
    %125 = tpu.matmul %122, %124, %cst_54 {dimension_numbers = #tpu.dot_dimension_numbers<[1], [0], [0], [1], [0, 0, 1, 1], [], []>} : vector<32x32xbf16>, vector<32x96xbf16>, vector<32x96xf32> -> vector<32x96xf32>
    %126 = arith.truncf %125 : vector<32x96xf32> to vector<32x96xbf16>
    %127 = vector.extract_strided_slice %126 {offsets = [0, 0], sizes = [32, 32], strides = [1, 1]} : vector<32x96xbf16> to vector<32x32xbf16>
    %128 = vector.extract_strided_slice %126 {offsets = [0, 32], sizes = [32, 32], strides = [1, 1]} : vector<32x96xbf16> to vector<32x32xbf16>
    %129 = vector.extract_strided_slice %126 {offsets = [0, 64], sizes = [32, 32], strides = [1, 1]} : vector<32x96xbf16> to vector<32x32xbf16>
    %130 = vector.extract_strided_slice %127 {offsets = [0, 0], sizes = [32, 8], strides = [1, 1]} : vector<32x32xbf16> to vector<32x8xbf16>
    %131 = vector.extract_strided_slice %128 {offsets = [0, 0], sizes = [32, 8], strides = [1, 1]} : vector<32x32xbf16> to vector<32x8xbf16>
    %cst_55 = arith.constant dense<0.000000e+00> : vector<32x32xf32>
    %132 = tpu.matmul %130, %131, %cst_55 {dimension_numbers = #tpu.dot_dimension_numbers<[1], [1], [0], [0], [0, 0, 1, 0], [], []>} : vector<32x8xbf16>, vector<32x8xbf16>, vector<32x32xf32> -> vector<32x32xf32>
    %133 = arith.addf %132, %118 : vector<32x32xf32>
    %cst_56 = arith.constant dense<0xFF800000> : vector<32xf32>
    %134 = vector.multi_reduction <maximumf>, %133, %cst_56 [1] : vector<32x32xf32> to vector<32xf32>
    %135 = vector.shape_cast %134 : vector<32xf32> to vector<32x1xf32>
    %136 = vector.broadcast %135 : vector<32x1xf32> to vector<32x32xf32>
    %137 = arith.subf %133, %136 : vector<32x32xf32>
    %138 = math.exp %137 : vector<32x32xf32>
    %cst_57 = arith.constant dense<0.000000e+00> : vector<32xf32>
    %139 = vector.multi_reduction <add>, %138, %cst_57 [1] : vector<32x32xf32> to vector<32xf32>
    %140 = vector.shape_cast %139 : vector<32xf32> to vector<32x1xf32>
    %141 = tpu.reciprocal %140 {approx = true} : vector<32x1xf32> -> vector<32x1xf32>
    %142 = vector.broadcast %141 : vector<32x1xf32> to vector<32x32xf32>
    %143 = arith.mulf %138, %142 : vector<32x32xf32>
    %144 = arith.truncf %143 : vector<32x32xf32> to vector<32x32xbf16>
    %145 = vector.extract_strided_slice %129 {offsets = [0, 0], sizes = [32, 8], strides = [1, 1]} : vector<32x32xbf16> to vector<32x8xbf16>
    %cst_58 = arith.constant dense<0.000000e+00> : vector<32x8xf32>
    %146 = tpu.matmul %144, %145, %cst_58 {dimension_numbers = #tpu.dot_dimension_numbers<[1], [0], [0], [1], [0, 0, 1, 1], [], []>} : vector<32x32xbf16>, vector<32x8xbf16>, vector<32x8xf32> -> vector<32x8xf32>
    %147 = vector.extract_strided_slice %127 {offsets = [0, 8], sizes = [32, 8], strides = [1, 1]} : vector<32x32xbf16> to vector<32x8xbf16>
    %148 = vector.extract_strided_slice %128 {offsets = [0, 8], sizes = [32, 8], strides = [1, 1]} : vector<32x32xbf16> to vector<32x8xbf16>
    %cst_59 = arith.constant dense<0.000000e+00> : vector<32x32xf32>
    %149 = tpu.matmul %147, %148, %cst_59 {dimension_numbers = #tpu.dot_dimension_numbers<[1], [1], [0], [0], [0, 0, 1, 0], [], []>} : vector<32x8xbf16>, vector<32x8xbf16>, vector<32x32xf32> -> vector<32x32xf32>
    %150 = arith.addf %149, %118 : vector<32x32xf32>
    %cst_60 = arith.constant dense<0xFF800000> : vector<32xf32>
    %151 = vector.multi_reduction <maximumf>, %150, %cst_60 [1] : vector<32x32xf32> to vector<32xf32>
    %152 = vector.shape_cast %151 : vector<32xf32> to vector<32x1xf32>
    %153 = vector.broadcast %152 : vector<32x1xf32> to vector<32x32xf32>
    %154 = arith.subf %150, %153 : vector<32x32xf32>
    %155 = math.exp %154 : vector<32x32xf32>
    %cst_61 = arith.constant dense<0.000000e+00> : vector<32xf32>
    %156 = vector.multi_reduction <add>, %155, %cst_61 [1] : vector<32x32xf32> to vector<32xf32>
    %157 = vector.shape_cast %156 : vector<32xf32> to vector<32x1xf32>
    %158 = tpu.reciprocal %157 {approx = true} : vector<32x1xf32> -> vector<32x1xf32>
    %159 = vector.broadcast %158 : vector<32x1xf32> to vector<32x32xf32>
    %160 = arith.mulf %155, %159 : vector<32x32xf32>
    %161 = arith.truncf %160 : vector<32x32xf32> to vector<32x32xbf16>
    %162 = vector.extract_strided_slice %129 {offsets = [0, 8], sizes = [32, 8], strides = [1, 1]} : vector<32x32xbf16> to vector<32x8xbf16>
    %cst_62 = arith.constant dense<0.000000e+00> : vector<32x8xf32>
    %163 = tpu.matmul %161, %162, %cst_62 {dimension_numbers = #tpu.dot_dimension_numbers<[1], [0], [0], [1], [0, 0, 1, 1], [], []>} : vector<32x32xbf16>, vector<32x8xbf16>, vector<32x8xf32> -> vector<32x8xf32>
    %164 = vector.extract_strided_slice %127 {offsets = [0, 16], sizes = [32, 8], strides = [1, 1]} : vector<32x32xbf16> to vector<32x8xbf16>
    %165 = vector.extract_strided_slice %128 {offsets = [0, 16], sizes = [32, 8], strides = [1, 1]} : vector<32x32xbf16> to vector<32x8xbf16>
    %cst_63 = arith.constant dense<0.000000e+00> : vector<32x32xf32>
    %166 = tpu.matmul %164, %165, %cst_63 {dimension_numbers = #tpu.dot_dimension_numbers<[1], [1], [0], [0], [0, 0, 1, 0], [], []>} : vector<32x8xbf16>, vector<32x8xbf16>, vector<32x32xf32> -> vector<32x32xf32>
    %167 = arith.addf %166, %118 : vector<32x32xf32>
    %cst_64 = arith.constant dense<0xFF800000> : vector<32xf32>
    %168 = vector.multi_reduction <maximumf>, %167, %cst_64 [1] : vector<32x32xf32> to vector<32xf32>
    %169 = vector.shape_cast %168 : vector<32xf32> to vector<32x1xf32>
    %170 = vector.broadcast %169 : vector<32x1xf32> to vector<32x32xf32>
    %171 = arith.subf %167, %170 : vector<32x32xf32>
    %172 = math.exp %171 : vector<32x32xf32>
    %cst_65 = arith.constant dense<0.000000e+00> : vector<32xf32>
    %173 = vector.multi_reduction <add>, %172, %cst_65 [1] : vector<32x32xf32> to vector<32xf32>
    %174 = vector.shape_cast %173 : vector<32xf32> to vector<32x1xf32>
    %175 = tpu.reciprocal %174 {approx = true} : vector<32x1xf32> -> vector<32x1xf32>
    %176 = vector.broadcast %175 : vector<32x1xf32> to vector<32x32xf32>
    %177 = arith.mulf %172, %176 : vector<32x32xf32>
    %178 = arith.truncf %177 : vector<32x32xf32> to vector<32x32xbf16>
    %179 = vector.extract_strided_slice %129 {offsets = [0, 16], sizes = [32, 8], strides = [1, 1]} : vector<32x32xbf16> to vector<32x8xbf16>
    %cst_66 = arith.constant dense<0.000000e+00> : vector<32x8xf32>
    %180 = tpu.matmul %178, %179, %cst_66 {dimension_numbers = #tpu.dot_dimension_numbers<[1], [0], [0], [1], [0, 0, 1, 1], [], []>} : vector<32x32xbf16>, vector<32x8xbf16>, vector<32x8xf32> -> vector<32x8xf32>
    %181 = vector.extract_strided_slice %127 {offsets = [0, 24], sizes = [32, 8], strides = [1, 1]} : vector<32x32xbf16> to vector<32x8xbf16>
    %182 = vector.extract_strided_slice %128 {offsets = [0, 24], sizes = [32, 8], strides = [1, 1]} : vector<32x32xbf16> to vector<32x8xbf16>
    %cst_67 = arith.constant dense<0.000000e+00> : vector<32x32xf32>
    %183 = tpu.matmul %181, %182, %cst_67 {dimension_numbers = #tpu.dot_dimension_numbers<[1], [1], [0], [0], [0, 0, 1, 0], [], []>} : vector<32x8xbf16>, vector<32x8xbf16>, vector<32x32xf32> -> vector<32x32xf32>
    %184 = arith.addf %183, %118 : vector<32x32xf32>
    %cst_68 = arith.constant dense<0xFF800000> : vector<32xf32>
    %185 = vector.multi_reduction <maximumf>, %184, %cst_68 [1] : vector<32x32xf32> to vector<32xf32>
    %186 = vector.shape_cast %185 : vector<32xf32> to vector<32x1xf32>
    %187 = vector.broadcast %186 : vector<32x1xf32> to vector<32x32xf32>
    %188 = arith.subf %184, %187 : vector<32x32xf32>
    %189 = math.exp %188 : vector<32x32xf32>
    %cst_69 = arith.constant dense<0.000000e+00> : vector<32xf32>
    %190 = vector.multi_reduction <add>, %189, %cst_69 [1] : vector<32x32xf32> to vector<32xf32>
    %191 = vector.shape_cast %190 : vector<32xf32> to vector<32x1xf32>
    %192 = tpu.reciprocal %191 {approx = true} : vector<32x1xf32> -> vector<32x1xf32>
    %193 = vector.broadcast %192 : vector<32x1xf32> to vector<32x32xf32>
    %194 = arith.mulf %189, %193 : vector<32x32xf32>
    %195 = arith.truncf %194 : vector<32x32xf32> to vector<32x32xbf16>
    %196 = vector.extract_strided_slice %129 {offsets = [0, 24], sizes = [32, 8], strides = [1, 1]} : vector<32x32xbf16> to vector<32x8xbf16>
    %cst_70 = arith.constant dense<0.000000e+00> : vector<32x8xf32>
    %197 = tpu.matmul %195, %196, %cst_70 {dimension_numbers = #tpu.dot_dimension_numbers<[1], [0], [0], [1], [0, 0, 1, 1], [], []>} : vector<32x32xbf16>, vector<32x8xbf16>, vector<32x8xf32> -> vector<32x8xf32>
    %198 = tpu.concatenate %146, %163, %180, %197 in 1 : vector<32x8xf32>, vector<32x8xf32>, vector<32x8xf32>, vector<32x8xf32> -> vector<32x32xf32>
    %199 = arith.addf %198, %120 : vector<32x32xf32>
    %c0_71 = arith.constant 0 : index
    %c0_72 = arith.constant 0 : index
    %c0_73 = arith.constant 0 : index
    %200 = vector.load %arg10[%c0_71, %c0_72, %c0_73] : memref<3x1x32xf32, #tpu.memory_space<vmem>>, vector<1x1x32xf32>
    %201 = vector.shape_cast %200 : vector<1x1x32xf32> to vector<1x32xf32>
    %c0_74 = arith.constant 0 : index
    %c0_75 = arith.constant 0 : index
    %c0_76 = arith.constant 0 : index
    %202 = vector.load %arg11[%c0_74, %c0_75, %c0_76] : memref<3x1x32xf32, #tpu.memory_space<vmem>>, vector<1x1x32xf32>
    %203 = vector.shape_cast %202 : vector<1x1x32xf32> to vector<1x32xf32>
    %cst_77 = arith.constant dense<0.000000e+00> : vector<32xf32>
    %204 = vector.multi_reduction <add>, %199, %cst_77 [1] : vector<32x32xf32> to vector<32xf32>
    %205 = vector.shape_cast %204 : vector<32xf32> to vector<32x1xf32>
    %cst_78 = arith.constant 3.200000e+01 : f32
    %206 = vector.broadcast %cst_78 : f32 to vector<32x1xf32>
    %207 = arith.divf %205, %206 : vector<32x1xf32>
    %208 = vector.broadcast %207 : vector<32x1xf32> to vector<32x32xf32>
    %209 = arith.subf %199, %208 : vector<32x32xf32>
    %210 = arith.mulf %209, %209 : vector<32x32xf32>
    %cst_79 = arith.constant dense<0.000000e+00> : vector<32xf32>
    %211 = vector.multi_reduction <add>, %210, %cst_79 [1] : vector<32x32xf32> to vector<32xf32>
    %212 = vector.shape_cast %211 : vector<32xf32> to vector<32x1xf32>
    %cst_80 = arith.constant 3.200000e+01 : f32
    %213 = vector.broadcast %cst_80 : f32 to vector<32x1xf32>
    %214 = arith.divf %212, %213 : vector<32x1xf32>
    %215 = vector.broadcast %207 : vector<32x1xf32> to vector<32x32xf32>
    %216 = arith.subf %199, %215 : vector<32x32xf32>
    %cst_81 = arith.constant 9.99999974E-6 : f32
    %217 = vector.broadcast %cst_81 : f32 to vector<32x1xf32>
    %218 = arith.addf %214, %217 : vector<32x1xf32>
    %219 = math.rsqrt %218 : vector<32x1xf32>
    %220 = vector.broadcast %219 : vector<32x1xf32> to vector<32x32xf32>
    %221 = arith.mulf %216, %220 : vector<32x32xf32>
    %222 = vector.broadcast %201 : vector<1x32xf32> to vector<32x32xf32>
    %223 = arith.mulf %221, %222 : vector<32x32xf32>
    %224 = vector.broadcast %203 : vector<1x32xf32> to vector<32x32xf32>
    %225 = arith.addf %223, %224 : vector<32x32xf32>
    %226 = arith.truncf %225 : vector<32x32xf32> to vector<32x32xbf16>
    %227 = arith.truncf %121 : vector<4x32xf32> to vector<4x32xbf16>
    %c0_82 = arith.constant 0 : index
    %c0_83 = arith.constant 0 : index
    %c0_84 = arith.constant 0 : index
    %228 = vector.load %arg12[%c0_82, %c0_83, %c0_84] : memref<3x32x32xbf16, #tpu.memory_space<vmem>>, vector<1x32x32xbf16>
    %229 = vector.shape_cast %228 : vector<1x32x32xbf16> to vector<32x32xbf16>
    %cst_85 = arith.constant dense<0.000000e+00> : vector<4x32xf32>
    %230 = tpu.matmul %227, %229, %cst_85 {dimension_numbers = #tpu.dot_dimension_numbers<[1], [0], [0], [1], [0, 0, 1, 1], [], []>} : vector<4x32xbf16>, vector<32x32xbf16>, vector<4x32xf32> -> vector<4x32xf32>
    %231 = arith.truncf %230 : vector<4x32xf32> to vector<4x32xbf16>
    %c0_86 = arith.constant 0 : index
    %c0_87 = arith.constant 0 : index
    %c0_88 = arith.constant 0 : index
    %232 = vector.load %arg13[%c0_86, %c0_87, %c0_88] : memref<3x32x64xbf16, #tpu.memory_space<vmem>>, vector<1x32x64xbf16>
    %233 = vector.shape_cast %232 : vector<1x32x64xbf16> to vector<32x64xbf16>
    %cst_89 = arith.constant dense<0.000000e+00> : vector<32x64xf32>
    %234 = tpu.matmul %226, %233, %cst_89 {dimension_numbers = #tpu.dot_dimension_numbers<[1], [0], [0], [1], [0, 0, 1, 1], [], []>} : vector<32x32xbf16>, vector<32x64xbf16>, vector<32x64xf32> -> vector<32x64xf32>
    %235 = arith.truncf %234 : vector<32x64xf32> to vector<32x64xbf16>
    %236 = vector.extract_strided_slice %235 {offsets = [0, 0], sizes = [32, 32], strides = [1, 1]} : vector<32x64xbf16> to vector<32x32xbf16>
    %237 = vector.extract_strided_slice %235 {offsets = [0, 32], sizes = [32, 32], strides = [1, 1]} : vector<32x64xbf16> to vector<32x32xbf16>
    %238 = vector.extract_strided_slice %231 {offsets = [0, 0], sizes = [4, 8], strides = [1, 1]} : vector<4x32xbf16> to vector<4x8xbf16>
    %239 = vector.extract_strided_slice %236 {offsets = [0, 0], sizes = [32, 8], strides = [1, 1]} : vector<32x32xbf16> to vector<32x8xbf16>
    %cst_90 = arith.constant dense<0.000000e+00> : vector<4x32xf32>
    %240 = tpu.matmul %238, %239, %cst_90 {dimension_numbers = #tpu.dot_dimension_numbers<[1], [1], [0], [0], [0, 0, 1, 0], [], []>} : vector<4x8xbf16>, vector<32x8xbf16>, vector<4x32xf32> -> vector<4x32xf32>
    %241 = vector.broadcast %119 : vector<1x32xf32> to vector<4x32xf32>
    %242 = arith.addf %240, %241 : vector<4x32xf32>
    %cst_91 = arith.constant dense<0xFF800000> : vector<4xf32>
    %243 = vector.multi_reduction <maximumf>, %242, %cst_91 [1] : vector<4x32xf32> to vector<4xf32>
    %244 = vector.shape_cast %243 : vector<4xf32> to vector<4x1xf32>
    %245 = vector.broadcast %244 : vector<4x1xf32> to vector<4x32xf32>
    %246 = arith.subf %242, %245 : vector<4x32xf32>
    %247 = math.exp %246 : vector<4x32xf32>
    %cst_92 = arith.constant dense<0.000000e+00> : vector<4xf32>
    %248 = vector.multi_reduction <add>, %247, %cst_92 [1] : vector<4x32xf32> to vector<4xf32>
    %249 = vector.shape_cast %248 : vector<4xf32> to vector<4x1xf32>
    %250 = tpu.reciprocal %249 {approx = true} : vector<4x1xf32> -> vector<4x1xf32>
    %251 = vector.broadcast %250 : vector<4x1xf32> to vector<4x32xf32>
    %252 = arith.mulf %247, %251 : vector<4x32xf32>
    %253 = arith.truncf %252 : vector<4x32xf32> to vector<4x32xbf16>
    %254 = vector.extract_strided_slice %237 {offsets = [0, 0], sizes = [32, 8], strides = [1, 1]} : vector<32x32xbf16> to vector<32x8xbf16>
    %cst_93 = arith.constant dense<0.000000e+00> : vector<4x8xf32>
    %255 = tpu.matmul %253, %254, %cst_93 {dimension_numbers = #tpu.dot_dimension_numbers<[1], [0], [0], [1], [0, 0, 1, 1], [], []>} : vector<4x32xbf16>, vector<32x8xbf16>, vector<4x8xf32> -> vector<4x8xf32>
    %256 = vector.extract_strided_slice %231 {offsets = [0, 8], sizes = [4, 8], strides = [1, 1]} : vector<4x32xbf16> to vector<4x8xbf16>
    %257 = vector.extract_strided_slice %236 {offsets = [0, 8], sizes = [32, 8], strides = [1, 1]} : vector<32x32xbf16> to vector<32x8xbf16>
    %cst_94 = arith.constant dense<0.000000e+00> : vector<4x32xf32>
    %258 = tpu.matmul %256, %257, %cst_94 {dimension_numbers = #tpu.dot_dimension_numbers<[1], [1], [0], [0], [0, 0, 1, 0], [], []>} : vector<4x8xbf16>, vector<32x8xbf16>, vector<4x32xf32> -> vector<4x32xf32>
    %259 = vector.broadcast %119 : vector<1x32xf32> to vector<4x32xf32>
    %260 = arith.addf %258, %259 : vector<4x32xf32>
    %cst_95 = arith.constant dense<0xFF800000> : vector<4xf32>
    %261 = vector.multi_reduction <maximumf>, %260, %cst_95 [1] : vector<4x32xf32> to vector<4xf32>
    %262 = vector.shape_cast %261 : vector<4xf32> to vector<4x1xf32>
    %263 = vector.broadcast %262 : vector<4x1xf32> to vector<4x32xf32>
    %264 = arith.subf %260, %263 : vector<4x32xf32>
    %265 = math.exp %264 : vector<4x32xf32>
    %cst_96 = arith.constant dense<0.000000e+00> : vector<4xf32>
    %266 = vector.multi_reduction <add>, %265, %cst_96 [1] : vector<4x32xf32> to vector<4xf32>
    %267 = vector.shape_cast %266 : vector<4xf32> to vector<4x1xf32>
    %268 = tpu.reciprocal %267 {approx = true} : vector<4x1xf32> -> vector<4x1xf32>
    %269 = vector.broadcast %268 : vector<4x1xf32> to vector<4x32xf32>
    %270 = arith.mulf %265, %269 : vector<4x32xf32>
    %271 = arith.truncf %270 : vector<4x32xf32> to vector<4x32xbf16>
    %272 = vector.extract_strided_slice %237 {offsets = [0, 8], sizes = [32, 8], strides = [1, 1]} : vector<32x32xbf16> to vector<32x8xbf16>
    %cst_97 = arith.constant dense<0.000000e+00> : vector<4x8xf32>
    %273 = tpu.matmul %271, %272, %cst_97 {dimension_numbers = #tpu.dot_dimension_numbers<[1], [0], [0], [1], [0, 0, 1, 1], [], []>} : vector<4x32xbf16>, vector<32x8xbf16>, vector<4x8xf32> -> vector<4x8xf32>
    %274 = vector.extract_strided_slice %231 {offsets = [0, 16], sizes = [4, 8], strides = [1, 1]} : vector<4x32xbf16> to vector<4x8xbf16>
    %275 = vector.extract_strided_slice %236 {offsets = [0, 16], sizes = [32, 8], strides = [1, 1]} : vector<32x32xbf16> to vector<32x8xbf16>
    %cst_98 = arith.constant dense<0.000000e+00> : vector<4x32xf32>
    %276 = tpu.matmul %274, %275, %cst_98 {dimension_numbers = #tpu.dot_dimension_numbers<[1], [1], [0], [0], [0, 0, 1, 0], [], []>} : vector<4x8xbf16>, vector<32x8xbf16>, vector<4x32xf32> -> vector<4x32xf32>
    %277 = vector.broadcast %119 : vector<1x32xf32> to vector<4x32xf32>
    %278 = arith.addf %276, %277 : vector<4x32xf32>
    %cst_99 = arith.constant dense<0xFF800000> : vector<4xf32>
    %279 = vector.multi_reduction <maximumf>, %278, %cst_99 [1] : vector<4x32xf32> to vector<4xf32>
    %280 = vector.shape_cast %279 : vector<4xf32> to vector<4x1xf32>
    %281 = vector.broadcast %280 : vector<4x1xf32> to vector<4x32xf32>
    %282 = arith.subf %278, %281 : vector<4x32xf32>
    %283 = math.exp %282 : vector<4x32xf32>
    %cst_100 = arith.constant dense<0.000000e+00> : vector<4xf32>
    %284 = vector.multi_reduction <add>, %283, %cst_100 [1] : vector<4x32xf32> to vector<4xf32>
    %285 = vector.shape_cast %284 : vector<4xf32> to vector<4x1xf32>
    %286 = tpu.reciprocal %285 {approx = true} : vector<4x1xf32> -> vector<4x1xf32>
    %287 = vector.broadcast %286 : vector<4x1xf32> to vector<4x32xf32>
    %288 = arith.mulf %283, %287 : vector<4x32xf32>
    %289 = arith.truncf %288 : vector<4x32xf32> to vector<4x32xbf16>
    %290 = vector.extract_strided_slice %237 {offsets = [0, 16], sizes = [32, 8], strides = [1, 1]} : vector<32x32xbf16> to vector<32x8xbf16>
    %cst_101 = arith.constant dense<0.000000e+00> : vector<4x8xf32>
    %291 = tpu.matmul %289, %290, %cst_101 {dimension_numbers = #tpu.dot_dimension_numbers<[1], [0], [0], [1], [0, 0, 1, 1], [], []>} : vector<4x32xbf16>, vector<32x8xbf16>, vector<4x8xf32> -> vector<4x8xf32>
    %292 = vector.extract_strided_slice %231 {offsets = [0, 24], sizes = [4, 8], strides = [1, 1]} : vector<4x32xbf16> to vector<4x8xbf16>
    %293 = vector.extract_strided_slice %236 {offsets = [0, 24], sizes = [32, 8], strides = [1, 1]} : vector<32x32xbf16> to vector<32x8xbf16>
    %cst_102 = arith.constant dense<0.000000e+00> : vector<4x32xf32>
    %294 = tpu.matmul %292, %293, %cst_102 {dimension_numbers = #tpu.dot_dimension_numbers<[1], [1], [0], [0], [0, 0, 1, 0], [], []>} : vector<4x8xbf16>, vector<32x8xbf16>, vector<4x32xf32> -> vector<4x32xf32>
    %295 = vector.broadcast %119 : vector<1x32xf32> to vector<4x32xf32>
    %296 = arith.addf %294, %295 : vector<4x32xf32>
    %cst_103 = arith.constant dense<0xFF800000> : vector<4xf32>
    %297 = vector.multi_reduction <maximumf>, %296, %cst_103 [1] : vector<4x32xf32> to vector<4xf32>
    %298 = vector.shape_cast %297 : vector<4xf32> to vector<4x1xf32>
    %299 = vector.broadcast %298 : vector<4x1xf32> to vector<4x32xf32>
    %300 = arith.subf %296, %299 : vector<4x32xf32>
    %301 = math.exp %300 : vector<4x32xf32>
    %cst_104 = arith.constant dense<0.000000e+00> : vector<4xf32>
    %302 = vector.multi_reduction <add>, %301, %cst_104 [1] : vector<4x32xf32> to vector<4xf32>
    %303 = vector.shape_cast %302 : vector<4xf32> to vector<4x1xf32>
    %304 = tpu.reciprocal %303 {approx = true} : vector<4x1xf32> -> vector<4x1xf32>
    %305 = vector.broadcast %304 : vector<4x1xf32> to vector<4x32xf32>
    %306 = arith.mulf %301, %305 : vector<4x32xf32>
    %307 = arith.truncf %306 : vector<4x32xf32> to vector<4x32xbf16>
    %308 = vector.extract_strided_slice %237 {offsets = [0, 24], sizes = [32, 8], strides = [1, 1]} : vector<32x32xbf16> to vector<32x8xbf16>
    %cst_105 = arith.constant dense<0.000000e+00> : vector<4x8xf32>
    %309 = tpu.matmul %307, %308, %cst_105 {dimension_numbers = #tpu.dot_dimension_numbers<[1], [0], [0], [1], [0, 0, 1, 1], [], []>} : vector<4x32xbf16>, vector<32x8xbf16>, vector<4x8xf32> -> vector<4x8xf32>
    %310 = tpu.concatenate %255, %273, %291, %309 in 1 : vector<4x8xf32>, vector<4x8xf32>, vector<4x8xf32>, vector<4x8xf32> -> vector<4x32xf32>
    %311 = arith.addf %310, %121 : vector<4x32xf32>
    %c0_106 = arith.constant 0 : index
    %c0_107 = arith.constant 0 : index
    %c0_108 = arith.constant 0 : index
    %312 = vector.load %arg14[%c0_106, %c0_107, %c0_108] : memref<3x1x32xf32, #tpu.memory_space<vmem>>, vector<1x1x32xf32>
    %313 = vector.shape_cast %312 : vector<1x1x32xf32> to vector<1x32xf32>
    %c0_109 = arith.constant 0 : index
    %c0_110 = arith.constant 0 : index
    %c0_111 = arith.constant 0 : index
    %314 = vector.load %arg15[%c0_109, %c0_110, %c0_111] : memref<3x1x32xf32, #tpu.memory_space<vmem>>, vector<1x1x32xf32>
    %315 = vector.shape_cast %314 : vector<1x1x32xf32> to vector<1x32xf32>
    %cst_112 = arith.constant dense<0.000000e+00> : vector<4xf32>
    %316 = vector.multi_reduction <add>, %311, %cst_112 [1] : vector<4x32xf32> to vector<4xf32>
    %317 = vector.shape_cast %316 : vector<4xf32> to vector<4x1xf32>
    %cst_113 = arith.constant 3.200000e+01 : f32
    %318 = vector.broadcast %cst_113 : f32 to vector<4x1xf32>
    %319 = arith.divf %317, %318 : vector<4x1xf32>
    %320 = vector.broadcast %319 : vector<4x1xf32> to vector<4x32xf32>
    %321 = arith.subf %311, %320 : vector<4x32xf32>
    %322 = arith.mulf %321, %321 : vector<4x32xf32>
    %cst_114 = arith.constant dense<0.000000e+00> : vector<4xf32>
    %323 = vector.multi_reduction <add>, %322, %cst_114 [1] : vector<4x32xf32> to vector<4xf32>
    %324 = vector.shape_cast %323 : vector<4xf32> to vector<4x1xf32>
    %cst_115 = arith.constant 3.200000e+01 : f32
    %325 = vector.broadcast %cst_115 : f32 to vector<4x1xf32>
    %326 = arith.divf %324, %325 : vector<4x1xf32>
    %327 = vector.broadcast %319 : vector<4x1xf32> to vector<4x32xf32>
    %328 = arith.subf %311, %327 : vector<4x32xf32>
    %cst_116 = arith.constant 9.99999974E-6 : f32
    %329 = vector.broadcast %cst_116 : f32 to vector<4x1xf32>
    %330 = arith.addf %326, %329 : vector<4x1xf32>
    %331 = math.rsqrt %330 : vector<4x1xf32>
    %332 = vector.broadcast %331 : vector<4x1xf32> to vector<4x32xf32>
    %333 = arith.mulf %328, %332 : vector<4x32xf32>
    %334 = vector.broadcast %313 : vector<1x32xf32> to vector<4x32xf32>
    %335 = arith.mulf %333, %334 : vector<4x32xf32>
    %336 = vector.broadcast %315 : vector<1x32xf32> to vector<4x32xf32>
    %337 = arith.addf %335, %336 : vector<4x32xf32>
    %338 = vector.extract_strided_slice %225 {offsets = [0, 0], sizes = [16, 32], strides = [1, 1]} : vector<32x32xf32> to vector<16x32xf32>
    %c0_117 = arith.constant 0 : index
    %c0_118 = arith.constant 0 : index
    %339 = vector.load %arg17[%c0_117, %c0_118] : memref<32x32xf32, #tpu.memory_space<vmem>>, vector<16x32xf32>
    tpu.vector_store %arg17[%c0_117, %c0_118], %338 {strides = array<i32>} : memref<32x32xf32, #tpu.memory_space<vmem>>, vector<16x32xf32>,
    %c16_119 = arith.constant 16 : index
    %c0_120 = arith.constant 0 : index
    %340 = vector.load %arg17[%c16_119, %c0_120] : memref<32x32xf32, #tpu.memory_space<vmem>>, vector<4x32xf32>
    tpu.vector_store %arg17[%c16_119, %c0_120], %337 {strides = array<i32>} : memref<32x32xf32, #tpu.memory_space<vmem>>, vector<4x32xf32>,
    %c0_121 = arith.constant 0 : index
    %c0_122 = arith.constant 0 : index
    %341 = vector.load %arg17[%c0_121, %c0_122] : memref<32x32xf32, #tpu.memory_space<vmem>>, vector<32x32xf32>
    %342 = vector.extract_strided_slice %341 {offsets = [16, 0], sizes = [4, 32], strides = [1, 1]} : vector<32x32xf32> to vector<4x32xf32>
    %343 = arith.truncf %341 : vector<32x32xf32> to vector<32x32xbf16>
    %c1 = arith.constant 1 : index
    %c0_123 = arith.constant 0 : index
    %c0_124 = arith.constant 0 : index
    %344 = vector.load %arg9[%c1, %c0_123, %c0_124] : memref<3x32x96xbf16, #tpu.memory_space<vmem>>, vector<1x32x96xbf16>
    %345 = vector.shape_cast %344 : vector<1x32x96xbf16> to vector<32x96xbf16>
    %cst_125 = arith.constant dense<0.000000e+00> : vector<32x96xf32>
    %346 = tpu.matmul %343, %345, %cst_125 {dimension_numbers = #tpu.dot_dimension_numbers<[1], [0], [0], [1], [0, 0, 1, 1], [], []>} : vector<32x32xbf16>, vector<32x96xbf16>, vector<32x96xf32> -> vector<32x96xf32>
    %347 = arith.truncf %346 : vector<32x96xf32> to vector<32x96xbf16>
    %348 = vector.extract_strided_slice %347 {offsets = [0, 0], sizes = [32, 32], strides = [1, 1]} : vector<32x96xbf16> to vector<32x32xbf16>
    %349 = vector.extract_strided_slice %347 {offsets = [0, 32], sizes = [32, 32], strides = [1, 1]} : vector<32x96xbf16> to vector<32x32xbf16>
    %350 = vector.extract_strided_slice %347 {offsets = [0, 64], sizes = [32, 32], strides = [1, 1]} : vector<32x96xbf16> to vector<32x32xbf16>
    %351 = vector.extract_strided_slice %348 {offsets = [0, 0], sizes = [32, 8], strides = [1, 1]} : vector<32x32xbf16> to vector<32x8xbf16>
    %352 = vector.extract_strided_slice %349 {offsets = [0, 0], sizes = [32, 8], strides = [1, 1]} : vector<32x32xbf16> to vector<32x8xbf16>
    %cst_126 = arith.constant dense<0.000000e+00> : vector<32x32xf32>
    %353 = tpu.matmul %351, %352, %cst_126 {dimension_numbers = #tpu.dot_dimension_numbers<[1], [1], [0], [0], [0, 0, 1, 0], [], []>} : vector<32x8xbf16>, vector<32x8xbf16>, vector<32x32xf32> -> vector<32x32xf32>
    %354 = arith.addf %353, %118 : vector<32x32xf32>
    %cst_127 = arith.constant dense<0xFF800000> : vector<32xf32>
    %355 = vector.multi_reduction <maximumf>, %354, %cst_127 [1] : vector<32x32xf32> to vector<32xf32>
    %356 = vector.shape_cast %355 : vector<32xf32> to vector<32x1xf32>
    %357 = vector.broadcast %356 : vector<32x1xf32> to vector<32x32xf32>
    %358 = arith.subf %354, %357 : vector<32x32xf32>
    %359 = math.exp %358 : vector<32x32xf32>
    %cst_128 = arith.constant dense<0.000000e+00> : vector<32xf32>
    %360 = vector.multi_reduction <add>, %359, %cst_128 [1] : vector<32x32xf32> to vector<32xf32>
    %361 = vector.shape_cast %360 : vector<32xf32> to vector<32x1xf32>
    %362 = tpu.reciprocal %361 {approx = true} : vector<32x1xf32> -> vector<32x1xf32>
    %363 = vector.broadcast %362 : vector<32x1xf32> to vector<32x32xf32>
    %364 = arith.mulf %359, %363 : vector<32x32xf32>
    %365 = arith.truncf %364 : vector<32x32xf32> to vector<32x32xbf16>
    %366 = vector.extract_strided_slice %350 {offsets = [0, 0], sizes = [32, 8], strides = [1, 1]} : vector<32x32xbf16> to vector<32x8xbf16>
    %cst_129 = arith.constant dense<0.000000e+00> : vector<32x8xf32>
    %367 = tpu.matmul %365, %366, %cst_129 {dimension_numbers = #tpu.dot_dimension_numbers<[1], [0], [0], [1], [0, 0, 1, 1], [], []>} : vector<32x32xbf16>, vector<32x8xbf16>, vector<32x8xf32> -> vector<32x8xf32>
    %368 = vector.extract_strided_slice %348 {offsets = [0, 8], sizes = [32, 8], strides = [1, 1]} : vector<32x32xbf16> to vector<32x8xbf16>
    %369 = vector.extract_strided_slice %349 {offsets = [0, 8], sizes = [32, 8], strides = [1, 1]} : vector<32x32xbf16> to vector<32x8xbf16>
    %cst_130 = arith.constant dense<0.000000e+00> : vector<32x32xf32>
    %370 = tpu.matmul %368, %369, %cst_130 {dimension_numbers = #tpu.dot_dimension_numbers<[1], [1], [0], [0], [0, 0, 1, 0], [], []>} : vector<32x8xbf16>, vector<32x8xbf16>, vector<32x32xf32> -> vector<32x32xf32>
    %371 = arith.addf %370, %118 : vector<32x32xf32>
    %cst_131 = arith.constant dense<0xFF800000> : vector<32xf32>
    %372 = vector.multi_reduction <maximumf>, %371, %cst_131 [1] : vector<32x32xf32> to vector<32xf32>
    %373 = vector.shape_cast %372 : vector<32xf32> to vector<32x1xf32>
    %374 = vector.broadcast %373 : vector<32x1xf32> to vector<32x32xf32>
    %375 = arith.subf %371, %374 : vector<32x32xf32>
    %376 = math.exp %375 : vector<32x32xf32>
    %cst_132 = arith.constant dense<0.000000e+00> : vector<32xf32>
    %377 = vector.multi_reduction <add>, %376, %cst_132 [1] : vector<32x32xf32> to vector<32xf32>
    %378 = vector.shape_cast %377 : vector<32xf32> to vector<32x1xf32>
    %379 = tpu.reciprocal %378 {approx = true} : vector<32x1xf32> -> vector<32x1xf32>
    %380 = vector.broadcast %379 : vector<32x1xf32> to vector<32x32xf32>
    %381 = arith.mulf %376, %380 : vector<32x32xf32>
    %382 = arith.truncf %381 : vector<32x32xf32> to vector<32x32xbf16>
    %383 = vector.extract_strided_slice %350 {offsets = [0, 8], sizes = [32, 8], strides = [1, 1]} : vector<32x32xbf16> to vector<32x8xbf16>
    %cst_133 = arith.constant dense<0.000000e+00> : vector<32x8xf32>
    %384 = tpu.matmul %382, %383, %cst_133 {dimension_numbers = #tpu.dot_dimension_numbers<[1], [0], [0], [1], [0, 0, 1, 1], [], []>} : vector<32x32xbf16>, vector<32x8xbf16>, vector<32x8xf32> -> vector<32x8xf32>
    %385 = vector.extract_strided_slice %348 {offsets = [0, 16], sizes = [32, 8], strides = [1, 1]} : vector<32x32xbf16> to vector<32x8xbf16>
    %386 = vector.extract_strided_slice %349 {offsets = [0, 16], sizes = [32, 8], strides = [1, 1]} : vector<32x32xbf16> to vector<32x8xbf16>
    %cst_134 = arith.constant dense<0.000000e+00> : vector<32x32xf32>
    %387 = tpu.matmul %385, %386, %cst_134 {dimension_numbers = #tpu.dot_dimension_numbers<[1], [1], [0], [0], [0, 0, 1, 0], [], []>} : vector<32x8xbf16>, vector<32x8xbf16>, vector<32x32xf32> -> vector<32x32xf32>
    %388 = arith.addf %387, %118 : vector<32x32xf32>
    %cst_135 = arith.constant dense<0xFF800000> : vector<32xf32>
    %389 = vector.multi_reduction <maximumf>, %388, %cst_135 [1] : vector<32x32xf32> to vector<32xf32>
    %390 = vector.shape_cast %389 : vector<32xf32> to vector<32x1xf32>
    %391 = vector.broadcast %390 : vector<32x1xf32> to vector<32x32xf32>
    %392 = arith.subf %388, %391 : vector<32x32xf32>
    %393 = math.exp %392 : vector<32x32xf32>
    %cst_136 = arith.constant dense<0.000000e+00> : vector<32xf32>
    %394 = vector.multi_reduction <add>, %393, %cst_136 [1] : vector<32x32xf32> to vector<32xf32>
    %395 = vector.shape_cast %394 : vector<32xf32> to vector<32x1xf32>
    %396 = tpu.reciprocal %395 {approx = true} : vector<32x1xf32> -> vector<32x1xf32>
    %397 = vector.broadcast %396 : vector<32x1xf32> to vector<32x32xf32>
    %398 = arith.mulf %393, %397 : vector<32x32xf32>
    %399 = arith.truncf %398 : vector<32x32xf32> to vector<32x32xbf16>
    %400 = vector.extract_strided_slice %350 {offsets = [0, 16], sizes = [32, 8], strides = [1, 1]} : vector<32x32xbf16> to vector<32x8xbf16>
    %cst_137 = arith.constant dense<0.000000e+00> : vector<32x8xf32>
    %401 = tpu.matmul %399, %400, %cst_137 {dimension_numbers = #tpu.dot_dimension_numbers<[1], [0], [0], [1], [0, 0, 1, 1], [], []>} : vector<32x32xbf16>, vector<32x8xbf16>, vector<32x8xf32> -> vector<32x8xf32>
    %402 = vector.extract_strided_slice %348 {offsets = [0, 24], sizes = [32, 8], strides = [1, 1]} : vector<32x32xbf16> to vector<32x8xbf16>
    %403 = vector.extract_strided_slice %349 {offsets = [0, 24], sizes = [32, 8], strides = [1, 1]} : vector<32x32xbf16> to vector<32x8xbf16>
    %cst_138 = arith.constant dense<0.000000e+00> : vector<32x32xf32>
    %404 = tpu.matmul %402, %403, %cst_138 {dimension_numbers = #tpu.dot_dimension_numbers<[1], [1], [0], [0], [0, 0, 1, 0], [], []>} : vector<32x8xbf16>, vector<32x8xbf16>, vector<32x32xf32> -> vector<32x32xf32>
    %405 = arith.addf %404, %118 : vector<32x32xf32>
    %cst_139 = arith.constant dense<0xFF800000> : vector<32xf32>
    %406 = vector.multi_reduction <maximumf>, %405, %cst_139 [1] : vector<32x32xf32> to vector<32xf32>
    %407 = vector.shape_cast %406 : vector<32xf32> to vector<32x1xf32>
    %408 = vector.broadcast %407 : vector<32x1xf32> to vector<32x32xf32>
    %409 = arith.subf %405, %408 : vector<32x32xf32>
    %410 = math.exp %409 : vector<32x32xf32>
    %cst_140 = arith.constant dense<0.000000e+00> : vector<32xf32>
    %411 = vector.multi_reduction <add>, %410, %cst_140 [1] : vector<32x32xf32> to vector<32xf32>
    %412 = vector.shape_cast %411 : vector<32xf32> to vector<32x1xf32>
    %413 = tpu.reciprocal %412 {approx = true} : vector<32x1xf32> -> vector<32x1xf32>
    %414 = vector.broadcast %413 : vector<32x1xf32> to vector<32x32xf32>
    %415 = arith.mulf %410, %414 : vector<32x32xf32>
    %416 = arith.truncf %415 : vector<32x32xf32> to vector<32x32xbf16>
    %417 = vector.extract_strided_slice %350 {offsets = [0, 24], sizes = [32, 8], strides = [1, 1]} : vector<32x32xbf16> to vector<32x8xbf16>
    %cst_141 = arith.constant dense<0.000000e+00> : vector<32x8xf32>
    %418 = tpu.matmul %416, %417, %cst_141 {dimension_numbers = #tpu.dot_dimension_numbers<[1], [0], [0], [1], [0, 0, 1, 1], [], []>} : vector<32x32xbf16>, vector<32x8xbf16>, vector<32x8xf32> -> vector<32x8xf32>
    %419 = tpu.concatenate %367, %384, %401, %418 in 1 : vector<32x8xf32>, vector<32x8xf32>, vector<32x8xf32>, vector<32x8xf32> -> vector<32x32xf32>
    %420 = arith.addf %419, %341 : vector<32x32xf32>
    %c1_142 = arith.constant 1 : index
    %c0_143 = arith.constant 0 : index
    %c0_144 = arith.constant 0 : index
    %421 = vector.load %arg10[%c1_142, %c0_143, %c0_144] : memref<3x1x32xf32, #tpu.memory_space<vmem>>, vector<1x1x32xf32>
    %422 = vector.shape_cast %421 : vector<1x1x32xf32> to vector<1x32xf32>
    %c1_145 = arith.constant 1 : index
    %c0_146 = arith.constant 0 : index
    %c0_147 = arith.constant 0 : index
    %423 = vector.load %arg11[%c1_145, %c0_146, %c0_147] : memref<3x1x32xf32, #tpu.memory_space<vmem>>, vector<1x1x32xf32>
    %424 = vector.shape_cast %423 : vector<1x1x32xf32> to vector<1x32xf32>
    %cst_148 = arith.constant dense<0.000000e+00> : vector<32xf32>
    %425 = vector.multi_reduction <add>, %420, %cst_148 [1] : vector<32x32xf32> to vector<32xf32>
    %426 = vector.shape_cast %425 : vector<32xf32> to vector<32x1xf32>
    %cst_149 = arith.constant 3.200000e+01 : f32
    %427 = vector.broadcast %cst_149 : f32 to vector<32x1xf32>
    %428 = arith.divf %426, %427 : vector<32x1xf32>
    %429 = vector.broadcast %428 : vector<32x1xf32> to vector<32x32xf32>
    %430 = arith.subf %420, %429 : vector<32x32xf32>
    %431 = arith.mulf %430, %430 : vector<32x32xf32>
    %cst_150 = arith.constant dense<0.000000e+00> : vector<32xf32>
    %432 = vector.multi_reduction <add>, %431, %cst_150 [1] : vector<32x32xf32> to vector<32xf32>
    %433 = vector.shape_cast %432 : vector<32xf32> to vector<32x1xf32>
    %cst_151 = arith.constant 3.200000e+01 : f32
    %434 = vector.broadcast %cst_151 : f32 to vector<32x1xf32>
    %435 = arith.divf %433, %434 : vector<32x1xf32>
    %436 = vector.broadcast %428 : vector<32x1xf32> to vector<32x32xf32>
    %437 = arith.subf %420, %436 : vector<32x32xf32>
    %cst_152 = arith.constant 9.99999974E-6 : f32
    %438 = vector.broadcast %cst_152 : f32 to vector<32x1xf32>
    %439 = arith.addf %435, %438 : vector<32x1xf32>
    %440 = math.rsqrt %439 : vector<32x1xf32>
    %441 = vector.broadcast %440 : vector<32x1xf32> to vector<32x32xf32>
    %442 = arith.mulf %437, %441 : vector<32x32xf32>
    %443 = vector.broadcast %422 : vector<1x32xf32> to vector<32x32xf32>
    %444 = arith.mulf %442, %443 : vector<32x32xf32>
    %445 = vector.broadcast %424 : vector<1x32xf32> to vector<32x32xf32>
    %446 = arith.addf %444, %445 : vector<32x32xf32>
    %447 = arith.truncf %446 : vector<32x32xf32> to vector<32x32xbf16>
    %448 = arith.truncf %342 : vector<4x32xf32> to vector<4x32xbf16>
    %c1_153 = arith.constant 1 : index
    %c0_154 = arith.constant 0 : index
    %c0_155 = arith.constant 0 : index
    %449 = vector.load %arg12[%c1_153, %c0_154, %c0_155] : memref<3x32x32xbf16, #tpu.memory_space<vmem>>, vector<1x32x32xbf16>
    %450 = vector.shape_cast %449 : vector<1x32x32xbf16> to vector<32x32xbf16>
    %cst_156 = arith.constant dense<0.000000e+00> : vector<4x32xf32>
    %451 = tpu.matmul %448, %450, %cst_156 {dimension_numbers = #tpu.dot_dimension_numbers<[1], [0], [0], [1], [0, 0, 1, 1], [], []>} : vector<4x32xbf16>, vector<32x32xbf16>, vector<4x32xf32> -> vector<4x32xf32>
    %452 = arith.truncf %451 : vector<4x32xf32> to vector<4x32xbf16>
    %c1_157 = arith.constant 1 : index
    %c0_158 = arith.constant 0 : index
    %c0_159 = arith.constant 0 : index
    %453 = vector.load %arg13[%c1_157, %c0_158, %c0_159] : memref<3x32x64xbf16, #tpu.memory_space<vmem>>, vector<1x32x64xbf16>
    %454 = vector.shape_cast %453 : vector<1x32x64xbf16> to vector<32x64xbf16>
    %cst_160 = arith.constant dense<0.000000e+00> : vector<32x64xf32>
    %455 = tpu.matmul %447, %454, %cst_160 {dimension_numbers = #tpu.dot_dimension_numbers<[1], [0], [0], [1], [0, 0, 1, 1], [], []>} : vector<32x32xbf16>, vector<32x64xbf16>, vector<32x64xf32> -> vector<32x64xf32>
    %456 = arith.truncf %455 : vector<32x64xf32> to vector<32x64xbf16>
    %457 = vector.extract_strided_slice %456 {offsets = [0, 0], sizes = [32, 32], strides = [1, 1]} : vector<32x64xbf16> to vector<32x32xbf16>
    %458 = vector.extract_strided_slice %456 {offsets = [0, 32], sizes = [32, 32], strides = [1, 1]} : vector<32x64xbf16> to vector<32x32xbf16>
    %459 = vector.extract_strided_slice %452 {offsets = [0, 0], sizes = [4, 8], strides = [1, 1]} : vector<4x32xbf16> to vector<4x8xbf16>
    %460 = vector.extract_strided_slice %457 {offsets = [0, 0], sizes = [32, 8], strides = [1, 1]} : vector<32x32xbf16> to vector<32x8xbf16>
    %cst_161 = arith.constant dense<0.000000e+00> : vector<4x32xf32>
    %461 = tpu.matmul %459, %460, %cst_161 {dimension_numbers = #tpu.dot_dimension_numbers<[1], [1], [0], [0], [0, 0, 1, 0], [], []>} : vector<4x8xbf16>, vector<32x8xbf16>, vector<4x32xf32> -> vector<4x32xf32>
    %462 = vector.broadcast %119 : vector<1x32xf32> to vector<4x32xf32>
    %463 = arith.addf %461, %462 : vector<4x32xf32>
    %cst_162 = arith.constant dense<0xFF800000> : vector<4xf32>
    %464 = vector.multi_reduction <maximumf>, %463, %cst_162 [1] : vector<4x32xf32> to vector<4xf32>
    %465 = vector.shape_cast %464 : vector<4xf32> to vector<4x1xf32>
    %466 = vector.broadcast %465 : vector<4x1xf32> to vector<4x32xf32>
    %467 = arith.subf %463, %466 : vector<4x32xf32>
    %468 = math.exp %467 : vector<4x32xf32>
    %cst_163 = arith.constant dense<0.000000e+00> : vector<4xf32>
    %469 = vector.multi_reduction <add>, %468, %cst_163 [1] : vector<4x32xf32> to vector<4xf32>
    %470 = vector.shape_cast %469 : vector<4xf32> to vector<4x1xf32>
    %471 = tpu.reciprocal %470 {approx = true} : vector<4x1xf32> -> vector<4x1xf32>
    %472 = vector.broadcast %471 : vector<4x1xf32> to vector<4x32xf32>
    %473 = arith.mulf %468, %472 : vector<4x32xf32>
    %474 = arith.truncf %473 : vector<4x32xf32> to vector<4x32xbf16>
    %475 = vector.extract_strided_slice %458 {offsets = [0, 0], sizes = [32, 8], strides = [1, 1]} : vector<32x32xbf16> to vector<32x8xbf16>
    %cst_164 = arith.constant dense<0.000000e+00> : vector<4x8xf32>
    %476 = tpu.matmul %474, %475, %cst_164 {dimension_numbers = #tpu.dot_dimension_numbers<[1], [0], [0], [1], [0, 0, 1, 1], [], []>} : vector<4x32xbf16>, vector<32x8xbf16>, vector<4x8xf32> -> vector<4x8xf32>
    %477 = vector.extract_strided_slice %452 {offsets = [0, 8], sizes = [4, 8], strides = [1, 1]} : vector<4x32xbf16> to vector<4x8xbf16>
    %478 = vector.extract_strided_slice %457 {offsets = [0, 8], sizes = [32, 8], strides = [1, 1]} : vector<32x32xbf16> to vector<32x8xbf16>
    %cst_165 = arith.constant dense<0.000000e+00> : vector<4x32xf32>
    %479 = tpu.matmul %477, %478, %cst_165 {dimension_numbers = #tpu.dot_dimension_numbers<[1], [1], [0], [0], [0, 0, 1, 0], [], []>} : vector<4x8xbf16>, vector<32x8xbf16>, vector<4x32xf32> -> vector<4x32xf32>
    %480 = vector.broadcast %119 : vector<1x32xf32> to vector<4x32xf32>
    %481 = arith.addf %479, %480 : vector<4x32xf32>
    %cst_166 = arith.constant dense<0xFF800000> : vector<4xf32>
    %482 = vector.multi_reduction <maximumf>, %481, %cst_166 [1] : vector<4x32xf32> to vector<4xf32>
    %483 = vector.shape_cast %482 : vector<4xf32> to vector<4x1xf32>
    %484 = vector.broadcast %483 : vector<4x1xf32> to vector<4x32xf32>
    %485 = arith.subf %481, %484 : vector<4x32xf32>
    %486 = math.exp %485 : vector<4x32xf32>
    %cst_167 = arith.constant dense<0.000000e+00> : vector<4xf32>
    %487 = vector.multi_reduction <add>, %486, %cst_167 [1] : vector<4x32xf32> to vector<4xf32>
    %488 = vector.shape_cast %487 : vector<4xf32> to vector<4x1xf32>
    %489 = tpu.reciprocal %488 {approx = true} : vector<4x1xf32> -> vector<4x1xf32>
    %490 = vector.broadcast %489 : vector<4x1xf32> to vector<4x32xf32>
    %491 = arith.mulf %486, %490 : vector<4x32xf32>
    %492 = arith.truncf %491 : vector<4x32xf32> to vector<4x32xbf16>
    %493 = vector.extract_strided_slice %458 {offsets = [0, 8], sizes = [32, 8], strides = [1, 1]} : vector<32x32xbf16> to vector<32x8xbf16>
    %cst_168 = arith.constant dense<0.000000e+00> : vector<4x8xf32>
    %494 = tpu.matmul %492, %493, %cst_168 {dimension_numbers = #tpu.dot_dimension_numbers<[1], [0], [0], [1], [0, 0, 1, 1], [], []>} : vector<4x32xbf16>, vector<32x8xbf16>, vector<4x8xf32> -> vector<4x8xf32>
    %495 = vector.extract_strided_slice %452 {offsets = [0, 16], sizes = [4, 8], strides = [1, 1]} : vector<4x32xbf16> to vector<4x8xbf16>
    %496 = vector.extract_strided_slice %457 {offsets = [0, 16], sizes = [32, 8], strides = [1, 1]} : vector<32x32xbf16> to vector<32x8xbf16>
    %cst_169 = arith.constant dense<0.000000e+00> : vector<4x32xf32>
    %497 = tpu.matmul %495, %496, %cst_169 {dimension_numbers = #tpu.dot_dimension_numbers<[1], [1], [0], [0], [0, 0, 1, 0], [], []>} : vector<4x8xbf16>, vector<32x8xbf16>, vector<4x32xf32> -> vector<4x32xf32>
    %498 = vector.broadcast %119 : vector<1x32xf32> to vector<4x32xf32>
    %499 = arith.addf %497, %498 : vector<4x32xf32>
    %cst_170 = arith.constant dense<0xFF800000> : vector<4xf32>
    %500 = vector.multi_reduction <maximumf>, %499, %cst_170 [1] : vector<4x32xf32> to vector<4xf32>
    %501 = vector.shape_cast %500 : vector<4xf32> to vector<4x1xf32>
    %502 = vector.broadcast %501 : vector<4x1xf32> to vector<4x32xf32>
    %503 = arith.subf %499, %502 : vector<4x32xf32>
    %504 = math.exp %503 : vector<4x32xf32>
    %cst_171 = arith.constant dense<0.000000e+00> : vector<4xf32>
    %505 = vector.multi_reduction <add>, %504, %cst_171 [1] : vector<4x32xf32> to vector<4xf32>
    %506 = vector.shape_cast %505 : vector<4xf32> to vector<4x1xf32>
    %507 = tpu.reciprocal %506 {approx = true} : vector<4x1xf32> -> vector<4x1xf32>
    %508 = vector.broadcast %507 : vector<4x1xf32> to vector<4x32xf32>
    %509 = arith.mulf %504, %508 : vector<4x32xf32>
    %510 = arith.truncf %509 : vector<4x32xf32> to vector<4x32xbf16>
    %511 = vector.extract_strided_slice %458 {offsets = [0, 16], sizes = [32, 8], strides = [1, 1]} : vector<32x32xbf16> to vector<32x8xbf16>
    %cst_172 = arith.constant dense<0.000000e+00> : vector<4x8xf32>
    %512 = tpu.matmul %510, %511, %cst_172 {dimension_numbers = #tpu.dot_dimension_numbers<[1], [0], [0], [1], [0, 0, 1, 1], [], []>} : vector<4x32xbf16>, vector<32x8xbf16>, vector<4x8xf32> -> vector<4x8xf32>
    %513 = vector.extract_strided_slice %452 {offsets = [0, 24], sizes = [4, 8], strides = [1, 1]} : vector<4x32xbf16> to vector<4x8xbf16>
    %514 = vector.extract_strided_slice %457 {offsets = [0, 24], sizes = [32, 8], strides = [1, 1]} : vector<32x32xbf16> to vector<32x8xbf16>
    %cst_173 = arith.constant dense<0.000000e+00> : vector<4x32xf32>
    %515 = tpu.matmul %513, %514, %cst_173 {dimension_numbers = #tpu.dot_dimension_numbers<[1], [1], [0], [0], [0, 0, 1, 0], [], []>} : vector<4x8xbf16>, vector<32x8xbf16>, vector<4x32xf32> -> vector<4x32xf32>
    %516 = vector.broadcast %119 : vector<1x32xf32> to vector<4x32xf32>
    %517 = arith.addf %515, %516 : vector<4x32xf32>
    %cst_174 = arith.constant dense<0xFF800000> : vector<4xf32>
    %518 = vector.multi_reduction <maximumf>, %517, %cst_174 [1] : vector<4x32xf32> to vector<4xf32>
    %519 = vector.shape_cast %518 : vector<4xf32> to vector<4x1xf32>
    %520 = vector.broadcast %519 : vector<4x1xf32> to vector<4x32xf32>
    %521 = arith.subf %517, %520 : vector<4x32xf32>
    %522 = math.exp %521 : vector<4x32xf32>
    %cst_175 = arith.constant dense<0.000000e+00> : vector<4xf32>
    %523 = vector.multi_reduction <add>, %522, %cst_175 [1] : vector<4x32xf32> to vector<4xf32>
    %524 = vector.shape_cast %523 : vector<4xf32> to vector<4x1xf32>
    %525 = tpu.reciprocal %524 {approx = true} : vector<4x1xf32> -> vector<4x1xf32>
    %526 = vector.broadcast %525 : vector<4x1xf32> to vector<4x32xf32>
    %527 = arith.mulf %522, %526 : vector<4x32xf32>
    %528 = arith.truncf %527 : vector<4x32xf32> to vector<4x32xbf16>
    %529 = vector.extract_strided_slice %458 {offsets = [0, 24], sizes = [32, 8], strides = [1, 1]} : vector<32x32xbf16> to vector<32x8xbf16>
    %cst_176 = arith.constant dense<0.000000e+00> : vector<4x8xf32>
    %530 = tpu.matmul %528, %529, %cst_176 {dimension_numbers = #tpu.dot_dimension_numbers<[1], [0], [0], [1], [0, 0, 1, 1], [], []>} : vector<4x32xbf16>, vector<32x8xbf16>, vector<4x8xf32> -> vector<4x8xf32>
    %531 = tpu.concatenate %476, %494, %512, %530 in 1 : vector<4x8xf32>, vector<4x8xf32>, vector<4x8xf32>, vector<4x8xf32> -> vector<4x32xf32>
    %532 = arith.addf %531, %342 : vector<4x32xf32>
    %c1_177 = arith.constant 1 : index
    %c0_178 = arith.constant 0 : index
    %c0_179 = arith.constant 0 : index
    %533 = vector.load %arg14[%c1_177, %c0_178, %c0_179] : memref<3x1x32xf32, #tpu.memory_space<vmem>>, vector<1x1x32xf32>
    %534 = vector.shape_cast %533 : vector<1x1x32xf32> to vector<1x32xf32>
    %c1_180 = arith.constant 1 : index
    %c0_181 = arith.constant 0 : index
    %c0_182 = arith.constant 0 : index
    %535 = vector.load %arg15[%c1_180, %c0_181, %c0_182] : memref<3x1x32xf32, #tpu.memory_space<vmem>>, vector<1x1x32xf32>
    %536 = vector.shape_cast %535 : vector<1x1x32xf32> to vector<1x32xf32>
    %cst_183 = arith.constant dense<0.000000e+00> : vector<4xf32>
    %537 = vector.multi_reduction <add>, %532, %cst_183 [1] : vector<4x32xf32> to vector<4xf32>
    %538 = vector.shape_cast %537 : vector<4xf32> to vector<4x1xf32>
    %cst_184 = arith.constant 3.200000e+01 : f32
    %539 = vector.broadcast %cst_184 : f32 to vector<4x1xf32>
    %540 = arith.divf %538, %539 : vector<4x1xf32>
    %541 = vector.broadcast %540 : vector<4x1xf32> to vector<4x32xf32>
    %542 = arith.subf %532, %541 : vector<4x32xf32>
    %543 = arith.mulf %542, %542 : vector<4x32xf32>
    %cst_185 = arith.constant dense<0.000000e+00> : vector<4xf32>
    %544 = vector.multi_reduction <add>, %543, %cst_185 [1] : vector<4x32xf32> to vector<4xf32>
    %545 = vector.shape_cast %544 : vector<4xf32> to vector<4x1xf32>
    %cst_186 = arith.constant 3.200000e+01 : f32
    %546 = vector.broadcast %cst_186 : f32 to vector<4x1xf32>
    %547 = arith.divf %545, %546 : vector<4x1xf32>
    %548 = vector.broadcast %540 : vector<4x1xf32> to vector<4x32xf32>
    %549 = arith.subf %532, %548 : vector<4x32xf32>
    %cst_187 = arith.constant 9.99999974E-6 : f32
    %550 = vector.broadcast %cst_187 : f32 to vector<4x1xf32>
    %551 = arith.addf %547, %550 : vector<4x1xf32>
    %552 = math.rsqrt %551 : vector<4x1xf32>
    %553 = vector.broadcast %552 : vector<4x1xf32> to vector<4x32xf32>
    %554 = arith.mulf %549, %553 : vector<4x32xf32>
    %555 = vector.broadcast %534 : vector<1x32xf32> to vector<4x32xf32>
    %556 = arith.mulf %554, %555 : vector<4x32xf32>
    %557 = vector.broadcast %536 : vector<1x32xf32> to vector<4x32xf32>
    %558 = arith.addf %556, %557 : vector<4x32xf32>
    %559 = vector.extract_strided_slice %446 {offsets = [0, 0], sizes = [16, 32], strides = [1, 1]} : vector<32x32xf32> to vector<16x32xf32>
    %c0_188 = arith.constant 0 : index
    %c0_189 = arith.constant 0 : index
    %560 = vector.load %arg17[%c0_188, %c0_189] : memref<32x32xf32, #tpu.memory_space<vmem>>, vector<16x32xf32>
    tpu.vector_store %arg17[%c0_188, %c0_189], %559 {strides = array<i32>} : memref<32x32xf32, #tpu.memory_space<vmem>>, vector<16x32xf32>,
    %c16_190 = arith.constant 16 : index
    %c0_191 = arith.constant 0 : index
    %561 = vector.load %arg17[%c16_190, %c0_191] : memref<32x32xf32, #tpu.memory_space<vmem>>, vector<4x32xf32>
    tpu.vector_store %arg17[%c16_190, %c0_191], %558 {strides = array<i32>} : memref<32x32xf32, #tpu.memory_space<vmem>>, vector<4x32xf32>,
    %c0_192 = arith.constant 0 : index
    %c0_193 = arith.constant 0 : index
    %562 = vector.load %arg17[%c0_192, %c0_193] : memref<32x32xf32, #tpu.memory_space<vmem>>, vector<32x32xf32>
    %563 = vector.extract_strided_slice %562 {offsets = [16, 0], sizes = [4, 32], strides = [1, 1]} : vector<32x32xf32> to vector<4x32xf32>
    %564 = arith.truncf %562 : vector<32x32xf32> to vector<32x32xbf16>
    %c2 = arith.constant 2 : index
    %c0_194 = arith.constant 0 : index
    %c0_195 = arith.constant 0 : index
    %565 = vector.load %arg9[%c2, %c0_194, %c0_195] : memref<3x32x96xbf16, #tpu.memory_space<vmem>>, vector<1x32x96xbf16>
    %566 = vector.shape_cast %565 : vector<1x32x96xbf16> to vector<32x96xbf16>
    %cst_196 = arith.constant dense<0.000000e+00> : vector<32x96xf32>
    %567 = tpu.matmul %564, %566, %cst_196 {dimension_numbers = #tpu.dot_dimension_numbers<[1], [0], [0], [1], [0, 0, 1, 1], [], []>} : vector<32x32xbf16>, vector<32x96xbf16>, vector<32x96xf32> -> vector<32x96xf32>
    %568 = arith.truncf %567 : vector<32x96xf32> to vector<32x96xbf16>
    %569 = vector.extract_strided_slice %568 {offsets = [0, 0], sizes = [32, 32], strides = [1, 1]} : vector<32x96xbf16> to vector<32x32xbf16>
    %570 = vector.extract_strided_slice %568 {offsets = [0, 32], sizes = [32, 32], strides = [1, 1]} : vector<32x96xbf16> to vector<32x32xbf16>
    %571 = vector.extract_strided_slice %568 {offsets = [0, 64], sizes = [32, 32], strides = [1, 1]} : vector<32x96xbf16> to vector<32x32xbf16>
    %572 = vector.extract_strided_slice %569 {offsets = [0, 0], sizes = [32, 8], strides = [1, 1]} : vector<32x32xbf16> to vector<32x8xbf16>
    %573 = vector.extract_strided_slice %570 {offsets = [0, 0], sizes = [32, 8], strides = [1, 1]} : vector<32x32xbf16> to vector<32x8xbf16>
    %cst_197 = arith.constant dense<0.000000e+00> : vector<32x32xf32>
    %574 = tpu.matmul %572, %573, %cst_197 {dimension_numbers = #tpu.dot_dimension_numbers<[1], [1], [0], [0], [0, 0, 1, 0], [], []>} : vector<32x8xbf16>, vector<32x8xbf16>, vector<32x32xf32> -> vector<32x32xf32>
    %575 = arith.addf %574, %118 : vector<32x32xf32>
    %cst_198 = arith.constant dense<0xFF800000> : vector<32xf32>
    %576 = vector.multi_reduction <maximumf>, %575, %cst_198 [1] : vector<32x32xf32> to vector<32xf32>
    %577 = vector.shape_cast %576 : vector<32xf32> to vector<32x1xf32>
    %578 = vector.broadcast %577 : vector<32x1xf32> to vector<32x32xf32>
    %579 = arith.subf %575, %578 : vector<32x32xf32>
    %580 = math.exp %579 : vector<32x32xf32>
    %cst_199 = arith.constant dense<0.000000e+00> : vector<32xf32>
    %581 = vector.multi_reduction <add>, %580, %cst_199 [1] : vector<32x32xf32> to vector<32xf32>
    %582 = vector.shape_cast %581 : vector<32xf32> to vector<32x1xf32>
    %583 = tpu.reciprocal %582 {approx = true} : vector<32x1xf32> -> vector<32x1xf32>
    %584 = vector.broadcast %583 : vector<32x1xf32> to vector<32x32xf32>
    %585 = arith.mulf %580, %584 : vector<32x32xf32>
    %586 = arith.truncf %585 : vector<32x32xf32> to vector<32x32xbf16>
    %587 = vector.extract_strided_slice %571 {offsets = [0, 0], sizes = [32, 8], strides = [1, 1]} : vector<32x32xbf16> to vector<32x8xbf16>
    %cst_200 = arith.constant dense<0.000000e+00> : vector<32x8xf32>
    %588 = tpu.matmul %586, %587, %cst_200 {dimension_numbers = #tpu.dot_dimension_numbers<[1], [0], [0], [1], [0, 0, 1, 1], [], []>} : vector<32x32xbf16>, vector<32x8xbf16>, vector<32x8xf32> -> vector<32x8xf32>
    %589 = vector.extract_strided_slice %569 {offsets = [0, 8], sizes = [32, 8], strides = [1, 1]} : vector<32x32xbf16> to vector<32x8xbf16>
    %590 = vector.extract_strided_slice %570 {offsets = [0, 8], sizes = [32, 8], strides = [1, 1]} : vector<32x32xbf16> to vector<32x8xbf16>
    %cst_201 = arith.constant dense<0.000000e+00> : vector<32x32xf32>
    %591 = tpu.matmul %589, %590, %cst_201 {dimension_numbers = #tpu.dot_dimension_numbers<[1], [1], [0], [0], [0, 0, 1, 0], [], []>} : vector<32x8xbf16>, vector<32x8xbf16>, vector<32x32xf32> -> vector<32x32xf32>
    %592 = arith.addf %591, %118 : vector<32x32xf32>
    %cst_202 = arith.constant dense<0xFF800000> : vector<32xf32>
    %593 = vector.multi_reduction <maximumf>, %592, %cst_202 [1] : vector<32x32xf32> to vector<32xf32>
    %594 = vector.shape_cast %593 : vector<32xf32> to vector<32x1xf32>
    %595 = vector.broadcast %594 : vector<32x1xf32> to vector<32x32xf32>
    %596 = arith.subf %592, %595 : vector<32x32xf32>
    %597 = math.exp %596 : vector<32x32xf32>
    %cst_203 = arith.constant dense<0.000000e+00> : vector<32xf32>
    %598 = vector.multi_reduction <add>, %597, %cst_203 [1] : vector<32x32xf32> to vector<32xf32>
    %599 = vector.shape_cast %598 : vector<32xf32> to vector<32x1xf32>
    %600 = tpu.reciprocal %599 {approx = true} : vector<32x1xf32> -> vector<32x1xf32>
    %601 = vector.broadcast %600 : vector<32x1xf32> to vector<32x32xf32>
    %602 = arith.mulf %597, %601 : vector<32x32xf32>
    %603 = arith.truncf %602 : vector<32x32xf32> to vector<32x32xbf16>
    %604 = vector.extract_strided_slice %571 {offsets = [0, 8], sizes = [32, 8], strides = [1, 1]} : vector<32x32xbf16> to vector<32x8xbf16>
    %cst_204 = arith.constant dense<0.000000e+00> : vector<32x8xf32>
    %605 = tpu.matmul %603, %604, %cst_204 {dimension_numbers = #tpu.dot_dimension_numbers<[1], [0], [0], [1], [0, 0, 1, 1], [], []>} : vector<32x32xbf16>, vector<32x8xbf16>, vector<32x8xf32> -> vector<32x8xf32>
    %606 = vector.extract_strided_slice %569 {offsets = [0, 16], sizes = [32, 8], strides = [1, 1]} : vector<32x32xbf16> to vector<32x8xbf16>
    %607 = vector.extract_strided_slice %570 {offsets = [0, 16], sizes = [32, 8], strides = [1, 1]} : vector<32x32xbf16> to vector<32x8xbf16>
    %cst_205 = arith.constant dense<0.000000e+00> : vector<32x32xf32>
    %608 = tpu.matmul %606, %607, %cst_205 {dimension_numbers = #tpu.dot_dimension_numbers<[1], [1], [0], [0], [0, 0, 1, 0], [], []>} : vector<32x8xbf16>, vector<32x8xbf16>, vector<32x32xf32> -> vector<32x32xf32>
    %609 = arith.addf %608, %118 : vector<32x32xf32>
    %cst_206 = arith.constant dense<0xFF800000> : vector<32xf32>
    %610 = vector.multi_reduction <maximumf>, %609, %cst_206 [1] : vector<32x32xf32> to vector<32xf32>
    %611 = vector.shape_cast %610 : vector<32xf32> to vector<32x1xf32>
    %612 = vector.broadcast %611 : vector<32x1xf32> to vector<32x32xf32>
    %613 = arith.subf %609, %612 : vector<32x32xf32>
    %614 = math.exp %613 : vector<32x32xf32>
    %cst_207 = arith.constant dense<0.000000e+00> : vector<32xf32>
    %615 = vector.multi_reduction <add>, %614, %cst_207 [1] : vector<32x32xf32> to vector<32xf32>
    %616 = vector.shape_cast %615 : vector<32xf32> to vector<32x1xf32>
    %617 = tpu.reciprocal %616 {approx = true} : vector<32x1xf32> -> vector<32x1xf32>
    %618 = vector.broadcast %617 : vector<32x1xf32> to vector<32x32xf32>
    %619 = arith.mulf %614, %618 : vector<32x32xf32>
    %620 = arith.truncf %619 : vector<32x32xf32> to vector<32x32xbf16>
    %621 = vector.extract_strided_slice %571 {offsets = [0, 16], sizes = [32, 8], strides = [1, 1]} : vector<32x32xbf16> to vector<32x8xbf16>
    %cst_208 = arith.constant dense<0.000000e+00> : vector<32x8xf32>
    %622 = tpu.matmul %620, %621, %cst_208 {dimension_numbers = #tpu.dot_dimension_numbers<[1], [0], [0], [1], [0, 0, 1, 1], [], []>} : vector<32x32xbf16>, vector<32x8xbf16>, vector<32x8xf32> -> vector<32x8xf32>
    %623 = vector.extract_strided_slice %569 {offsets = [0, 24], sizes = [32, 8], strides = [1, 1]} : vector<32x32xbf16> to vector<32x8xbf16>
    %624 = vector.extract_strided_slice %570 {offsets = [0, 24], sizes = [32, 8], strides = [1, 1]} : vector<32x32xbf16> to vector<32x8xbf16>
    %cst_209 = arith.constant dense<0.000000e+00> : vector<32x32xf32>
    %625 = tpu.matmul %623, %624, %cst_209 {dimension_numbers = #tpu.dot_dimension_numbers<[1], [1], [0], [0], [0, 0, 1, 0], [], []>} : vector<32x8xbf16>, vector<32x8xbf16>, vector<32x32xf32> -> vector<32x32xf32>
    %626 = arith.addf %625, %118 : vector<32x32xf32>
    %cst_210 = arith.constant dense<0xFF800000> : vector<32xf32>
    %627 = vector.multi_reduction <maximumf>, %626, %cst_210 [1] : vector<32x32xf32> to vector<32xf32>
    %628 = vector.shape_cast %627 : vector<32xf32> to vector<32x1xf32>
    %629 = vector.broadcast %628 : vector<32x1xf32> to vector<32x32xf32>
    %630 = arith.subf %626, %629 : vector<32x32xf32>
    %631 = math.exp %630 : vector<32x32xf32>
    %cst_211 = arith.constant dense<0.000000e+00> : vector<32xf32>
    %632 = vector.multi_reduction <add>, %631, %cst_211 [1] : vector<32x32xf32> to vector<32xf32>
    %633 = vector.shape_cast %632 : vector<32xf32> to vector<32x1xf32>
    %634 = tpu.reciprocal %633 {approx = true} : vector<32x1xf32> -> vector<32x1xf32>
    %635 = vector.broadcast %634 : vector<32x1xf32> to vector<32x32xf32>
    %636 = arith.mulf %631, %635 : vector<32x32xf32>
    %637 = arith.truncf %636 : vector<32x32xf32> to vector<32x32xbf16>
    %638 = vector.extract_strided_slice %571 {offsets = [0, 24], sizes = [32, 8], strides = [1, 1]} : vector<32x32xbf16> to vector<32x8xbf16>
    %cst_212 = arith.constant dense<0.000000e+00> : vector<32x8xf32>
    %639 = tpu.matmul %637, %638, %cst_212 {dimension_numbers = #tpu.dot_dimension_numbers<[1], [0], [0], [1], [0, 0, 1, 1], [], []>} : vector<32x32xbf16>, vector<32x8xbf16>, vector<32x8xf32> -> vector<32x8xf32>
    %640 = tpu.concatenate %588, %605, %622, %639 in 1 : vector<32x8xf32>, vector<32x8xf32>, vector<32x8xf32>, vector<32x8xf32> -> vector<32x32xf32>
    %641 = arith.addf %640, %562 : vector<32x32xf32>
    %c2_213 = arith.constant 2 : index
    %c0_214 = arith.constant 0 : index
    %c0_215 = arith.constant 0 : index
    %642 = vector.load %arg10[%c2_213, %c0_214, %c0_215] : memref<3x1x32xf32, #tpu.memory_space<vmem>>, vector<1x1x32xf32>
    %643 = vector.shape_cast %642 : vector<1x1x32xf32> to vector<1x32xf32>
    %c2_216 = arith.constant 2 : index
    %c0_217 = arith.constant 0 : index
    %c0_218 = arith.constant 0 : index
    %644 = vector.load %arg11[%c2_216, %c0_217, %c0_218] : memref<3x1x32xf32, #tpu.memory_space<vmem>>, vector<1x1x32xf32>
    %645 = vector.shape_cast %644 : vector<1x1x32xf32> to vector<1x32xf32>
    %cst_219 = arith.constant dense<0.000000e+00> : vector<32xf32>
    %646 = vector.multi_reduction <add>, %641, %cst_219 [1] : vector<32x32xf32> to vector<32xf32>
    %647 = vector.shape_cast %646 : vector<32xf32> to vector<32x1xf32>
    %cst_220 = arith.constant 3.200000e+01 : f32
    %648 = vector.broadcast %cst_220 : f32 to vector<32x1xf32>
    %649 = arith.divf %647, %648 : vector<32x1xf32>
    %650 = vector.broadcast %649 : vector<32x1xf32> to vector<32x32xf32>
    %651 = arith.subf %641, %650 : vector<32x32xf32>
    %652 = arith.mulf %651, %651 : vector<32x32xf32>
    %cst_221 = arith.constant dense<0.000000e+00> : vector<32xf32>
    %653 = vector.multi_reduction <add>, %652, %cst_221 [1] : vector<32x32xf32> to vector<32xf32>
    %654 = vector.shape_cast %653 : vector<32xf32> to vector<32x1xf32>
    %cst_222 = arith.constant 3.200000e+01 : f32
    %655 = vector.broadcast %cst_222 : f32 to vector<32x1xf32>
    %656 = arith.divf %654, %655 : vector<32x1xf32>
    %657 = vector.broadcast %649 : vector<32x1xf32> to vector<32x32xf32>
    %658 = arith.subf %641, %657 : vector<32x32xf32>
    %cst_223 = arith.constant 9.99999974E-6 : f32
    %659 = vector.broadcast %cst_223 : f32 to vector<32x1xf32>
    %660 = arith.addf %656, %659 : vector<32x1xf32>
    %661 = math.rsqrt %660 : vector<32x1xf32>
    %662 = vector.broadcast %661 : vector<32x1xf32> to vector<32x32xf32>
    %663 = arith.mulf %658, %662 : vector<32x32xf32>
    %664 = vector.broadcast %643 : vector<1x32xf32> to vector<32x32xf32>
    %665 = arith.mulf %663, %664 : vector<32x32xf32>
    %666 = vector.broadcast %645 : vector<1x32xf32> to vector<32x32xf32>
    %667 = arith.addf %665, %666 : vector<32x32xf32>
    %668 = arith.truncf %667 : vector<32x32xf32> to vector<32x32xbf16>
    %669 = arith.truncf %563 : vector<4x32xf32> to vector<4x32xbf16>
    %c2_224 = arith.constant 2 : index
    %c0_225 = arith.constant 0 : index
    %c0_226 = arith.constant 0 : index
    %670 = vector.load %arg12[%c2_224, %c0_225, %c0_226] : memref<3x32x32xbf16, #tpu.memory_space<vmem>>, vector<1x32x32xbf16>
    %671 = vector.shape_cast %670 : vector<1x32x32xbf16> to vector<32x32xbf16>
    %cst_227 = arith.constant dense<0.000000e+00> : vector<4x32xf32>
    %672 = tpu.matmul %669, %671, %cst_227 {dimension_numbers = #tpu.dot_dimension_numbers<[1], [0], [0], [1], [0, 0, 1, 1], [], []>} : vector<4x32xbf16>, vector<32x32xbf16>, vector<4x32xf32> -> vector<4x32xf32>
    %673 = arith.truncf %672 : vector<4x32xf32> to vector<4x32xbf16>
    %c2_228 = arith.constant 2 : index
    %c0_229 = arith.constant 0 : index
    %c0_230 = arith.constant 0 : index
    %674 = vector.load %arg13[%c2_228, %c0_229, %c0_230] : memref<3x32x64xbf16, #tpu.memory_space<vmem>>, vector<1x32x64xbf16>
    %675 = vector.shape_cast %674 : vector<1x32x64xbf16> to vector<32x64xbf16>
    %cst_231 = arith.constant dense<0.000000e+00> : vector<32x64xf32>
    %676 = tpu.matmul %668, %675, %cst_231 {dimension_numbers = #tpu.dot_dimension_numbers<[1], [0], [0], [1], [0, 0, 1, 1], [], []>} : vector<32x32xbf16>, vector<32x64xbf16>, vector<32x64xf32> -> vector<32x64xf32>
    %677 = arith.truncf %676 : vector<32x64xf32> to vector<32x64xbf16>
    %678 = vector.extract_strided_slice %677 {offsets = [0, 0], sizes = [32, 32], strides = [1, 1]} : vector<32x64xbf16> to vector<32x32xbf16>
    %679 = vector.extract_strided_slice %677 {offsets = [0, 32], sizes = [32, 32], strides = [1, 1]} : vector<32x64xbf16> to vector<32x32xbf16>
    %680 = vector.extract_strided_slice %673 {offsets = [0, 0], sizes = [4, 8], strides = [1, 1]} : vector<4x32xbf16> to vector<4x8xbf16>
    %681 = vector.extract_strided_slice %678 {offsets = [0, 0], sizes = [32, 8], strides = [1, 1]} : vector<32x32xbf16> to vector<32x8xbf16>
    %cst_232 = arith.constant dense<0.000000e+00> : vector<4x32xf32>
    %682 = tpu.matmul %680, %681, %cst_232 {dimension_numbers = #tpu.dot_dimension_numbers<[1], [1], [0], [0], [0, 0, 1, 0], [], []>} : vector<4x8xbf16>, vector<32x8xbf16>, vector<4x32xf32> -> vector<4x32xf32>
    %683 = vector.broadcast %119 : vector<1x32xf32> to vector<4x32xf32>
    %684 = arith.addf %682, %683 : vector<4x32xf32>
    %cst_233 = arith.constant dense<0xFF800000> : vector<4xf32>
    %685 = vector.multi_reduction <maximumf>, %684, %cst_233 [1] : vector<4x32xf32> to vector<4xf32>
    %686 = vector.shape_cast %685 : vector<4xf32> to vector<4x1xf32>
    %687 = vector.broadcast %686 : vector<4x1xf32> to vector<4x32xf32>
    %688 = arith.subf %684, %687 : vector<4x32xf32>
    %689 = math.exp %688 : vector<4x32xf32>
    %cst_234 = arith.constant dense<0.000000e+00> : vector<4xf32>
    %690 = vector.multi_reduction <add>, %689, %cst_234 [1] : vector<4x32xf32> to vector<4xf32>
    %691 = vector.shape_cast %690 : vector<4xf32> to vector<4x1xf32>
    %692 = tpu.reciprocal %691 {approx = true} : vector<4x1xf32> -> vector<4x1xf32>
    %693 = vector.broadcast %692 : vector<4x1xf32> to vector<4x32xf32>
    %694 = arith.mulf %689, %693 : vector<4x32xf32>
    %695 = arith.truncf %694 : vector<4x32xf32> to vector<4x32xbf16>
    %696 = vector.extract_strided_slice %679 {offsets = [0, 0], sizes = [32, 8], strides = [1, 1]} : vector<32x32xbf16> to vector<32x8xbf16>
    %cst_235 = arith.constant dense<0.000000e+00> : vector<4x8xf32>
    %697 = tpu.matmul %695, %696, %cst_235 {dimension_numbers = #tpu.dot_dimension_numbers<[1], [0], [0], [1], [0, 0, 1, 1], [], []>} : vector<4x32xbf16>, vector<32x8xbf16>, vector<4x8xf32> -> vector<4x8xf32>
    %698 = vector.extract_strided_slice %673 {offsets = [0, 8], sizes = [4, 8], strides = [1, 1]} : vector<4x32xbf16> to vector<4x8xbf16>
    %699 = vector.extract_strided_slice %678 {offsets = [0, 8], sizes = [32, 8], strides = [1, 1]} : vector<32x32xbf16> to vector<32x8xbf16>
    %cst_236 = arith.constant dense<0.000000e+00> : vector<4x32xf32>
    %700 = tpu.matmul %698, %699, %cst_236 {dimension_numbers = #tpu.dot_dimension_numbers<[1], [1], [0], [0], [0, 0, 1, 0], [], []>} : vector<4x8xbf16>, vector<32x8xbf16>, vector<4x32xf32> -> vector<4x32xf32>
    %701 = vector.broadcast %119 : vector<1x32xf32> to vector<4x32xf32>
    %702 = arith.addf %700, %701 : vector<4x32xf32>
    %cst_237 = arith.constant dense<0xFF800000> : vector<4xf32>
    %703 = vector.multi_reduction <maximumf>, %702, %cst_237 [1] : vector<4x32xf32> to vector<4xf32>
    %704 = vector.shape_cast %703 : vector<4xf32> to vector<4x1xf32>
    %705 = vector.broadcast %704 : vector<4x1xf32> to vector<4x32xf32>
    %706 = arith.subf %702, %705 : vector<4x32xf32>
    %707 = math.exp %706 : vector<4x32xf32>
    %cst_238 = arith.constant dense<0.000000e+00> : vector<4xf32>
    %708 = vector.multi_reduction <add>, %707, %cst_238 [1] : vector<4x32xf32> to vector<4xf32>
    %709 = vector.shape_cast %708 : vector<4xf32> to vector<4x1xf32>
    %710 = tpu.reciprocal %709 {approx = true} : vector<4x1xf32> -> vector<4x1xf32>
    %711 = vector.broadcast %710 : vector<4x1xf32> to vector<4x32xf32>
    %712 = arith.mulf %707, %711 : vector<4x32xf32>
    %713 = arith.truncf %712 : vector<4x32xf32> to vector<4x32xbf16>
    %714 = vector.extract_strided_slice %679 {offsets = [0, 8], sizes = [32, 8], strides = [1, 1]} : vector<32x32xbf16> to vector<32x8xbf16>
    %cst_239 = arith.constant dense<0.000000e+00> : vector<4x8xf32>
    %715 = tpu.matmul %713, %714, %cst_239 {dimension_numbers = #tpu.dot_dimension_numbers<[1], [0], [0], [1], [0, 0, 1, 1], [], []>} : vector<4x32xbf16>, vector<32x8xbf16>, vector<4x8xf32> -> vector<4x8xf32>
    %716 = vector.extract_strided_slice %673 {offsets = [0, 16], sizes = [4, 8], strides = [1, 1]} : vector<4x32xbf16> to vector<4x8xbf16>
    %717 = vector.extract_strided_slice %678 {offsets = [0, 16], sizes = [32, 8], strides = [1, 1]} : vector<32x32xbf16> to vector<32x8xbf16>
    %cst_240 = arith.constant dense<0.000000e+00> : vector<4x32xf32>
    %718 = tpu.matmul %716, %717, %cst_240 {dimension_numbers = #tpu.dot_dimension_numbers<[1], [1], [0], [0], [0, 0, 1, 0], [], []>} : vector<4x8xbf16>, vector<32x8xbf16>, vector<4x32xf32> -> vector<4x32xf32>
    %719 = vector.broadcast %119 : vector<1x32xf32> to vector<4x32xf32>
    %720 = arith.addf %718, %719 : vector<4x32xf32>
    %cst_241 = arith.constant dense<0xFF800000> : vector<4xf32>
    %721 = vector.multi_reduction <maximumf>, %720, %cst_241 [1] : vector<4x32xf32> to vector<4xf32>
    %722 = vector.shape_cast %721 : vector<4xf32> to vector<4x1xf32>
    %723 = vector.broadcast %722 : vector<4x1xf32> to vector<4x32xf32>
    %724 = arith.subf %720, %723 : vector<4x32xf32>
    %725 = math.exp %724 : vector<4x32xf32>
    %cst_242 = arith.constant dense<0.000000e+00> : vector<4xf32>
    %726 = vector.multi_reduction <add>, %725, %cst_242 [1] : vector<4x32xf32> to vector<4xf32>
    %727 = vector.shape_cast %726 : vector<4xf32> to vector<4x1xf32>
    %728 = tpu.reciprocal %727 {approx = true} : vector<4x1xf32> -> vector<4x1xf32>
    %729 = vector.broadcast %728 : vector<4x1xf32> to vector<4x32xf32>
    %730 = arith.mulf %725, %729 : vector<4x32xf32>
    %731 = arith.truncf %730 : vector<4x32xf32> to vector<4x32xbf16>
    %732 = vector.extract_strided_slice %679 {offsets = [0, 16], sizes = [32, 8], strides = [1, 1]} : vector<32x32xbf16> to vector<32x8xbf16>
    %cst_243 = arith.constant dense<0.000000e+00> : vector<4x8xf32>
    %733 = tpu.matmul %731, %732, %cst_243 {dimension_numbers = #tpu.dot_dimension_numbers<[1], [0], [0], [1], [0, 0, 1, 1], [], []>} : vector<4x32xbf16>, vector<32x8xbf16>, vector<4x8xf32> -> vector<4x8xf32>
    %734 = vector.extract_strided_slice %673 {offsets = [0, 24], sizes = [4, 8], strides = [1, 1]} : vector<4x32xbf16> to vector<4x8xbf16>
    %735 = vector.extract_strided_slice %678 {offsets = [0, 24], sizes = [32, 8], strides = [1, 1]} : vector<32x32xbf16> to vector<32x8xbf16>
    %cst_244 = arith.constant dense<0.000000e+00> : vector<4x32xf32>
    %736 = tpu.matmul %734, %735, %cst_244 {dimension_numbers = #tpu.dot_dimension_numbers<[1], [1], [0], [0], [0, 0, 1, 0], [], []>} : vector<4x8xbf16>, vector<32x8xbf16>, vector<4x32xf32> -> vector<4x32xf32>
    %737 = vector.broadcast %119 : vector<1x32xf32> to vector<4x32xf32>
    %738 = arith.addf %736, %737 : vector<4x32xf32>
    %cst_245 = arith.constant dense<0xFF800000> : vector<4xf32>
    %739 = vector.multi_reduction <maximumf>, %738, %cst_245 [1] : vector<4x32xf32> to vector<4xf32>
    %740 = vector.shape_cast %739 : vector<4xf32> to vector<4x1xf32>
    %741 = vector.broadcast %740 : vector<4x1xf32> to vector<4x32xf32>
    %742 = arith.subf %738, %741 : vector<4x32xf32>
    %743 = math.exp %742 : vector<4x32xf32>
    %cst_246 = arith.constant dense<0.000000e+00> : vector<4xf32>
    %744 = vector.multi_reduction <add>, %743, %cst_246 [1] : vector<4x32xf32> to vector<4xf32>
    %745 = vector.shape_cast %744 : vector<4xf32> to vector<4x1xf32>
    %746 = tpu.reciprocal %745 {approx = true} : vector<4x1xf32> -> vector<4x1xf32>
    %747 = vector.broadcast %746 : vector<4x1xf32> to vector<4x32xf32>
    %748 = arith.mulf %743, %747 : vector<4x32xf32>
    %749 = arith.truncf %748 : vector<4x32xf32> to vector<4x32xbf16>
    %750 = vector.extract_strided_slice %679 {offsets = [0, 24], sizes = [32, 8], strides = [1, 1]} : vector<32x32xbf16> to vector<32x8xbf16>
    %cst_247 = arith.constant dense<0.000000e+00> : vector<4x8xf32>
    %751 = tpu.matmul %749, %750, %cst_247 {dimension_numbers = #tpu.dot_dimension_numbers<[1], [0], [0], [1], [0, 0, 1, 1], [], []>} : vector<4x32xbf16>, vector<32x8xbf16>, vector<4x8xf32> -> vector<4x8xf32>
    %752 = tpu.concatenate %697, %715, %733, %751 in 1 : vector<4x8xf32>, vector<4x8xf32>, vector<4x8xf32>, vector<4x8xf32> -> vector<4x32xf32>
    %753 = arith.addf %752, %563 : vector<4x32xf32>
    %c2_248 = arith.constant 2 : index
    %c0_249 = arith.constant 0 : index
    %c0_250 = arith.constant 0 : index
    %754 = vector.load %arg14[%c2_248, %c0_249, %c0_250] : memref<3x1x32xf32, #tpu.memory_space<vmem>>, vector<1x1x32xf32>
    %755 = vector.shape_cast %754 : vector<1x1x32xf32> to vector<1x32xf32>
    %c2_251 = arith.constant 2 : index
    %c0_252 = arith.constant 0 : index
    %c0_253 = arith.constant 0 : index
    %756 = vector.load %arg15[%c2_251, %c0_252, %c0_253] : memref<3x1x32xf32, #tpu.memory_space<vmem>>, vector<1x1x32xf32>
    %757 = vector.shape_cast %756 : vector<1x1x32xf32> to vector<1x32xf32>
    %cst_254 = arith.constant dense<0.000000e+00> : vector<4xf32>
    %758 = vector.multi_reduction <add>, %753, %cst_254 [1] : vector<4x32xf32> to vector<4xf32>
    %759 = vector.shape_cast %758 : vector<4xf32> to vector<4x1xf32>
    %cst_255 = arith.constant 3.200000e+01 : f32
    %760 = vector.broadcast %cst_255 : f32 to vector<4x1xf32>
    %761 = arith.divf %759, %760 : vector<4x1xf32>
    %762 = vector.broadcast %761 : vector<4x1xf32> to vector<4x32xf32>
    %763 = arith.subf %753, %762 : vector<4x32xf32>
    %764 = arith.mulf %763, %763 : vector<4x32xf32>
    %cst_256 = arith.constant dense<0.000000e+00> : vector<4xf32>
    %765 = vector.multi_reduction <add>, %764, %cst_256 [1] : vector<4x32xf32> to vector<4xf32>
    %766 = vector.shape_cast %765 : vector<4xf32> to vector<4x1xf32>
    %cst_257 = arith.constant 3.200000e+01 : f32
    %767 = vector.broadcast %cst_257 : f32 to vector<4x1xf32>
    %768 = arith.divf %766, %767 : vector<4x1xf32>
    %769 = vector.broadcast %761 : vector<4x1xf32> to vector<4x32xf32>
    %770 = arith.subf %753, %769 : vector<4x32xf32>
    %cst_258 = arith.constant 9.99999974E-6 : f32
    %771 = vector.broadcast %cst_258 : f32 to vector<4x1xf32>
    %772 = arith.addf %768, %771 : vector<4x1xf32>
    %773 = math.rsqrt %772 : vector<4x1xf32>
    %774 = vector.broadcast %773 : vector<4x1xf32> to vector<4x32xf32>
    %775 = arith.mulf %770, %774 : vector<4x32xf32>
    %776 = vector.broadcast %755 : vector<1x32xf32> to vector<4x32xf32>
    %777 = arith.mulf %775, %776 : vector<4x32xf32>
    %778 = vector.broadcast %757 : vector<1x32xf32> to vector<4x32xf32>
    %779 = arith.addf %777, %778 : vector<4x32xf32>
    %780 = vector.extract_strided_slice %667 {offsets = [0, 0], sizes = [16, 32], strides = [1, 1]} : vector<32x32xf32> to vector<16x32xf32>
    %c0_259 = arith.constant 0 : index
    %c0_260 = arith.constant 0 : index
    %781 = vector.load %arg17[%c0_259, %c0_260] : memref<32x32xf32, #tpu.memory_space<vmem>>, vector<16x32xf32>
    tpu.vector_store %arg17[%c0_259, %c0_260], %780 {strides = array<i32>} : memref<32x32xf32, #tpu.memory_space<vmem>>, vector<16x32xf32>,
    %c16_261 = arith.constant 16 : index
    %c0_262 = arith.constant 0 : index
    %782 = vector.load %arg17[%c16_261, %c0_262] : memref<32x32xf32, #tpu.memory_space<vmem>>, vector<4x32xf32>
    tpu.vector_store %arg17[%c16_261, %c0_262], %779 {strides = array<i32>} : memref<32x32xf32, #tpu.memory_space<vmem>>, vector<4x32xf32>,
    %783 = vector.extract_strided_slice %667 {offsets = [0, 0], sizes = [20, 32], strides = [1, 1]} : vector<32x32xf32> to vector<20x32xf32>
    %c0_263 = arith.constant 0 : index
    %c0_264 = arith.constant 0 : index
    %784 = vector.load %arg16[%c0_263, %c0_264] : memref<24x32xf32, #tpu.memory_space<vmem>>, vector<20x32xf32>
    tpu.vector_store %arg16[%c0_263, %c0_264], %783 {strides = array<i32>} : memref<24x32xf32, #tpu.memory_space<vmem>>, vector<20x32xf32>,
    %c20 = arith.constant 20 : index
    %c0_265 = arith.constant 0 : index
    %785 = vector.load %arg16[%c20, %c0_265] : memref<24x32xf32, #tpu.memory_space<vmem>>, vector<4x32xf32>
    tpu.vector_store %arg16[%c20, %c0_265], %779 {strides = array<i32>} : memref<24x32xf32, #tpu.memory_space<vmem>>, vector<4x32xf32>,
    return
  }
}

</mosaic_0001>

<bundles_post_ra>
// kernel: graph_star_forward.1
= control target key start
LH: loop header
LB: loop body
LE: loop exit
PB: predicated region body
PF: predicated region fallthrough
CT: control target
= control target key end

     0   :  { %vm69_vm0 = vcmask 1043456   ;;  %v6759_v0 = vmov 0.0   ;;  %vm6760_vm1 = vmmov 0   ;;  %vm65_vm2 = vcmask 64512   ;;  %s6764_s25 = smov 32   ;;  %s6767_s27 = smov 56   ;;  %s8157_s3 = inlined_call_operand.vmem [shape: bf16[8,32], index: 3, kind: input, shape index: {}]   ;;  %s8158_s0 = inlined_call_operand.vmem [shape: f32[16,8], index: 0, kind: input, shape index: {}]   ;;  %s8159_s6 = inlined_call_operand.vmem [shape: bf16[32,256], index: 6, kind: input, shape index: {}]   ;;  %s8160_s5 = inlined_call_operand.vmem [shape: bf16[32,128], index: 5, kind: input, shape index: {}]   ;;  %s8161_s4 = inlined_call_operand.vmem [shape: f32[1,32], index: 4, kind: input, shape index: {}]   ;;  %s8162_s9 = inlined_call_operand.vmem [shape: bf16[3,32,96], index: 9, kind: input, shape index: {}]   ;;  %s8163_s7 = inlined_call_operand.vmem [shape: f32[4,32], index: 7, kind: input, shape index: {}]   ;;  %s8164_s8 = inlined_call_operand.vmem [shape: f32[4,32], index: 8, kind: input, shape index: {}]   ;;  %s8165_s1 = inlined_call_operand.vmem [shape: f32[32,32], index: 1, kind: input, shape index: {}]   ;;  %s8166_s12 = inlined_call_operand.vmem [shape: bf16[3,32,32], index: 12, kind: input, shape index: {}]   ;;  %s8167_s13 = inlined_call_operand.vmem [shape: bf16[3,32,64], index: 13, kind: input, shape index: {}]   ;;  %s8168_s10 = inlined_call_operand.vmem [shape: f32[3,1,32], index: 10, kind: input, shape index: {}]   ;;  %s8169_s11 = inlined_call_operand.vmem [shape: f32[3,1,32], index: 11, kind: input, shape index: {}]   ;;  %s8170_s2 = inlined_call_operand.vmem [shape: f32[1,32], index: 2, kind: input, shape index: {}]   ;;  %s8171_s14 = inlined_call_operand.vmem [shape: f32[3,1,32], index: 14, kind: input, shape index: {}]   ;;  %s8172_s15 = inlined_call_operand.vmem [shape: f32[3,1,32], index: 15, kind: input, shape index: {}]   ;;  %s8173_s16 = inlined_call_operand.vmem [shape: f32[24,32], index: 16, kind: output, shape index: {}]  }
   0x1   :  { %8174 = sst [smem:[#allocation3_spill]] %s8157_s3  ;;  %5866 = vmatprep.subr.bf16.mxu0 %v6759_v0  ;;  %5868 = vmatprep.mubr.msk.bf16.mxu0 %vm6760_vm1, %v6759_v0  ;;  %v54_v2 = vld [vmem:[%s8158_s0] sm:$0xff]  ;;  %v55_v3 = vld [vmem:[%s8158_s0 + $0x8] sm:$0xff]  ;;  %vm117_vm3 = vcmask 261120   ;;  %v6435_v8 = vld [vmem:[%s8159_s6 + $0x14] ss:$8 sps:$4 sm:$0xff]  }
   0x2   :  { %s8175_s23 = sld [smem:[#allocation3_spill]]  ;;  %v56_v5 = vpack.c.bf16 %v55_v3, %v54_v2  ;;  %5872 = vmatprep.subr.bf16.mxu1 %v6759_v0  ;;  %5876 = vmatprep.mubr.msk.bf16.mxu1 %vm6760_vm1, %v6759_v0  ;;  %v6432_v6 = vld [vmem:[%s8159_s6 + $0x4] ss:$8 sps:$4 sm:$0xff]   ;;  %v6430_v7 = vld [vmem:[%s8159_s6] ss:$8 sps:$4 sm:$0xff]   ;;  %742 = vst.msk [vmem:[#allocation2] sm:$0xff] %vm117_vm3, %v6759_v0 }
   0x3   :  { %743 = vst.msk [vmem:[#allocation2 + $0x8] sm:$0xff] %vm117_vm3, %v6759_v0  ;;  %744 = vst.msk [vmem:[#allocation2 + $0x10] sm:$0xff] %vm117_vm3, %v6759_v0  ;;  %v6433_v9 = vld [vmem:[%s8159_s6 + $0x10] ss:$8 sps:$4 sm:$0xff]   ;;  %v6761_v10 = vmov 0   ;;  %v6436_v11 = vld [vmem:[%s8160_s5] sm:$0xff]  }
   0x4   :  { %745 = vst.msk [vmem:[#allocation2 + $0x18] sm:$0xff] %vm117_vm3, %v6759_v0  ;;  %5873 = vmatpush3.bf16.msra.mxu1 %v6436_v11  ;;  %v6437_v12 = vld [vmem:[%s8160_s5 + $0x8] sm:$0xff]   ;;  %v5476_v13 = vld [vmem:[%s8161_s4] ss:$0 sm:$0xff]  ;;  %s6762_s4 = smov 64   ;;  %s6763_s5 = smov 96  }
   0x5   :  { %5874 = vmatprep.subr.bf16.mxu1 %v6759_v0  ;;  %vm308_vm4 = vcmask 122880   ;;  %vm321_vm5 = vcmask 130048   ;;  %vm701_vm6 = vcmask 1040384   ;;  %vm703_vm7 = vcmask 1041408   ;;  %s6768_s28 = smov 80   ;;  %s6769_s29 = smov 112  }
   0x6   :  { %vm705_vm8 = vcmask 1042432   ;;  %vm707_vm9 = vcmask 257024   ;;  %s6770_s30 = smov 48   ;;  %s6772_s0 = smov 104   ;;  %vm1591_vm10 = vcmask 195584  }
   0x7   :  { %s6773_s17 = smov 40   ;;  %s6774_s18 = smov 8  }
   0x8   :  { %v57_v1 = vld [vmem:[%s8175_s23] sm:$0xf]  ;;  %5875 = vmatpush3.bf16.msra.mxu1 %v6437_v12  ;;  %s6775_s19 = smov 16   ;;  %s6776_s22 = smov 24  }
   0x9   :  { %v71_v4 = vsel %vm69_vm0, %v57_v1, 0  ;;  %5880 = vmatprep.subr.bf16.mxu1 %v6759_v0 }
   0xa   :  { %5867 = vmatpush3.bf16.msra.mxu0 %v71_v4 }
   0xb   :  { %217 = vmatprep.subr.bf16.mxu0 %v6432_v6 }
   0xd   :  { %5869 = vmatmul.mubr.msk.bf16.vlgmr.msra.gmra.mrb[0].mxu0 %vm65_vm2, %v56_v5 }
   0xe   :  { %218 = vmatpush1.bf16.msra.mxu0 %v6430_v7  ;;  %249 = vmatprep.mubr.bf16.mxu0 %v6761_v10 }
   0xf   :  { %219 = vmatprep.subr.bf16.mxu0 %v6435_v8 }
  0x12   :  { %220 = vmatpush1.bf16.msra.mxu0 %v6433_v9 }
  0x13   :  { %5886 = vmatprep.subr.bf16.mxu0 %v6759_v0 }
  0xe0   :  { %v107_v14 = vpop.f32.mrb[0].mxu0 }
  0xe1   :  { %v108_v15 = vadd.f32 %v5476_v13, %v107_v14  ;;  %v5870_v16 = vpop.f32.mrb[1].mxu0 }
  0xe2   :  { %v110_v17 = vpop.f32.mrb[2].mxu0 }
  0xe3   :  { %v114_v18 = vmax.f32 %v108_v15, 0.0  ;;  %v111_v19 = vadd.f32 %v5476_v13, %v110_v17  ;;  %v5871_v20 = vpop.f32.mrb[3].mxu0 }
  0xe5   :  { %746 = vst.msk [vmem:[#allocation2] sm:$0xff] %vm117_vm3, %v114_v18  ;;  %v115_v21 = vmax.f32 %v111_v19, 0.0  ;;  %v118_v22 = vsel %vm117_vm3, %v114_v18, 0.0 }
  0xe7   :  { %v116_v23 = vpack.c.bf16 %v115_v21, %v114_v18  ;;  %v119_v24 = vsel %vm117_vm3, %v115_v21, 0.0  ;;  %747 = vst.msk [vmem:[#allocation2 + $0x8] sm:$0xff] %vm117_vm3, %v115_v21 }
  0xe8   :  { %v120_v25 = vadd.f32 %v119_v24, %v118_v22 }
  0xe9   :  { %5485 = vmatmul.mubr.msk.bf16.vlgmr.msra.gmra.mrb[4].mxu0 %vm117_vm3, %v116_v23 }
  0xea   :  { %v121_v26 = vrot.slane %v120_v25, 4  ;;  %5888 = vmatprep.mubr.msk.bf16.mxu0 %vm6760_vm1, %v6759_v0 }
  0xec   :  { %v122_v27 = vadd.f32 %v121_v26, %v120_v25  ;;  %v754_v55 = vld [vmem:[#allocation2] sm:$0xff] }
  0xee   :  { %v123_v28 = vrot.slane %v122_v27, 2  ;;  %v755_v54 = vld [vmem:[#allocation2 + $0x8] sm:$0xff] }
  0xef   :  { %v758_v57 = vpack.c.bf16 %v755_v54, %v754_v55 }
  0xf0   :  { %v124_v29 = vadd.f32 %v123_v28, %v122_v27 }
  0xf2   :  { %v125_v30 = vrot.slane %v124_v29, 1 }
  0xf4   :  { %v126_v31 = vadd.f32 %v125_v30, %v124_v29 }
  0xf6   :  { %v128_v32 = vmul.f32 0.0625, %v126_v31 }
  0xf8   :  { %v129_v33 = vpack.c.bf16 %v128_v32, %v128_v32 }
  0xfa   :  { %5877 = vmatmul.mubr.msk.bf16.vlgmr.msra.gmra.mrb[0].mxu1 %vm117_vm3, %v129_v33 }
  0xfb   :  { %5882 = vmatprep.mubr.msk.bf16.mxu1 %vm6760_vm1, %v6759_v0 }
 0x1bc   :  { %v251_v34 = vpop.f32.mrb[4].mxu0 }
 0x1bd   :  { %v253_v35 = vpop.f32.mrb[5].mxu0 }
 0x1be   :  { %v255_v36 = vpop.f32.mrb[6].mxu0 }
 0x1bf   :  { %v260_v37 = vpack.c.bf16 %v255_v36, %v251_v34  ;;  %v257_v38 = vpop.f32.mrb[7].mxu0 }
 0x1c0   :  { %v6920_v39 = vpack.c.bf16 %v257_v38, %v253_v35 }
 0x1c1   :  { %478 = vrot.lane.b32.xlu1 %v260_v37, %s6762_s4  ;;  %369 = vrot.lane.b32.xlu0 %v260_v37, %s6763_s5  ;;  %v266_v40 = vsel %vm117_vm3, %v260_v37, 0 }
 0x1c2   :  { %5881 = vmatpush3.bf16.xpose.msra.mxu1 %v266_v40  ;;  %5887 = vmatpush3.bf16.msra.mxu0 %v6920_v39 }
 0x1c3   :  { %5892 = vmatprep.subr.bf16.mxu1 %v6759_v0  ;;  %5898 = vmatprep.subr.bf16.mxu0 %v6759_v0 }
 0x1cd   :  { %v183_v41 = vpop.f32.mrb[0].mxu1 }
 0x1ce   :  { %v189_v42 = vpack.c.bf16 %v183_v41, %v183_v41  ;;  %v5878_v43 = vpop.f32.mrb[1].mxu1 }
 0x1cf   :  { %v186_v44 = vpop.f32.mrb[2].mxu1 }
 0x1d0   :  { %v5879_v45 = vpop.f32.mrb[3].mxu1  ;;  %476 = vrot.lane.b32.xlu1 %v189_v42, %s6762_s4  ;;  %366 = vrot.lane.b32.xlu0 %v189_v42, %s6763_s5 }
 0x1d1   :  { %5883 = vmatmul.mubr.msk.bf16.vlgmr.msra.gmra.mrb[4].mxu1 %vm117_vm3, %v189_v42 }
 0x1d2   :  { %5894 = vmatprep.mubr.msk.bf16.mxu1 %vm6760_vm1, %v6759_v0 }
 0x1d4   :  { %584 = vrot.lane.b32.xlu1 %v189_v42, %s6764_s25  ;;  %586 = vrot.lane.b32.xlu0 %v260_v37, %s6764_s25 }
 0x233   :  { %v370_v46 = vpop.permute.xlu0 %369  ;;  %v479_v48 = vpop.permute.xlu1 %478 }
 0x234   :  { %v375_v47 = vsel %vm117_vm3, %v370_v46, 0  ;;  %v484_v50 = vsel %vm117_vm3, %v479_v48, 0 }
 0x235   :  { %5893 = vmatpush3.bf16.xpose.msra.mxu1 %v375_v47 }
 0x236   :  { %5904 = vmatprep.subr.bf16.mxu1 %v6759_v0 }
 0x242   :  { %v367_v49 = vpop.permute.xlu0 %366  ;;  %v477_v52 = vpop.permute.xlu1 %476 }
 0x243   :  { %5895 = vmatmul.mubr.msk.bf16.vlgmr.msra.gmra.mrb[8].mxu1 %vm117_vm3, %v367_v49 }
 0x244   :  { %5905 = vmatpush3.bf16.xpose.msra.mxu1 %v484_v50  ;;  %5906 = vmatprep.mubr.msk.bf16.mxu1 %vm6760_vm1, %v6759_v0 }
 0x245   :  { %5916 = vmatprep.subr.bf16.mxu1 %v6759_v0 }
 0x246   :  { %v587_v51 = vpop.permute.xlu0 %586  ;;  %v585_v56 = vpop.permute.xlu1 %584 }
 0x247   :  { %v592_v53 = vsel %vm117_vm3, %v587_v51, 0 }
 0x24b   :  { %5907 = vmatmul.mubr.msk.bf16.vlgmr.msra.gmra.mrb[12].mxu1 %vm117_vm3, %v477_v52 }
 0x24c   :  { %5917 = vmatpush3.bf16.xpose.msra.mxu1 %v592_v53  ;;  %5918 = vmatprep.mubr.msk.bf16.mxu1 %vm6760_vm1, %v6759_v0 }
 0x253   :  { %5919 = vmatmul.mubr.msk.bf16.vlgmr.msra.gmra.mrb[16].mxu1 %vm117_vm3, %v585_v56 }
 0x254   :  { %5932 = vmatprep.mubr.msk.bf16.mxu1 %vm117_vm3, %v758_v57 }
 0x2a4   :  { %v302_v58 = vpop.f32.mrb[4].mxu1 }
 0x2a5   :  { %v5884_v59 = vpop.f32.mrb[5].mxu1  ;;  %v309_v60 = vsel %vm308_vm4, %v302_v58, -inf }
 0x2a6   :  { %310 = vmax.xlane.f32.xlu0 %v309_v60  ;;  %v305_v61 = vpop.f32.mrb[6].mxu1 }
 0x2a7   :  { %v5885_v62 = vpop.f32.mrb[7].mxu1 }
 0x316   :  { %v411_v63 = vpop.f32.mrb[8].mxu1 }
 0x317   :  { %v5896_v1 = vpop.f32.mrb[9].mxu1  ;;  %v417_v2 = vsel %vm308_vm4, %v411_v63, -inf }
 0x318   :  { %418 = vmax.xlane.f32.xlu1 %v417_v2  ;;  %v414_v3 = vpop.f32.mrb[10].mxu1 }
 0x319   :  { %v5897_v4 = vpop.f32.mrb[11].mxu1 }
 0x31e   :  { %v520_v5 = vpop.f32.mrb[12].mxu1 }
 0x31f   :  { %v5908_v6 = vpop.f32.mrb[13].mxu1  ;;  %v526_v7 = vsel %vm308_vm4, %v520_v5, -inf }
 0x320   :  { %527 = vmax.xlane.f32.xlu0 %v526_v7  ;;  %v523_v8 = vpop.f32.mrb[14].mxu1 }
 0x321   :  { %v5909_v9 = vpop.f32.mrb[15].mxu1 }
 0x326   :  { %v628_v10 = vpop.f32.mrb[16].mxu1 }
 0x327   :  { %v5920_v11 = vpop.f32.mrb[17].mxu1  ;;  %v634_v12 = vsel %vm308_vm4, %v628_v10, -inf }
 0x328   :  { %635 = vmax.xlane.f32.xlu0 %v634_v12  ;;  %v631_v13 = vpop.f32.mrb[18].mxu1 }
 0x329   :  { %v5921_v14 = vpop.f32.mrb[19].mxu1 }
 0x333   :  { %v311_v15 = vpop.xlane.xlu0 %310 }
 0x334   :  { %v312_v16 = vsub.f32 %v302_v58, %v311_v15 }
 0x336   :  { %v313_v17 = vmul.f32 1.442695, %v312_v16 }
 0x338   :  { %6456 = vpow2.f32 %v313_v17 }
 0x342   :  { %v6457_v18 = vpop.eup %6456 }
 0x343   :  { %v315_v19 = vsel %vm308_vm4, %v6457_v18, 0.0 }
 0x344   :  { %316 = vadd.xlane.f32.xlu1 %v315_v19 }
 0x355   :  { %430 = vrot.lane.b32.xlu1 %v6920_v39, %s6763_s5 }
 0x3a5   :  { %v419_v20 = vpop.xlane.xlu1 %418 }
 0x3a6   :  { %v420_v21 = vsub.f32 %v411_v63, %v419_v20 }
 0x3a8   :  { %v421_v22 = vmul.f32 1.442695, %v420_v21 }
 0x3aa   :  { %6458 = vpow2.f32 %v421_v22 }
 0x3ad   :  { %v528_v23 = vpop.xlane.xlu0 %527 }
 0x3ae   :  { %v529_v24 = vsub.f32 %v520_v5, %v528_v23 }
 0x3b0   :  { %v530_v25 = vmul.f32 1.442695, %v529_v24 }
 0x3b2   :  { %6460 = vpow2.f32 %v530_v25 }
 0x3b4   :  { %v6459_v26 = vpop.eup %6458 }
 0x3b5   :  { %v636_v27 = vpop.xlane.xlu0 %635  ;;  %v423_v28 = vsel %vm308_vm4, %v6459_v26, 0.0 }
 0x3b6   :  { %v637_v29 = vsub.f32 %v628_v10, %v636_v27  ;;  %424 = vadd.xlane.f32.xlu0 %v423_v28  ;;  %v6439_v27 = vld [vmem:[%s8162_s9 + $0x8] sm:$0xff]  }
 0x3b8   :  { %v638_v30 = vmul.f32 1.442695, %v637_v29 }
 0x3ba   :  { %6462 = vpow2.f32 %v638_v30 }
 0x3bc   :  { %v6461_v31 = vpop.eup %6460 }
 0x3bd   :  { %v532_v32 = vsel %vm308_vm4, %v6461_v31, 0.0 }
 0x3be   :  { %533 = vadd.xlane.f32.xlu1 %v532_v32 }
 0x3c4   :  { %v6463_v33 = vpop.eup %6462 }
 0x3c5   :  { %v640_v34 = vsel %vm308_vm4, %v6463_v33, 0.0 }
 0x3c6   :  { %641 = vadd.xlane.f32.xlu0 %v640_v34 }
 0x3cf   :  { %646 = vrot.lane.b32.xlu1 %v6920_v39, %s6764_s25  ;;  %s6765_s25 = smov 88  }
 0x3d1   :  { %v317_v35 = vpop.xlane.xlu1 %316 }
 0x3d2   :  { %6464 = vrcp.f32 %v317_v35 }
 0x3d5   :  { %v431_v40 = vpop.permute.xlu1 %430 }
 0x3dc   :  { %v6465_v36 = vpop.eup %6464  ;;  %538 = vrot.lane.b32.xlu0 %v6920_v39, %s6762_s4 }
 0x3dd   :  { %v319_v37 = vmul.f32 %v6465_v36, %v6457_v18 }
 0x3df   :  { %v320_v38 = vpack.c.bf16 %v319_v37, %v319_v37 }
 0x3e1   :  { %5889 = vmatmul.mubr.msk.bf16.vlgmr.msra.gmra.mrb[8].mxu0 %vm321_vm5, %v320_v38 }
 0x3e2   :  { %5899 = vmatpush3.bf16.msra.mxu0 %v431_v40  ;;  %5900 = vmatprep.mubr.msk.bf16.mxu0 %vm6760_vm1, %v6759_v0  ;;  %v738_v40 = vld [vmem:[%s8163_s7] sm:$0xf] }
 0x3e3   :  { %5910 = vmatprep.subr.bf16.mxu0 %v6759_v0 }
 0x443   :  { %v425_v41 = vpop.xlane.xlu0 %424 }
 0x444   :  { %6466 = vrcp.f32 %v425_v41 }
 0x44b   :  { %v534_v42 = vpop.xlane.xlu1 %533 }
 0x44c   :  { %6468 = vrcp.f32 %v534_v42  ;;  %v740_v42 = vld [vmem:[%s8164_s8] sm:$0xf] }
 0x44e   :  { %v6467_v43 = vpop.eup %6466 }
 0x44f   :  { %v427_v44 = vmul.f32 %v6467_v43, %v6459_v26  ;;  %v647_v50 = vpop.permute.xlu1 %646  ;;  %v6438_v26 = vld [vmem:[%s8162_s9] sm:$0xff]  }
 0x450   :  { %5928 = vmatprep.subr.bf16.mxu1 %v6438_v26 }
 0x451   :  { %v428_v45 = vpack.c.bf16 %v427_v44, %v427_v44  ;;  %5929 = vmatpush3.bf16.msra.mxu1 %v6438_v26 }
 0x452   :  { %5930 = vmatprep.subr.bf16.mxu1 %v6439_v27 }
 0x453   :  { %v642_v39 = vpop.xlane.xlu0 %641  ;;  %5901 = vmatmul.mubr.msk.bf16.vlgmr.msra.gmra.mrb[12].mxu0 %vm321_vm5, %v428_v45  ;;  %v6989_v45 = vld [vmem:[#allocation2 + $0x18] sm:$0xff] }
 0x454   :  { %6470 = vrcp.f32 %v642_v39  ;;  %5912 = vmatprep.mubr.msk.bf16.mxu0 %vm6760_vm1, %v6759_v0 }
 0x455   :  { %5931 = vmatpush3.bf16.msra.mxu1 %v6439_v27 }
 0x456   :  { %v6469_v46 = vpop.eup %6468 }
 0x457   :  { %v539_v47 = vpop.permute.xlu0 %538  ;;  %v536_v48 = vmul.f32 %v6469_v46, %v6461_v31 }
 0x458   :  { %5911 = vmatpush3.bf16.msra.mxu0 %v539_v47 }
 0x459   :  { %v537_v49 = vpack.c.bf16 %v536_v48, %v536_v48  ;;  %5922 = vmatprep.subr.bf16.mxu0 %v6759_v0 }
 0x45b   :  { %5913 = vmatmul.mubr.msk.bf16.vlgmr.msra.gmra.mrb[16].mxu0 %vm321_vm5, %v537_v49 }
 0x45c   :  { %5923 = vmatpush3.bf16.msra.mxu0 %v647_v50  ;;  %5924 = vmatprep.mubr.msk.bf16.mxu0 %vm6760_vm1, %v6759_v0 }
 0x45e   :  { %v6471_v51 = vpop.eup %6470 }
 0x45f   :  { %v644_v52 = vmul.f32 %v6471_v51, %v6463_v33 }
 0x461   :  { %v645_v53 = vpack.c.bf16 %v644_v52, %v644_v52 }
 0x463   :  { %5925 = vmatmul.mubr.msk.bf16.vlgmr.msra.gmra.mrb[20].mxu0 %vm321_vm5, %v645_v53 }
 0x4b4   :  { %v359_v54 = vpop.f32.mrb[8].mxu0 }
 0x4b5   :  { %v5890_v55 = vpop.f32.mrb[9].mxu0 }
 0x4b6   :  { %v362_v56 = vpop.f32.mrb[10].mxu0 }
 0x4b7   :  { %v5891_v57 = vpop.f32.mrb[11].mxu0 }
 0x4b8   :  { %v7015_v57 = vld [vmem:[%s8165_s1] sm:$0xff] }
 0x526   :  { %v470_v58 = vpop.f32.mrb[12].mxu0 }
 0x527   :  { %v693_v59 = vrot.slane %v470_v58, 7  ;;  %v5902_v60 = vpop.f32.mrb[13].mxu0 }
 0x528   :  { %v473_v61 = vpop.f32.mrb[14].mxu0  ;;  %v7020_v60 = vld [vmem:[%s8165_s1 + $0x18] sm:$0xff] }
 0x529   :  { %v702_v62 = vsel %vm701_vm6, %v359_v54, %v693_v59  ;;  %v5903_v63 = vpop.f32.mrb[15].mxu0  ;;  %v7025_v61 = vld [vmem:[%s8165_s1 + $0x8] sm:$0xff] }
 0x52e   :  { %v578_v1 = vpop.f32.mrb[16].mxu0 }
 0x52f   :  { %v696_v2 = vrot.slane %v578_v1, 6  ;;  %v5914_v3 = vpop.f32.mrb[17].mxu0  ;;  %v7031_v1 = vld [vmem:[%s8165_s1 + $0x10] sm:$0xff] }
 0x530   :  { %v581_v4 = vpop.f32.mrb[18].mxu0 }
 0x531   :  { %v5915_v5 = vpop.f32.mrb[19].mxu0  ;;  %v704_v6 = vsel %vm703_vm7, %v702_v62, %v696_v2 }
 0x536   :  { %v686_v7 = vpop.f32.mrb[20].mxu0 }
 0x537   :  { %v699_v8 = vrot.slane %v686_v7, 5  ;;  %v5926_v9 = vpop.f32.mrb[21].mxu0 }
 0x538   :  { %v689_v10 = vpop.f32.mrb[22].mxu0 }
 0x539   :  { %v5927_v11 = vpop.f32.mrb[23].mxu0  ;;  %v706_v12 = vsel %vm705_vm8, %v704_v6, %v699_v8 }
 0x53a   :  { %v708_v13 = vsel %vm707_vm9, %v706_v12, 0.0 }
 0x53b   :  { %709 = vadd.xlane.f32.xlu1 %v708_v13 }
 0x5c8   :  { %v710_v14 = vpop.xlane.xlu1 %709 }
 0x5c9   :  { %v711_v15 = vrot.slane %v710_v14, 4 }
 0x5cb   :  { %v712_v16 = vadd.f32 %v711_v15, %v710_v14 }
 0x5cd   :  { %v713_v17 = vrot.slane %v712_v16, 2 }
 0x5cf   :  { %v714_v18 = vadd.f32 %v713_v17, %v712_v16 }
 0x5d1   :  { %v715_v19 = vrot.slane %v714_v18, 1 }
 0x5d3   :  { %v716_v20 = vadd.f32 %v715_v19, %v714_v18 }
 0x5d5   :  { %6408 = vpush %v716_v20 }
 0x606   :  { %s6409_s26 = spop %6408 }
 0x607   :  { %v718_v21 = vstv %s6409_s26  ;;  %s6766_s26 = smov 120  }
 0x608   :  { %v720_v22 = vmul.f32 0.0078125, %v718_v21 }
 0x60a   :  { %v721_v23 = vsub.f32 %v706_v12, %v720_v22 }
 0x60c   :  { %v722_v24 = vmul.f32 %v721_v23, %v721_v23 }
 0x60e   :  { %v723_v25 = vsel %vm707_vm9, %v722_v24, 0.0 }
 0x60f   :  { %724 = vadd.xlane.f32.xlu0 %v723_v25 }
 0x69c   :  { %v725_v28 = vpop.xlane.xlu0 %724 }
 0x69d   :  { %v726_v29 = vrot.slane %v725_v28, 4 }
 0x69f   :  { %v727_v30 = vadd.f32 %v726_v29, %v725_v28 }
 0x6a1   :  { %v728_v31 = vrot.slane %v727_v30, 2 }
 0x6a3   :  { %v729_v32 = vadd.f32 %v728_v31, %v727_v30 }
 0x6a5   :  { %v730_v33 = vrot.slane %v729_v32, 1 }
 0x6a7   :  { %v731_v34 = vadd.f32 %v730_v33, %v729_v32 }
 0x6a9   :  { %6410 = vpush %v731_v34 }
 0x6da   :  { %s6411_s3 = spop %6410 }
 0x6db   :  { %v733_v35 = vstv %s6411_s3  ;;  %s6771_s3 = smov 72  }
 0x6dc   :  { %v734_v36 = vmul.f32 0.0078125, %v733_v35 }
 0x6de   :  { %v735_v37 = vadd.f32 1e-05, %v734_v36 }
 0x6e0   :  { %6472 = vrsqrt.f32 %v735_v37 }
 0x6ea   :  { %v6473_v38 = vpop.eup %6472 }
 0x6eb   :  { %v737_v41 = vmul.f32 %v6473_v38, %v721_v23 }
 0x6ed   :  { %v739_v43 = vmul.f32 %v738_v40, %v737_v41 }
 0x6ef   :  { %v741_v44 = vadd.f32 %v740_v42, %v739_v43 }
 0x6f1   :  { %748 = vst.msk [vmem:[#allocation2 + $0x10] sm:$0xf] %vm707_vm9, %v741_v44 }
 0x6f8   :  { %v6991_v39 = vld [vmem:[#allocation2 + $0x10] sm:$0xff] }
 0x6f9   :  { %v759_v46 = vpack.c.bf16 %v6989_v45, %v6991_v39 }
 0x6fb   :  { %5933 = vmatmul.mubr.msk.bf16.vlgmr.msra.gmra.mrb[20].mxu1 %vm117_vm3, %v759_v46 }
 0x7ce   :  { %v5934_v47 = vpop.f32.mrb[20].mxu1 }
 0x7cf   :  { %v816_v48 = vpop.f32.mrb[21].mxu1 }
 0x7d0   :  { %v5935_v49 = vpop.f32.mrb[22].mxu1 }
 0x7d1   :  { %v6996_v50 = vpack.c.bf16 %v5935_v49, %v5934_v47  ;;  %v819_v51 = vpop.f32.mrb[23].mxu1 }
 0x7d2   :  { %v6998_v52 = vpack.c.bf16 %v819_v51, %v816_v48 }
 0x7d3   :  { %837 = vrot.lane.b32.xlu1 %v6996_v50, %s6763_s5 }
 0x7d4   :  { %835 = vrot.lane.b32.xlu0 %v6998_v52, %s6763_s5  ;;  %5940 = vmatprep.mubr.msk.bf16.mxu0 %vm65_vm2, %v6998_v52 }
 0x845   :  { %v838_v55 = vpop.permute.xlu1 %837 }
 0x846   :  { %v836_v53 = vpop.permute.xlu0 %835  ;;  %v849_v56 = vsel %vm65_vm2, %v838_v55, 0 }
 0x847   :  { %6384 = vmatprep.subr.msk.bf16.mxu0 %vm65_vm2, %v836_v53  ;;  %v846_v54 = vsel %vm65_vm2, %v836_v53, 0 }
 0x848   :  { %5937 = vmatpush3.bf16.xpose.msra.mxu0 %v846_v54 }
 0x849   :  { %6385 = vmatprep.subr.msk.bf16.mxu0 %vm65_vm2, %v838_v55 }
 0x850   :  { %5939 = vmatpush3.bf16.xpose.msra.mxu0 %v849_v56 }
 0x857   :  { %5941 = vmatmul.mubr.msk.bf16.vlgmr.msra.gmra.mrb[24].mxu0 %vm65_vm2, %v6996_v50 }
 0x92a   :  { %v5942_v58 = vpop.f32.mrb[24].mxu0 }
 0x92b   :  { %v885_v59 = vpop.f32.mrb[25].mxu0  ;;  %v894_v6 = vadd.f32 %v5942_v58, %v7031_v1 }
 0x92c   :  { %v886_v62 = vadd.f32 %v885_v59, %v7015_v57  ;;  %v5943_v63 = vpop.f32.mrb[26].mxu0 }
 0x92d   :  { %v888_v2 = vpop.f32.mrb[27].mxu0  ;;  %v897_v3 = vadd.f32 %v5943_v63, %v7020_v60  ;;  %v906_v9 = vsel %vm117_vm3, %v894_v6, -inf }
 0x92e   :  { %v889_v4 = vadd.f32 %v888_v2, %v7025_v61  ;;  %v900_v5 = vsel %vm117_vm3, %v886_v62, -inf }
 0x92f   :  { %901 = vmax.xlane.f32.xlu1 %v900_v5  ;;  %v909_v8 = vsel %vm117_vm3, %v897_v3, -inf }
 0x930   :  { %v903_v7 = vsel %vm117_vm3, %v889_v4, -inf }
 0x931   :  { %904 = vmax.xlane.f32.xlu0 %v903_v7 }
 0x933   :  { %910 = vmax.xlane.f32.xlu1 %v909_v8 }
 0x935   :  { %907 = vmax.xlane.f32.xlu0 %v906_v9 }
 0x944   :  { %948 = vrot.lane.b32.xlu1 %v6996_v50, %s6762_s4 }
 0x9bc   :  { %v902_v10 = vpop.xlane.xlu1 %901 }
 0x9bd   :  { %v912_v14 = vsub.f32 %v886_v62, %v902_v10 }
 0x9be   :  { %v905_v11 = vpop.xlane.xlu0 %904 }
 0x9bf   :  { %v913_v12 = vsub.f32 %v889_v4, %v905_v11  ;;  %v916_v20 = vmul.f32 1.442695, %v912_v14 }
 0x9c0   :  { %v911_v13 = vpop.xlane.xlu1 %910 }
 0x9c1   :  { %v915_v15 = vsub.f32 %v897_v3, %v911_v13  ;;  %v918_v16 = vmul.f32 1.442695, %v913_v12 }
 0x9c2   :  { %v908_v17 = vpop.xlane.xlu0 %907 }
 0x9c3   :  { %v922_v18 = vmul.f32 1.442695, %v915_v15  ;;  %v914_v19 = vsub.f32 %v894_v6, %v908_v17 }
 0x9c4   :  { %v949_v30 = vpop.permute.xlu1 %948 }
 0x9c5   :  { %6474 = vpow2.f32 %v922_v18  ;;  %v920_v21 = vmul.f32 1.442695, %v914_v19 }
 0x9c6   :  { %6476 = vpow2.f32 %v918_v16 }
 0x9c7   :  { %6478 = vpow2.f32 %v920_v21 }
 0x9c8   :  { %6480 = vpow2.f32 %v916_v20 }
 0x9cf   :  { %v6475_v22 = vpop.eup %6474 }
 0x9d0   :  { %v6477_v23 = vpop.eup %6476  ;;  %v933_v24 = vsel %vm117_vm3, %v6475_v22, 0.0 }
 0x9d1   :  { %v6479_v25 = vpop.eup %6478  ;;  %934 = vadd.xlane.f32.xlu1 %v933_v24  ;;  %v927_v28 = vsel %vm117_vm3, %v6477_v23, 0.0 }
 0x9d2   :  { %v930_v26 = vsel %vm117_vm3, %v6479_v25, 0.0  ;;  %v6481_v27 = vpop.eup %6480 }
 0x9d3   :  { %931 = vadd.xlane.f32.xlu0 %v930_v26  ;;  %v924_v29 = vsel %vm117_vm3, %v6481_v27, 0.0 }
 0x9d5   :  { %928 = vadd.xlane.f32.xlu1 %v927_v28 }
 0x9d7   :  { %925 = vadd.xlane.f32.xlu0 %v924_v29 }
 0x9e6   :  { %1011 = vrot.lane.b32.xlu1 %v6998_v52, %s6765_s25 }
 0x9ea   :  { %1007 = vrot.lane.b32.xlu1 %v6998_v52, %s6766_s26 }
 0x9ed   :  { %946 = vrot.lane.b32.xlu0 %v6998_v52, %s6762_s4 }
 0x9f1   :  { %1013 = vrot.lane.b32.xlu0 %v6996_v50, %s6765_s25 }
 0x9f5   :  { %1009 = vrot.lane.b32.xlu0 %v6996_v50, %s6766_s26 }
 0xa5e   :  { %v935_v31 = vpop.xlane.xlu1 %934 }
 0xa60   :  { %v932_v32 = vpop.xlane.xlu0 %931 }
 0xa61   :  { %6482 = vrcp.f32 %v932_v32 }
 0xa62   :  { %v929_v33 = vpop.xlane.xlu1 %928 }
 0xa63   :  { %6484 = vrcp.f32 %v929_v33 }
 0xa64   :  { %6486 = vrcp.f32 %v935_v31  ;;  %v926_v34 = vpop.xlane.xlu0 %925 }
 0xa65   :  { %6488 = vrcp.f32 %v926_v34 }
 0xa66   :  { %v1012_v40 = vpop.permute.xlu1 %1011 }
 0xa67   :  { %v1022_v51 = vsel %vm65_vm2, %v1012_v40, 0 }
 0xa68   :  { %v947_v35 = vpop.permute.xlu0 %946 }
 0xa69   :  { %5944 = vmatprep.subr.bf16.mxu1 %v947_v35 }
 0xa6a   :  { %5945 = vmatpush3.bf16.msra.mxu1 %v947_v35  ;;  %v1008_v49 = vpop.permute.xlu1 %1007 }
 0xa6b   :  { %5946 = vmatprep.subr.bf16.mxu1 %v949_v30  ;;  %v6483_v36 = vpop.eup %6482 }
 0xa6c   :  { %v942_v42 = vmul.f32 %v6483_v36, %v6479_v25  ;;  %v1014_v53 = vpop.permute.xlu0 %1013 }
 0xa6d   :  { %v6485_v37 = vpop.eup %6484  ;;  %v1025_v54 = vsel %vm65_vm2, %v1014_v53, 0 }
 0xa6e   :  { %v6487_v38 = vpop.eup %6486  ;;  %5947 = vmatpush3.bf16.msra.mxu1 %v949_v30  ;;  %v941_v44 = vmul.f32 %v6485_v37, %v6477_v23 }
 0xa6f   :  { %v6489_v41 = vpop.eup %6488  ;;  %6386 = vmatprep.subr.msk.bf16.mxu1 %vm65_vm2, %v1012_v40  ;;  %v943_v46 = vmul.f32 %v6487_v38, %v6475_v22 }
 0xa70   :  { %v940_v43 = vmul.f32 %v6489_v41, %v6481_v27  ;;  %v1010_v55 = vpop.permute.xlu0 %1009 }
 0xa71   :  { %v945_v48 = vpack.c.bf16 %v943_v46, %v942_v42 }
 0xa72   :  { %v944_v47 = vpack.c.bf16 %v941_v44, %v940_v43 }
 0xa74   :  { %5948 = vmatprep.mubr.msk.bf16.mxu1 %vm117_vm3, %v944_v47 }
 0xa75   :  { %5949 = vmatmul.mubr.msk.bf16.vlgmr.msra.gmra.mrb[24].mxu1 %vm117_vm3, %v945_v48 }
 0xa76   :  { %5956 = vmatprep.mubr.msk.bf16.mxu1 %vm65_vm2, %v1008_v49 }
 0xa77   :  { %5953 = vmatpush3.bf16.xpose.msra.mxu1 %v1022_v51 }
 0xa78   :  { %6387 = vmatprep.subr.msk.bf16.mxu1 %vm65_vm2, %v1014_v53 }
 0xa7f   :  { %5955 = vmatpush3.bf16.xpose.msra.mxu1 %v1025_v54 }
 0xa86   :  { %5957 = vmatmul.mubr.msk.bf16.vlgmr.msra.gmra.mrb[28].mxu1 %vm65_vm2, %v1010_v55 }
 0xb48   :  { %v7064_v56 = vpop.f32.mrb[24].mxu1 }
 0xb49   :  { %v7066_v58 = vpop.f32.mrb[25].mxu1 }
 0xb4a   :  { %v7068_v59 = vpop.f32.mrb[26].mxu1 }
 0xb4b   :  { %v7070_v62 = vpop.f32.mrb[27].mxu1 }
 0xb59   :  { %v5958_v63 = vpop.f32.mrb[28].mxu1 }
 0xb5a   :  { %v1061_v2 = vpop.f32.mrb[29].mxu1  ;;  %v1070_v9 = vadd.f32 %v5958_v63, %v7031_v1 }
 0xb5b   :  { %v1062_v3 = vadd.f32 %v1061_v2, %v7015_v57  ;;  %v5959_v4 = vpop.f32.mrb[30].mxu1 }
 0xb5c   :  { %v1064_v5 = vpop.f32.mrb[31].mxu1  ;;  %v1073_v6 = vadd.f32 %v5959_v4, %v7020_v60  ;;  %v1082_v12 = vsel %vm117_vm3, %v1070_v9, -inf }
 0xb5d   :  { %v1065_v7 = vadd.f32 %v1064_v5, %v7025_v61  ;;  %v1076_v8 = vsel %vm117_vm3, %v1062_v3, -inf }
 0xb5e   :  { %1077 = vmax.xlane.f32.xlu1 %v1076_v8  ;;  %v1085_v11 = vsel %vm117_vm3, %v1073_v6, -inf }
 0xb5f   :  { %v1079_v10 = vsel %vm117_vm3, %v1065_v7, -inf }
 0xb60   :  { %1080 = vmax.xlane.f32.xlu0 %v1079_v10 }
 0xb62   :  { %1086 = vmax.xlane.f32.xlu1 %v1085_v11 }
 0xb64   :  { %1083 = vmax.xlane.f32.xlu0 %v1082_v12 }
 0xb73   :  { %1124 = vrot.lane.b32.xlu1 %v6996_v50, %s6767_s27 }
 0xbeb   :  { %v1078_v13 = vpop.xlane.xlu1 %1077 }
 0xbec   :  { %v1088_v17 = vsub.f32 %v1062_v3, %v1078_v13 }
 0xbed   :  { %v1081_v14 = vpop.xlane.xlu0 %1080 }
 0xbee   :  { %v1089_v15 = vsub.f32 %v1065_v7, %v1081_v14  ;;  %v1092_v23 = vmul.f32 1.442695, %v1088_v17 }
 0xbef   :  { %v1087_v16 = vpop.xlane.xlu1 %1086 }
 0xbf0   :  { %v1091_v18 = vsub.f32 %v1073_v6, %v1087_v16  ;;  %v1094_v19 = vmul.f32 1.442695, %v1089_v15 }
 0xbf1   :  { %v1084_v20 = vpop.xlane.xlu0 %1083 }
 0xbf2   :  { %v1098_v21 = vmul.f32 1.442695, %v1091_v18  ;;  %v1090_v22 = vsub.f32 %v1070_v9, %v1084_v20 }
 0xbf3   :  { %v1125_v33 = vpop.permute.xlu1 %1124 }
 0xbf4   :  { %6490 = vpow2.f32 %v1098_v21  ;;  %v1096_v24 = vmul.f32 1.442695, %v1090_v22 }
 0xbf5   :  { %6492 = vpow2.f32 %v1094_v19 }
 0xbf6   :  { %6494 = vpow2.f32 %v1096_v24 }
 0xbf7   :  { %6496 = vpow2.f32 %v1092_v23 }
 0xbfe   :  { %v6491_v25 = vpop.eup %6490 }
 0xbff   :  { %v6493_v26 = vpop.eup %6492  ;;  %v1109_v27 = vsel %vm117_vm3, %v6491_v25, 0.0 }
 0xc00   :  { %v6495_v28 = vpop.eup %6494  ;;  %1110 = vadd.xlane.f32.xlu1 %v1109_v27  ;;  %v1103_v31 = vsel %vm117_vm3, %v6493_v26, 0.0 }
 0xc01   :  { %v1106_v29 = vsel %vm117_vm3, %v6495_v28, 0.0  ;;  %v6497_v30 = vpop.eup %6496 }
 0xc02   :  { %1107 = vadd.xlane.f32.xlu0 %v1106_v29  ;;  %v1100_v32 = vsel %vm117_vm3, %v6497_v30, 0.0 }
 0xc04   :  { %1104 = vadd.xlane.f32.xlu1 %v1103_v31 }
 0xc06   :  { %1101 = vadd.xlane.f32.xlu0 %v1100_v32 }
 0xc15   :  { %1187 = vrot.lane.b32.xlu1 %v6998_v52, %s6768_s28 }
 0xc19   :  { %1183 = vrot.lane.b32.xlu1 %v6998_v52, %s6769_s29 }
 0xc1c   :  { %1122 = vrot.lane.b32.xlu0 %v6998_v52, %s6767_s27 }
 0xc20   :  { %1189 = vrot.lane.b32.xlu0 %v6996_v50, %s6768_s28 }
 0xc24   :  { %1185 = vrot.lane.b32.xlu0 %v6996_v50, %s6769_s29 }
 0xc8d   :  { %v1111_v34 = vpop.xlane.xlu1 %1110 }
 0xc8f   :  { %v1108_v35 = vpop.xlane.xlu0 %1107 }
 0xc90   :  { %6498 = vrcp.f32 %v1108_v35 }
 0xc91   :  { %v1105_v36 = vpop.xlane.xlu1 %1104 }
 0xc92   :  { %6500 = vrcp.f32 %v1105_v36 }
 0xc93   :  { %6502 = vrcp.f32 %v1111_v34  ;;  %v1102_v37 = vpop.xlane.xlu0 %1101 }
 0xc94   :  { %6504 = vrcp.f32 %v1102_v37 }
 0xc95   :  { %v1188_v43 = vpop.permute.xlu1 %1187 }
 0xc96   :  { %v1198_v55 = vsel %vm65_vm2, %v1188_v43, 0 }
 0xc97   :  { %v1123_v38 = vpop.permute.xlu0 %1122 }
 0xc98   :  { %5960 = vmatprep.subr.bf16.mxu0 %v1123_v38 }
 0xc99   :  { %5961 = vmatpush3.bf16.msra.mxu0 %v1123_v38  ;;  %v1184_v54 = vpop.permute.xlu1 %1183 }
 0xc9a   :  { %5962 = vmatprep.subr.bf16.mxu0 %v1125_v33  ;;  %v6499_v40 = vpop.eup %6498 }
 0xc9b   :  { %v1118_v46 = vmul.f32 %v6499_v40, %v6495_v28  ;;  %v1190_v63 = vpop.permute.xlu0 %1189 }
 0xc9c   :  { %v6501_v41 = vpop.eup %6500  ;;  %v1201_v2 = vsel %vm65_vm2, %v1190_v63, 0 }
 0xc9d   :  { %v6503_v42 = vpop.eup %6502  ;;  %5963 = vmatpush3.bf16.msra.mxu0 %v1125_v33  ;;  %v1117_v48 = vmul.f32 %v6501_v41, %v6493_v26 }
 0xc9e   :  { %v6505_v44 = vpop.eup %6504  ;;  %6388 = vmatprep.subr.msk.bf16.mxu0 %vm65_vm2, %v1188_v43  ;;  %v1119_v49 = vmul.f32 %v6503_v42, %v6491_v25 }
 0xc9f   :  { %v1116_v47 = vmul.f32 %v6505_v44, %v6497_v30  ;;  %v1186_v3 = vpop.permute.xlu0 %1185 }
 0xca0   :  { %v1121_v53 = vpack.c.bf16 %v1119_v49, %v1118_v46 }
 0xca1   :  { %v1120_v51 = vpack.c.bf16 %v1117_v48, %v1116_v47 }
 0xca3   :  { %5964 = vmatprep.mubr.msk.bf16.mxu0 %vm117_vm3, %v1120_v51 }
 0xca4   :  { %5965 = vmatmul.mubr.msk.bf16.vlgmr.msra.gmra.mrb[28].mxu0 %vm117_vm3, %v1121_v53 }
 0xca5   :  { %5972 = vmatprep.mubr.msk.bf16.mxu0 %vm65_vm2, %v1184_v54 }
 0xca6   :  { %5969 = vmatpush3.bf16.xpose.msra.mxu0 %v1198_v55 }
 0xca7   :  { %6389 = vmatprep.subr.msk.bf16.mxu0 %vm65_vm2, %v1190_v63 }
 0xcae   :  { %5971 = vmatpush3.bf16.xpose.msra.mxu0 %v1201_v2 }
 0xcb5   :  { %5973 = vmatmul.mubr.msk.bf16.vlgmr.msra.gmra.mrb[32].mxu0 %vm65_vm2, %v1186_v3 }
 0xd77   :  { %v7104_v4 = vpop.f32.mrb[28].mxu0 }
 0xd78   :  { %v7106_v5 = vpop.f32.mrb[29].mxu0 }
 0xd79   :  { %v7108_v6 = vpop.f32.mrb[30].mxu0 }
 0xd7a   :  { %v7110_v7 = vpop.f32.mrb[31].mxu0 }
 0xd88   :  { %v5974_v8 = vpop.f32.mrb[32].mxu0 }
 0xd89   :  { %v1237_v9 = vpop.f32.mrb[33].mxu0  ;;  %v1246_v16 = vadd.f32 %v5974_v8, %v7031_v1 }
 0xd8a   :  { %v1238_v10 = vadd.f32 %v1237_v9, %v7015_v57  ;;  %v5975_v11 = vpop.f32.mrb[34].mxu0 }
 0xd8b   :  { %v1240_v12 = vpop.f32.mrb[35].mxu0  ;;  %v1249_v13 = vadd.f32 %v5975_v11, %v7020_v60  ;;  %v1258_v19 = vsel %vm117_vm3, %v1246_v16, -inf }
 0xd8c   :  { %v1241_v14 = vadd.f32 %v1240_v12, %v7025_v61  ;;  %v1252_v15 = vsel %vm117_vm3, %v1238_v10, -inf }
 0xd8d   :  { %1253 = vmax.xlane.f32.xlu1 %v1252_v15  ;;  %v1261_v18 = vsel %vm117_vm3, %v1249_v13, -inf }
 0xd8e   :  { %v1255_v17 = vsel %vm117_vm3, %v1241_v14, -inf }
 0xd8f   :  { %1256 = vmax.xlane.f32.xlu0 %v1255_v17 }
 0xd91   :  { %1262 = vmax.xlane.f32.xlu1 %v1261_v18 }
 0xd93   :  { %1259 = vmax.xlane.f32.xlu0 %v1258_v19 }
 0xda2   :  { %1300 = vrot.lane.b32.xlu1 %v6996_v50, %s6770_s30 }
 0xe1a   :  { %v1254_v20 = vpop.xlane.xlu1 %1253 }
 0xe1b   :  { %v1264_v24 = vsub.f32 %v1238_v10, %v1254_v20 }
 0xe1c   :  { %v1257_v21 = vpop.xlane.xlu0 %1256 }
 0xe1d   :  { %v1265_v22 = vsub.f32 %v1241_v14, %v1257_v21  ;;  %v1268_v30 = vmul.f32 1.442695, %v1264_v24 }
 0xe1e   :  { %v1263_v23 = vpop.xlane.xlu1 %1262 }
 0xe1f   :  { %v1267_v25 = vsub.f32 %v1249_v13, %v1263_v23  ;;  %v1270_v26 = vmul.f32 1.442695, %v1265_v22 }
 0xe20   :  { %v1260_v27 = vpop.xlane.xlu0 %1259 }
 0xe21   :  { %v1274_v28 = vmul.f32 1.442695, %v1267_v25  ;;  %v1266_v29 = vsub.f32 %v1246_v16, %v1260_v27 }
 0xe22   :  { %v1301_v41 = vpop.permute.xlu1 %1300 }
 0xe23   :  { %6506 = vpow2.f32 %v1274_v28  ;;  %v1272_v31 = vmul.f32 1.442695, %v1266_v29 }
 0xe24   :  { %6508 = vpow2.f32 %v1270_v26 }
 0xe25   :  { %6510 = vpow2.f32 %v1272_v31 }
 0xe26   :  { %6512 = vpow2.f32 %v1268_v30 }
 0xe2d   :  { %v6507_v32 = vpop.eup %6506 }
 0xe2e   :  { %v6509_v33 = vpop.eup %6508  ;;  %v1285_v34 = vsel %vm117_vm3, %v6507_v32, 0.0 }
 0xe2f   :  { %v6511_v35 = vpop.eup %6510  ;;  %1286 = vadd.xlane.f32.xlu1 %v1285_v34  ;;  %v1279_v38 = vsel %vm117_vm3, %v6509_v33, 0.0 }
 0xe30   :  { %v1282_v36 = vsel %vm117_vm3, %v6511_v35, 0.0  ;;  %v6513_v37 = vpop.eup %6512 }
 0xe31   :  { %1283 = vadd.xlane.f32.xlu0 %v1282_v36  ;;  %v1276_v40 = vsel %vm117_vm3, %v6513_v37, 0.0 }
 0xe33   :  { %1280 = vadd.xlane.f32.xlu1 %v1279_v38 }
 0xe35   :  { %1277 = vadd.xlane.f32.xlu0 %v1276_v40 }
 0xe44   :  { %1363 = vrot.lane.b32.xlu1 %v6998_v52, %s6771_s3 }
 0xe48   :  { %1359 = vrot.lane.b32.xlu1 %v6998_v52, %s6772_s0 }
 0xe4b   :  { %1298 = vrot.lane.b32.xlu0 %v6998_v52, %s6770_s30 }
 0xe4f   :  { %1365 = vrot.lane.b32.xlu0 %v6996_v50, %s6771_s3 }
 0xe53   :  { %1361 = vrot.lane.b32.xlu0 %v6996_v50, %s6772_s0 }
 0xebc   :  { %v1287_v42 = vpop.xlane.xlu1 %1286 }
 0xebe   :  { %v1284_v43 = vpop.xlane.xlu0 %1283 }
 0xebf   :  { %6514 = vrcp.f32 %v1284_v43 }
 0xec0   :  { %v1281_v44 = vpop.xlane.xlu1 %1280 }
 0xec1   :  { %6516 = vrcp.f32 %v1281_v44 }
 0xec2   :  { %6518 = vrcp.f32 %v1287_v42  ;;  %v1278_v46 = vpop.xlane.xlu0 %1277 }
 0xec3   :  { %6520 = vrcp.f32 %v1278_v46 }
 0xec4   :  { %v1364_v53 = vpop.permute.xlu1 %1363 }
 0xec5   :  { %v1374_v11 = vsel %vm65_vm2, %v1364_v53, 0 }
 0xec6   :  { %v1299_v47 = vpop.permute.xlu0 %1298 }
 0xec7   :  { %5976 = vmatprep.subr.bf16.mxu1 %v1299_v47 }
 0xec8   :  { %5977 = vmatpush3.bf16.msra.mxu1 %v1299_v47  ;;  %v1360_v10 = vpop.permute.xlu1 %1359 }
 0xec9   :  { %5978 = vmatprep.subr.bf16.mxu1 %v1301_v41  ;;  %v6515_v48 = vpop.eup %6514 }
 0xeca   :  { %v1294_v55 = vmul.f32 %v6515_v48, %v6511_v35  ;;  %v1366_v12 = vpop.permute.xlu0 %1365 }
 0xecb   :  { %v6517_v49 = vpop.eup %6516  ;;  %v1377_v13 = vsel %vm65_vm2, %v1366_v12, 0 }
 0xecc   :  { %v6519_v51 = vpop.eup %6518  ;;  %5979 = vmatpush3.bf16.msra.mxu1 %v1301_v41  ;;  %v1293_v2 = vmul.f32 %v6517_v49, %v6509_v33 }
 0xecd   :  { %v6521_v54 = vpop.eup %6520  ;;  %6390 = vmatprep.subr.msk.bf16.mxu1 %vm65_vm2, %v1364_v53  ;;  %v1295_v3 = vmul.f32 %v6519_v51, %v6507_v32 }
 0xece   :  { %v1292_v63 = vmul.f32 %v6521_v54, %v6513_v37  ;;  %v1362_v14 = vpop.permute.xlu0 %1361 }
 0xecf   :  { %v1297_v9 = vpack.c.bf16 %v1295_v3, %v1294_v55 }
 0xed0   :  { %v1296_v8 = vpack.c.bf16 %v1293_v2, %v1292_v63 }
 0xed2   :  { %5980 = vmatprep.mubr.msk.bf16.mxu1 %vm117_vm3, %v1296_v8 }
 0xed3   :  { %5981 = vmatmul.mubr.msk.bf16.vlgmr.msra.gmra.mrb[32].mxu1 %vm117_vm3, %v1297_v9  ;;  %v6440_v9 = vld [vmem:[%s8166_s12] sm:$0xff]  }
 0xed4   :  { %5988 = vmatprep.mubr.msk.bf16.mxu1 %vm65_vm2, %v1360_v10 }
 0xed5   :  { %5985 = vmatpush3.bf16.xpose.msra.mxu1 %v1374_v11  ;;  %v6441_v11 = vld [vmem:[%s8166_s12 + $0x8] sm:$0xff]  }
 0xed6   :  { %6391 = vmatprep.subr.msk.bf16.mxu1 %vm65_vm2, %v1366_v12  ;;  %v1677_v12 = vpack.c.bf16 %v6991_v39, %v6991_v39 }
 0xedd   :  { %5987 = vmatpush3.bf16.xpose.msra.mxu1 %v1377_v13 }
 0xee4   :  { %5989 = vmatmul.mubr.msk.bf16.vlgmr.msra.gmra.mrb[36].mxu1 %vm65_vm2, %v1362_v14 }
 0xfa6   :  { %v5982_v15 = vpop.f32.mrb[32].mxu1 }
 0xfa7   :  { %v1344_v16 = vpop.f32.mrb[33].mxu1 }
 0xfa8   :  { %v5983_v17 = vpop.f32.mrb[34].mxu1 }
 0xfa9   :  { %v1347_v18 = vpop.f32.mrb[35].mxu1 }
 0xfb7   :  { %v5990_v19 = vpop.f32.mrb[36].mxu1 }
 0xfb8   :  { %v1413_v20 = vpop.f32.mrb[37].mxu1  ;;  %v1422_v27 = vadd.f32 %v5990_v19, %v7031_v1 }
 0xfb9   :  { %v1414_v21 = vadd.f32 %v1413_v20, %v7015_v57  ;;  %v5991_v22 = vpop.f32.mrb[38].mxu1 }
 0xfba   :  { %v1416_v23 = vpop.f32.mrb[39].mxu1  ;;  %v1425_v24 = vadd.f32 %v5991_v22, %v7020_v60  ;;  %v1434_v30 = vsel %vm117_vm3, %v1422_v27, -inf }
 0xfbb   :  { %v1417_v25 = vadd.f32 %v1416_v23, %v7025_v61  ;;  %v1428_v26 = vsel %vm117_vm3, %v1414_v21, -inf }
 0xfbc   :  { %1429 = vmax.xlane.f32.xlu1 %v1428_v26  ;;  %v1437_v29 = vsel %vm117_vm3, %v1425_v24, -inf }
 0xfbd   :  { %v1431_v28 = vsel %vm117_vm3, %v1417_v25, -inf }
 0xfbe   :  { %1432 = vmax.xlane.f32.xlu0 %v1431_v28 }
 0xfc0   :  { %1438 = vmax.xlane.f32.xlu1 %v1437_v29 }
 0xfc2   :  { %1435 = vmax.xlane.f32.xlu0 %v1434_v30 }
0x1049   :  { %v1430_v57 = vpop.xlane.xlu1 %1429 }
0x104a   :  { %v1440_v33 = vsub.f32 %v1414_v21, %v1430_v57 }
0x104b   :  { %v1433_v31 = vpop.xlane.xlu0 %1432 }
0x104c   :  { %v1441_v32 = vsub.f32 %v1417_v25, %v1433_v31  ;;  %v1444_v1 = vmul.f32 1.442695, %v1440_v33 }
0x104d   :  { %v1439_v60 = vpop.xlane.xlu1 %1438 }
0x104e   :  { %v1443_v61 = vsub.f32 %v1425_v24, %v1439_v60  ;;  %v1446_v34 = vmul.f32 1.442695, %v1441_v32 }
0x104f   :  { %v1436_v35 = vpop.xlane.xlu0 %1435 }
0x1050   :  { %v1450_v36 = vmul.f32 1.442695, %v1443_v61  ;;  %v1442_v37 = vsub.f32 %v1422_v27, %v1436_v35  ;;  %v6744_v61 = vld [vmem:[#allocation2] sm:$0xff] }
0x1052   :  { %6522 = vpow2.f32 %v1450_v36  ;;  %v1448_v38 = vmul.f32 1.442695, %v1442_v37 }
0x1053   :  { %6524 = vpow2.f32 %v1446_v34 }
0x1054   :  { %6526 = vpow2.f32 %v1448_v38  ;;  %v6745_v38 = vld [vmem:[#allocation2 + $0x8] sm:$0xff] }
0x1055   :  { %6528 = vpow2.f32 %v1444_v1 }
0x105c   :  { %v6523_v40 = vpop.eup %6522 }
0x105d   :  { %v6525_v41 = vpop.eup %6524  ;;  %v1461_v42 = vsel %vm117_vm3, %v6523_v40, 0.0 }
0x105e   :  { %v6527_v43 = vpop.eup %6526  ;;  %1462 = vadd.xlane.f32.xlu1 %v1461_v42  ;;  %v1455_v47 = vsel %vm117_vm3, %v6525_v41, 0.0 }
0x105f   :  { %v1458_v44 = vsel %vm117_vm3, %v6527_v43, 0.0  ;;  %v6529_v46 = vpop.eup %6528 }
0x1060   :  { %1459 = vadd.xlane.f32.xlu0 %v1458_v44  ;;  %v1452_v48 = vsel %vm117_vm3, %v6529_v46, 0.0 }
0x1062   :  { %1456 = vadd.xlane.f32.xlu1 %v1455_v47 }
0x1064   :  { %1453 = vadd.xlane.f32.xlu0 %v1452_v48 }
0x1073   :  { %1476 = vrot.lane.b32.xlu1 %v6996_v50, %s6773_s17 }
0x1077   :  { %1539 = vrot.lane.b32.xlu1 %v7106_v5, %s6774_s18 }
0x107a   :  { %1474 = vrot.lane.b32.xlu0 %v6998_v52, %s6773_s17 }
0x107b   :  { %1543 = vrot.lane.b32.xlu1 %v7104_v4, %s6774_s18 }
0x107e   :  { %1541 = vrot.lane.b32.xlu0 %v7110_v7, %s6774_s18 }
0x107f   :  { %1555 = vrot.lane.b32.xlu1 %v1344_v16, %s6775_s19 }
0x1082   :  { %1545 = vrot.lane.b32.xlu0 %v7108_v6, %s6774_s18 }
0x1083   :  { %1559 = vrot.lane.b32.xlu1 %v5982_v15, %s6775_s19 }
0x1086   :  { %1557 = vrot.lane.b32.xlu0 %v1347_v18, %s6775_s19 }
0x108a   :  { %1561 = vrot.lane.b32.xlu0 %v5983_v17, %s6775_s19 }
0x10eb   :  { %v1463_v50 = vpop.xlane.xlu1 %1462 }
0x10ed   :  { %v1460_v52 = vpop.xlane.xlu0 %1459 }
0x10ee   :  { %6530 = vrcp.f32 %v1460_v52 }
0x10ef   :  { %v1457_v5 = vpop.xlane.xlu1 %1456 }
0x10f0   :  { %6532 = vrcp.f32 %v1457_v5 }
0x10f1   :  { %6534 = vrcp.f32 %v1463_v50  ;;  %v1454_v4 = vpop.xlane.xlu0 %1453 }
0x10f2   :  { %6536 = vrcp.f32 %v1454_v4 }
0x10f3   :  { %v1477_v49 = vpop.permute.xlu1 %1476 }
0x10f5   :  { %v1475_v7 = vpop.permute.xlu0 %1474 }
0x10f6   :  { %5992 = vmatprep.subr.bf16.mxu0 %v1475_v7 }
0x10f7   :  { %5993 = vmatpush3.bf16.msra.mxu0 %v1475_v7  ;;  %v1540_v21 = vpop.permute.xlu1 %1539 }
0x10f8   :  { %5994 = vmatprep.subr.bf16.mxu0 %v1477_v49  ;;  %v6531_v6 = vpop.eup %6530  ;;  %v1583_v29 = vsel %vm65_vm2, %v7066_v58, %v1540_v21 }
0x10f9   :  { %v1470_v55 = vmul.f32 %v6531_v6, %v6527_v43  ;;  %v1542_v22 = vpop.permute.xlu0 %1541 }
0x10fa   :  { %v6533_v51 = vpop.eup %6532  ;;  %v1584_v31 = vsel %vm65_vm2, %v7070_v62, %v1542_v22 }
0x10fb   :  { %v6535_v53 = vpop.eup %6534  ;;  %5995 = vmatpush3.bf16.msra.mxu0 %v1477_v49  ;;  %v1469_v2 = vmul.f32 %v6533_v51, %v6525_v41  ;;  %v1544_v23 = vpop.permute.xlu1 %1543 }
0x10fc   :  { %v6537_v54 = vpop.eup %6536  ;;  %6000 = vmatprep.subr.bf16.mxu0 %v6759_v0  ;;  %v1471_v3 = vmul.f32 %v6535_v53, %v6523_v40  ;;  %v1585_v35 = vsel %vm65_vm2, %v7064_v56, %v1544_v23 }
0x10fd   :  { %v1468_v63 = vmul.f32 %v6537_v54, %v6529_v46  ;;  %v1546_v24 = vpop.permute.xlu0 %1545 }
0x10fe   :  { %v1473_v10 = vpack.c.bf16 %v1471_v3, %v1470_v55  ;;  %v1586_v62 = vsel %vm65_vm2, %v7068_v59, %v1546_v24 }
0x10ff   :  { %v1472_v8 = vpack.c.bf16 %v1469_v2, %v1468_v63  ;;  %v1556_v25 = vpop.permute.xlu1 %1555 }
0x1100   :  { %v1587_v30 = vsel %vm321_vm5, %v1583_v29, %v1556_v25 }
0x1101   :  { %5996 = vmatprep.mubr.msk.bf16.mxu0 %vm117_vm3, %v1472_v8  ;;  %v1558_v26 = vpop.permute.xlu0 %1557 }
0x1102   :  { %5997 = vmatmul.mubr.msk.bf16.vlgmr.msra.gmra.mrb[36].mxu0 %vm117_vm3, %v1473_v10  ;;  %v1588_v60 = vsel %vm321_vm5, %v1584_v31, %v1558_v26 }
0x1103   :  { %6001 = vmatpush3.bf16.msra.mxu0 %v6440_v9  ;;  %6004 = vmatprep.mubr.msk.bf16.mxu0 %vm6760_vm1, %v6759_v0  ;;  %v1560_v27 = vpop.permute.xlu1 %1559 }
0x1104   :  { %6002 = vmatprep.subr.bf16.mxu0 %v6759_v0  ;;  %v1589_v58 = vsel %vm321_vm5, %v1585_v35, %v1560_v27 }
0x1105   :  { %v1562_v28 = vpop.permute.xlu0 %1561 }
0x1106   :  { %v1590_v42 = vsel %vm321_vm5, %v1586_v62, %v1562_v28  ;;  %v5514_v28 = vld [vmem:[%s8168_s10] ss:$0 sm:$0xff] }
0x1107   :  { %6003 = vmatpush3.bf16.msra.mxu0 %v6441_v11 }
0x1108   :  { %6016 = vmatprep.subr.bf16.mxu0 %v6759_v0 }
0x110a   :  { %6005 = vmatmul.mubr.msk.bf16.vlgmr.msra.gmra.mrb[40].mxu0 %vm117_vm3, %v1677_v12  ;;  %v6442_v12 = vld [vmem:[%s8167_s13] sm:$0xff]  }
0x110b   :  { %6020 = vmatprep.mubr.msk.bf16.mxu0 %vm6760_vm1, %v6759_v0  ;;  %6008 = vmatprep.subr.bf16.mxu1 %v6442_v12 }
0x110c   :  { %6009 = vmatpush3.bf16.msra.mxu1 %v6442_v12 }
0x11d5   :  { %v5998_v13 = vpop.f32.mrb[36].mxu0 }
0x11d6   :  { %v1520_v14 = vpop.f32.mrb[37].mxu0 }
0x11d7   :  { %1571 = vrot.lane.b32.xlu1 %v1520_v14, %s6776_s22  ;;  %v5999_v15 = vpop.f32.mrb[38].mxu0 }
0x11d8   :  { %v1523_v16 = vpop.f32.mrb[39].mxu0 }
0x11d9   :  { %1573 = vrot.lane.b32.xlu0 %v1523_v16, %s6776_s22 }
0x11db   :  { %1575 = vrot.lane.b32.xlu1 %v5998_v13, %s6776_s22  ;;  %v6443_v13 = vld [vmem:[%s8167_s13 + $0x8] sm:$0xff]  }
0x11dc   :  { %6010 = vmatprep.subr.bf16.mxu1 %v6443_v13 }
0x11dd   :  { %1577 = vrot.lane.b32.xlu0 %v5999_v15, %s6776_s22  ;;  %v7194_v17 = vpop.f32.mrb[40].mxu0  ;;  %6011 = vmatpush3.bf16.msra.mxu1 %v6443_v13 }
0x11de   :  { %v6006_v18 = vpop.f32.mrb[41].mxu0  ;;  %6024 = vmatprep.subr.bf16.mxu1 %v6759_v0 }
0x11df   :  { %v1734_v19 = vpop.f32.mrb[42].mxu0 }
0x11e0   :  { %v6007_v20 = vpop.f32.mrb[43].mxu0 }
0x1249   :  { %v1572_v57 = vpop.permute.xlu1 %1571 }
0x124a   :  { %v1592_v32 = vsel %vm1591_vm10, %v1587_v30, %v1572_v57  ;;  %v5515_v57 = vld [vmem:[%s8169_s11] ss:$0 sm:$0xff] }
0x124b   :  { %v1574_v33 = vpop.permute.xlu0 %1573  ;;  %v1596_v34 = vadd.f32 %v6744_v61, %v1592_v32 }
0x124c   :  { %v1593_v36 = vsel %vm1591_vm10, %v1588_v60, %v1574_v33 }
0x124d   :  { %v1576_v37 = vpop.permute.xlu1 %1575  ;;  %v1602_v1 = vsel %vm117_vm3, %v1596_v34, 0.0  ;;  %v1597_v40 = vadd.f32 %v6745_v38, %v1593_v36 }
0x124e   :  { %v1594_v41 = vsel %vm1591_vm10, %v1589_v58, %v1576_v37  ;;  %1603 = vadd.xlane.f32.xlu1 %v1602_v1 }
0x124f   :  { %v1578_v43 = vpop.permute.xlu0 %1577  ;;  %v1605_v56 = vsel %vm117_vm3, %v1597_v40, 0.0  ;;  %v1598_v44 = vadd.f32 %v1594_v41, %v6991_v39 }
0x1250   :  { %v1595_v46 = vsel %vm1591_vm10, %v1590_v42, %v1578_v43  ;;  %1606 = vadd.xlane.f32.xlu0 %v1605_v56 }
0x1251   :  { %v1599_v47 = vadd.f32 %v1595_v46, %v6989_v45  ;;  %v1608_v50 = vsel %vm117_vm3, %v1598_v44, 0.0 }
0x1253   :  { %v1611_v48 = vsel %vm117_vm3, %v1599_v47, 0.0 }
0x1254   :  { %1612 = vadd.xlane.f32.xlu1 %v1611_v48  ;;  %1609 = vadd.xlane.f32.xlu0 %v1608_v50 }
0x12db   :  { %v1604_v59 = vpop.xlane.xlu1 %1603 }
0x12dc   :  { %v1615_v52 = vmul.f32 0.03125, %v1604_v59  ;;  %v7255_v59 = vpack.c.bf16 %v7194_v17, %v7194_v17 }
0x12dd   :  { %v1607_v5 = vpop.xlane.xlu0 %1606 }
0x12de   :  { %v1619_v4 = vsub.f32 %v1596_v34, %v1615_v52  ;;  %v1616_v7 = vmul.f32 0.03125, %v1607_v5  ;;  %v7264_v52 = vld [vmem:[%s8170_s2] ss:$0 sm:$0xff] }
0x12e0   :  { %v1620_v49 = vsub.f32 %v1597_v40, %v1616_v7  ;;  %v1623_v6 = vmul.f32 %v1619_v4, %v1619_v4 }
0x12e1   :  { %v1610_v51 = vpop.xlane.xlu0 %1609  ;;  %v1613_v39 = vpop.xlane.xlu1 %1612 }
0x12e2   :  { %v1617_v53 = vmul.f32 0.03125, %v1610_v51  ;;  %v1618_v54 = vmul.f32 0.03125, %v1613_v39  ;;  %v1627_v55 = vsel %vm117_vm3, %v1623_v6, 0.0  ;;  %v1624_v45 = vmul.f32 %v1620_v49, %v1620_v49 }
0x12e3   :  { %1628 = vadd.xlane.f32.xlu0 %v1627_v55 }
0x12e4   :  { %v1621_v63 = vsub.f32 %v1598_v44, %v1617_v53  ;;  %v1622_v2 = vsub.f32 %v1599_v47, %v1618_v54  ;;  %v1630_v3 = vsel %vm117_vm3, %v1624_v45, 0.0 }
0x12e5   :  { %1631 = vadd.xlane.f32.xlu1 %v1630_v3 }
0x12e6   :  { %v1625_v8 = vmul.f32 %v1621_v63, %v1621_v63  ;;  %v1626_v9 = vmul.f32 %v1622_v2, %v1622_v2 }
0x12e8   :  { %v1633_v10 = vsel %vm117_vm3, %v1625_v8, 0.0  ;;  %v1636_v11 = vsel %vm117_vm3, %v1626_v9, 0.0 }
0x12e9   :  { %1634 = vadd.xlane.f32.xlu0 %v1633_v10  ;;  %1637 = vadd.xlane.f32.xlu1 %v1636_v11 }
0x1370   :  { %v1629_v14 = vpop.xlane.xlu0 %1628 }
0x1371   :  { %v1639_v15 = vmul.f32 0.03125, %v1629_v14 }
0x1372   :  { %v1632_v16 = vpop.xlane.xlu1 %1631 }
0x1373   :  { %v1643_v18 = vadd.f32 1e-05, %v1639_v15  ;;  %v1640_v19 = vmul.f32 0.03125, %v1632_v16 }
0x1375   :  { %6538 = vrsqrt.f32 %v1643_v18  ;;  %v1644_v20 = vadd.f32 1e-05, %v1640_v19 }
0x1376   :  { %v1635_v21 = vpop.xlane.xlu0 %1634  ;;  %v1638_v22 = vpop.xlane.xlu1 %1637 }
0x1377   :  { %6540 = vrsqrt.f32 %v1644_v20  ;;  %v1641_v23 = vmul.f32 0.03125, %v1635_v21  ;;  %v1642_v24 = vmul.f32 0.03125, %v1638_v22 }
0x1379   :  { %v1645_v25 = vadd.f32 1e-05, %v1641_v23  ;;  %v1646_v26 = vadd.f32 1e-05, %v1642_v24 }
0x137b   :  { %6542 = vrsqrt.f32 %v1645_v25 }
0x137c   :  { %6544 = vrsqrt.f32 %v1646_v26 }
0x137f   :  { %v6539_v27 = vpop.eup %6538 }
0x1380   :  { %v1651_v29 = vmul.f32 %v6539_v27, %v1619_v4 }
0x1381   :  { %v6541_v30 = vpop.eup %6540 }
0x1382   :  { %v1652_v31 = vmul.f32 %v6541_v30, %v1620_v49  ;;  %v1661_v32 = vmul.f32 %v5514_v28, %v1651_v29 }
0x1384   :  { %v1662_v60 = vmul.f32 %v5514_v28, %v1652_v31  ;;  %v1671_v33 = vadd.f32 %v5515_v57, %v1661_v32 }
0x1385   :  { %v6543_v61 = vpop.eup %6542 }
0x1386   :  { %v6545_v34 = vpop.eup %6544  ;;  %v1653_v35 = vmul.f32 %v6543_v61, %v1621_v63  ;;  %v1672_v36 = vadd.f32 %v5515_v57, %v1662_v60  ;;  %2323 = vst.msk [vmem:[#allocation2] sm:$0xff] %vm117_vm3, %v1671_v33 }
0x1387   :  { %v1654_v58 = vmul.f32 %v6545_v34, %v1622_v2 }
0x1388   :  { %v1675_v37 = vpack.c.bf16 %v1672_v36, %v1671_v33  ;;  %2324 = vst.msk [vmem:[#allocation2 + $0x8] sm:$0xff] %vm117_vm3, %v1672_v36  ;;  %v1663_v1 = vmul.f32 %v5514_v28, %v1653_v35 }
0x1389   :  { %v1664_v38 = vmul.f32 %v5514_v28, %v1654_v58 }
0x138a   :  { %6012 = vmatprep.mubr.msk.bf16.mxu1 %vm117_vm3, %v1675_v37  ;;  %v1673_v40 = vadd.f32 %v5515_v57, %v1663_v1 }
0x138b   :  { %v1674_v62 = vadd.f32 %v5515_v57, %v1664_v38 }
0x138d   :  { %v1676_v41 = vpack.c.bf16 %v1674_v62, %v1673_v40 }
0x138f   :  { %6013 = vmatmul.mubr.msk.bf16.vlgmr.msra.gmra.mrb[40].mxu1 %vm117_vm3, %v1676_v41 }
0x1390   :  { %6028 = vmatprep.mubr.msk.bf16.mxu1 %vm6760_vm1, %v6759_v0 }
0x1462   :  { %v6014_v42 = vpop.f32.mrb[40].mxu1 }
0x1463   :  { %v1794_v43 = vpop.f32.mrb[41].mxu1 }
0x1464   :  { %v6015_v56 = vpop.f32.mrb[42].mxu1 }
0x1465   :  { %v7241_v44 = vpack.c.bf16 %v6015_v56, %v6014_v42  ;;  %v1797_v46 = vpop.f32.mrb[43].mxu1 }
0x1466   :  { %v7243_v47 = vpack.c.bf16 %v1797_v46, %v1794_v43 }
0x1467   :  { %1882 = vrot.lane.b32.xlu1 %v7241_v44, %s6763_s5  ;;  %v1824_v50 = vsel %vm65_vm2, %v7241_v44, 0 }
0x1468   :  { %v1821_v48 = vsel %vm65_vm2, %v7243_v47, 0 }
0x1469   :  { %6017 = vmatpush3.bf16.xpose.msra.mxu0 %v1821_v48 }
0x146a   :  { %6018 = vmatprep.subr.bf16.mxu0 %v6759_v0 }
0x1471   :  { %6019 = vmatpush3.bf16.xpose.msra.mxu0 %v1824_v50 }
0x1472   :  { %6040 = vmatprep.subr.bf16.mxu0 %v6759_v0 }
0x1478   :  { %6021 = vmatmul.mubr.msk.bf16.vlgmr.msra.gmra.mrb[44].mxu0 %vm65_vm2, %v7255_v59 }
0x1479   :  { %6044 = vmatprep.mubr.msk.bf16.mxu0 %vm6760_vm1, %v6759_v0 }
0x14d9   :  { %v1883_v55 = vpop.permute.xlu1 %1882 }
0x154b   :  { %v1860_v5 = vpop.f32.mrb[44].mxu0 }
0x154c   :  { %v1861_v4 = vadd.f32 %v7264_v52, %v1860_v5  ;;  %v6022_v7 = vpop.f32.mrb[45].mxu0 }
0x154d   :  { %v1863_v49 = vpop.f32.mrb[46].mxu0 }
0x154e   :  { %v6023_v6 = vpop.f32.mrb[47].mxu0  ;;  %v1866_v17 = vsel %vm707_vm9, %v1861_v4, -inf }
0x154f   :  { %1867 = vmax.xlane.f32.xlu0 %v1866_v17 }
0x1565   :  { %1880 = vrot.lane.b32.xlu0 %v7243_v47, %s6763_s5 }
0x1569   :  { %1934 = vrot.lane.b32.xlu0 %v7241_v44, %s6766_s26 }
0x15dc   :  { %v1868_v51 = vpop.xlane.xlu0 %1867 }
0x15dd   :  { %v1869_v39 = vsub.f32 %v1861_v4, %v1868_v51 }
0x15df   :  { %v1870_v53 = vmul.f32 1.442695, %v1869_v39 }
0x15e0   :  { %v1881_v54 = vpop.permute.xlu0 %1880 }
0x15e1   :  { %6546 = vpow2.f32 %v1870_v53  ;;  %6025 = vmatpush3.bf16.msra.mxu1 %v1881_v54 }
0x15e2   :  { %6026 = vmatprep.subr.bf16.mxu1 %v6759_v0 }
0x15e4   :  { %v1935_v12 = vpop.permute.xlu0 %1934 }
0x15e5   :  { %6027 = vmatpush3.bf16.msra.mxu1 %v1883_v55  ;;  %v1943_v13 = vsel %vm65_vm2, %v1935_v12, 0 }
0x15e6   :  { %6032 = vmatprep.subr.bf16.mxu1 %v6759_v0 }
0x15eb   :  { %v6547_v45 = vpop.eup %6546 }
0x15ec   :  { %v1872_v63 = vsel %vm707_vm9, %v6547_v45, 0.0 }
0x15ed   :  { %1873 = vadd.xlane.f32.xlu1 %v1872_v63 }
0x15fe   :  { %1932 = vrot.lane.b32.xlu1 %v7243_v47, %s6766_s26 }
0x1602   :  { %1930 = vrot.lane.b32.xlu1 %v7255_v59, %s6766_s26 }
0x1606   :  { %1999 = vrot.lane.b32.xlu1 %v7241_v44, %s6765_s25 }
0x167a   :  { %v1874_v2 = vpop.xlane.xlu1 %1873 }
0x167b   :  { %6548 = vrcp.f32 %v1874_v2 }
0x167e   :  { %v1933_v9 = vpop.permute.xlu1 %1932 }
0x167f   :  { %v1940_v11 = vsel %vm65_vm2, %v1933_v9, 0 }
0x1682   :  { %v1931_v14 = vpop.permute.xlu1 %1930 }
0x1685   :  { %v6549_v3 = vpop.eup %6548 }
0x1686   :  { %v1876_v8 = vmul.f32 %v6549_v3, %v6547_v45  ;;  %v2000_v30 = vpop.permute.xlu1 %1999 }
0x1688   :  { %v1877_v10 = vpack.c.bf16 %v1876_v8, %v1876_v8 }
0x168a   :  { %6029 = vmatmul.mubr.msk.bf16.vlgmr.msra.gmra.mrb[44].mxu1 %vm117_vm3, %v1877_v10 }
0x168b   :  { %6033 = vmatpush3.bf16.xpose.msra.mxu1 %v1940_v11  ;;  %6036 = vmatprep.mubr.msk.bf16.mxu1 %vm6760_vm1, %v6759_v0 }
0x168c   :  { %6034 = vmatprep.subr.bf16.mxu1 %v6759_v0 }
0x1693   :  { %6035 = vmatpush3.bf16.xpose.msra.mxu1 %v1943_v13 }
0x1694   :  { %6056 = vmatprep.subr.bf16.mxu1 %v6759_v0 }
0x169a   :  { %6037 = vmatmul.mubr.msk.bf16.vlgmr.msra.gmra.mrb[48].mxu1 %vm65_vm2, %v1931_v14 }
0x169b   :  { %6060 = vmatprep.mubr.msk.bf16.mxu1 %vm6760_vm1, %v6759_v0 }
0x175d   :  { %v7291_v15 = vpop.f32.mrb[44].mxu1 }
0x175e   :  { %v6030_v16 = vpop.f32.mrb[45].mxu1 }
0x175f   :  { %v1926_v18 = vpop.f32.mrb[46].mxu1 }
0x1760   :  { %v6031_v19 = vpop.f32.mrb[47].mxu1 }
0x176d   :  { %v1979_v20 = vpop.f32.mrb[48].mxu1 }
0x176e   :  { %v1980_v21 = vadd.f32 %v7264_v52, %v1979_v20  ;;  %v6038_v22 = vpop.f32.mrb[49].mxu1 }
0x176f   :  { %v1982_v23 = vpop.f32.mrb[50].mxu1 }
0x1770   :  { %v6039_v24 = vpop.f32.mrb[51].mxu1  ;;  %v1985_v25 = vsel %vm707_vm9, %v1980_v21, -inf }
0x1771   :  { %1986 = vmax.xlane.f32.xlu0 %v1985_v25 }
0x1787   :  { %1997 = vrot.lane.b32.xlu0 %v7243_v47, %s6765_s25 }
0x178b   :  { %2048 = vrot.lane.b32.xlu0 %v7243_v47, %s6769_s29 }
0x178f   :  { %2046 = vrot.lane.b32.xlu0 %v7255_v59, %s6769_s29 }
0x17fe   :  { %v1987_v26 = vpop.xlane.xlu0 %1986 }
0x17ff   :  { %v1988_v27 = vsub.f32 %v1980_v21, %v1987_v26 }
0x1801   :  { %v1989_v28 = vmul.f32 1.442695, %v1988_v27  ;;  %v7348_v27 = vld [vmem:[#allocation2 + $0x8] sm:$0xff] }
0x1802   :  { %v1998_v29 = vpop.permute.xlu0 %1997 }
0x1803   :  { %6550 = vpow2.f32 %v1989_v28  ;;  %6041 = vmatpush3.bf16.msra.mxu0 %v1998_v29  ;;  %v7350_v29 = vld [vmem:[#allocation2] sm:$0xff] }
0x1804   :  { %6042 = vmatprep.subr.bf16.mxu0 %v6759_v0 }
0x1806   :  { %v2049_v61 = vpop.permute.xlu0 %2048 }
0x1807   :  { %6043 = vmatpush3.bf16.msra.mxu0 %v2000_v30  ;;  %v2056_v35 = vsel %vm65_vm2, %v2049_v61, 0  ;;  %v2330_v30 = vpack.c.bf16 %v7348_v27, %v7350_v29 }
0x1808   :  { %6048 = vmatprep.subr.bf16.mxu0 %v6759_v0 }
0x180a   :  { %v2047_v37 = vpop.permute.xlu0 %2046 }
0x180d   :  { %v6551_v57 = vpop.eup %6550 }
0x180e   :  { %v1991_v31 = vsel %vm707_vm9, %v6551_v57, 0.0 }
0x180f   :  { %1992 = vadd.xlane.f32.xlu1 %v1991_v31 }
0x1820   :  { %2050 = vrot.lane.b32.xlu1 %v7241_v44, %s6769_s29 }
0x189c   :  { %v1993_v32 = vpop.xlane.xlu1 %1992 }
0x189d   :  { %6552 = vrcp.f32 %v1993_v32 }
0x18a0   :  { %v2051_v36 = vpop.permute.xlu1 %2050 }
0x18a1   :  { %v2059_v58 = vsel %vm65_vm2, %v2051_v36, 0 }
0x18a7   :  { %v6553_v60 = vpop.eup %6552 }
0x18a8   :  { %v1995_v33 = vmul.f32 %v6553_v60, %v6551_v57 }
0x18aa   :  { %v1996_v34 = vpack.c.bf16 %v1995_v33, %v1995_v33 }
0x18ac   :  { %6045 = vmatmul.mubr.msk.bf16.vlgmr.msra.gmra.mrb[48].mxu0 %vm117_vm3, %v1996_v34 }
0x18ad   :  { %6049 = vmatpush3.bf16.xpose.msra.mxu0 %v2056_v35  ;;  %6052 = vmatprep.mubr.msk.bf16.mxu0 %vm6760_vm1, %v6759_v0 }
0x18ae   :  { %6050 = vmatprep.subr.bf16.mxu0 %v6759_v0 }
0x18b5   :  { %6051 = vmatpush3.bf16.xpose.msra.mxu0 %v2059_v58  ;;  %v6746_v58 = vld [vmem:[#allocation2 + $0x10] sm:$0xff] }
0x18b6   :  { %6072 = vmatprep.subr.bf16.mxu0 %v6759_v0 }
0x18bc   :  { %6053 = vmatmul.mubr.msk.bf16.vlgmr.msra.gmra.mrb[52].mxu0 %vm65_vm2, %v2047_v37 }
0x18bd   :  { %6076 = vmatprep.mubr.msk.bf16.mxu0 %vm6760_vm1, %v6759_v0 }
0x197f   :  { %v2040_v1 = vpop.f32.mrb[48].mxu0 }
0x1980   :  { %v6046_v38 = vpop.f32.mrb[49].mxu0 }
0x1981   :  { %v2043_v40 = vpop.f32.mrb[50].mxu0 }
0x1982   :  { %v6047_v62 = vpop.f32.mrb[51].mxu0 }
0x198f   :  { %v2095_v41 = vpop.f32.mrb[52].mxu0 }
0x1990   :  { %v2096_v42 = vadd.f32 %v7264_v52, %v2095_v41  ;;  %v6054_v43 = vpop.f32.mrb[53].mxu0 }
0x1991   :  { %v2098_v56 = vpop.f32.mrb[54].mxu0  ;;  %v6445_v43 = vld [vmem:[%s8162_s9 + $0x18] sm:$0xff]  }
0x1992   :  { %v6055_v46 = vpop.f32.mrb[55].mxu0  ;;  %v2101_v48 = vsel %vm707_vm9, %v2096_v42, -inf }
0x1993   :  { %2102 = vmax.xlane.f32.xlu1 %v2101_v48 }
0x19a4   :  { %2115 = vrot.lane.b32.xlu1 %v7241_v44, %s6768_s28 }
0x19a8   :  { %2164 = vrot.lane.b32.xlu1 %v7243_v47, %s6772_s0 }
0x19ac   :  { %2162 = vrot.lane.b32.xlu1 %v7255_v59, %s6772_s0 }
0x1a20   :  { %v2103_v50 = vpop.xlane.xlu1 %2102 }
0x1a21   :  { %v2104_v5 = vsub.f32 %v2096_v42, %v2103_v50 }
0x1a23   :  { %v2105_v4 = vmul.f32 1.442695, %v2104_v5  ;;  %v5532_v5 = vld [vmem:[%s8171_s14] ss:$0 sm:$0xff] }
0x1a24   :  { %v2116_v59 = vpop.permute.xlu1 %2115 }
0x1a25   :  { %6554 = vpow2.f32 %v2105_v4 }
0x1a28   :  { %v2165_v53 = vpop.permute.xlu1 %2164 }
0x1a29   :  { %v2172_v55 = vsel %vm65_vm2, %v2165_v53, 0 }
0x1a2c   :  { %v2163_v2 = vpop.permute.xlu1 %2162 }
0x1a2f   :  { %v6555_v7 = vpop.eup %6554 }
0x1a30   :  { %v2107_v49 = vsel %vm707_vm9, %v6555_v7, 0.0 }
0x1a31   :  { %2108 = vadd.xlane.f32.xlu0 %v2107_v49 }
0x1a47   :  { %2113 = vrot.lane.b32.xlu0 %v7243_v47, %s6768_s28 }
0x1a4b   :  { %2166 = vrot.lane.b32.xlu0 %v7241_v44, %s6772_s0 }
0x1abe   :  { %v2109_v6 = vpop.xlane.xlu0 %2108 }
0x1abf   :  { %6556 = vrcp.f32 %v2109_v6 }
0x1ac2   :  { %v2114_v17 = vpop.permute.xlu0 %2113 }
0x1ac3   :  { %6057 = vmatpush3.bf16.msra.mxu1 %v2114_v17  ;;  %v7376_v17 = vld [vmem:[#allocation2 + $0x18] sm:$0xff] }
0x1ac4   :  { %6058 = vmatprep.subr.bf16.mxu1 %v6759_v0 }
0x1ac6   :  { %v2167_v45 = vpop.permute.xlu0 %2166 }
0x1ac7   :  { %6059 = vmatpush3.bf16.msra.mxu1 %v2116_v59  ;;  %v2175_v63 = vsel %vm65_vm2, %v2167_v45, 0 }
0x1ac8   :  { %6064 = vmatprep.subr.bf16.mxu1 %v6759_v0 }
0x1ac9   :  { %v6557_v51 = vpop.eup %6556 }
0x1aca   :  { %v2111_v39 = vmul.f32 %v6557_v51, %v6555_v7  ;;  %v5533_v7 = vld [vmem:[%s8172_s15] ss:$0 sm:$0xff] }
0x1acc   :  { %v2112_v54 = vpack.c.bf16 %v2111_v39, %v2111_v39 }
0x1ace   :  { %6061 = vmatmul.mubr.msk.bf16.vlgmr.msra.gmra.mrb[52].mxu1 %vm117_vm3, %v2112_v54 }
0x1acf   :  { %6068 = vmatprep.mubr.msk.bf16.mxu1 %vm6760_vm1, %v6759_v0 }
0x1ad0   :  { %6065 = vmatpush3.bf16.xpose.msra.mxu1 %v2172_v55 }
0x1ad1   :  { %6066 = vmatprep.subr.bf16.mxu1 %v6759_v0 }
0x1ad8   :  { %6067 = vmatpush3.bf16.xpose.msra.mxu1 %v2175_v63 }
0x1adf   :  { %6069 = vmatmul.mubr.msk.bf16.vlgmr.msra.gmra.mrb[56].mxu1 %vm65_vm2, %v2163_v2 }
0x1ba1   :  { %v2156_v3 = vpop.f32.mrb[52].mxu1 }
0x1ba2   :  { %v6062_v8 = vpop.f32.mrb[53].mxu1 }
0x1ba3   :  { %v2159_v9 = vpop.f32.mrb[54].mxu1 }
0x1ba4   :  { %v6063_v10 = vpop.f32.mrb[55].mxu1 }
0x1bb2   :  { %v2211_v11 = vpop.f32.mrb[56].mxu1 }
0x1bb3   :  { %v2212_v12 = vadd.f32 %v7264_v52, %v2211_v11  ;;  %v6070_v13 = vpop.f32.mrb[57].mxu1 }
0x1bb4   :  { %v2214_v14 = vpop.f32.mrb[58].mxu1 }
0x1bb5   :  { %v6071_v16 = vpop.f32.mrb[59].mxu1  ;;  %v2217_v18 = vsel %vm707_vm9, %v2212_v12, -inf }
0x1bb6   :  { %2218 = vmax.xlane.f32.xlu0 %v2217_v18  ;;  %v7408_v18 = vld [vmem:[%s8165_s1 + $0x18] sm:$0xff] }
0x1bcc   :  { %2229 = vrot.lane.b32.xlu0 %v7243_v47, %s6771_s3 }
0x1bd0   :  { %2279 = vrot.lane.b32.xlu0 %v2040_v1, %s6774_s18 }
0x1c43   :  { %v2219_v19 = vpop.xlane.xlu0 %2218 }
0x1c44   :  { %v2220_v20 = vsub.f32 %v2212_v12, %v2219_v19  ;;  %v7402_v12 = vld [vmem:[%s8165_s1] sm:$0xff] }
0x1c46   :  { %v2221_v21 = vmul.f32 1.442695, %v2220_v20  ;;  %v7414_v20 = vld [vmem:[%s8165_s1 + $0x8] sm:$0xff] }
0x1c47   :  { %v2230_v22 = vpop.permute.xlu0 %2229 }
0x1c48   :  { %6558 = vpow2.f32 %v2221_v21  ;;  %6073 = vmatpush3.bf16.msra.mxu0 %v2230_v22 }
0x1c49   :  { %6074 = vmatprep.subr.bf16.mxu0 %v6759_v0 }
0x1c4b   :  { %v2280_v60 = vpop.permute.xlu0 %2279 }
0x1c4c   :  { %v2290_v61 = vsel %vm65_vm2, %v7291_v15, %v2280_v60  ;;  %v6444_v15 = vld [vmem:[%s8162_s9 + $0x10] sm:$0xff]  }
0x1c52   :  { %v6559_v52 = vpop.eup %6558 }
0x1c53   :  { %v2223_v23 = vsel %vm707_vm9, %v6559_v52, 0.0 }
0x1c54   :  { %2224 = vadd.xlane.f32.xlu1 %v2223_v23 }
0x1c65   :  { %2231 = vrot.lane.b32.xlu1 %v7241_v44, %s6771_s3 }
0x1c69   :  { %2283 = vrot.lane.b32.xlu1 %v2156_v3, %s6775_s19 }
0x1ce1   :  { %v2225_v47 = vpop.xlane.xlu1 %2224 }
0x1ce2   :  { %6560 = vrcp.f32 %v2225_v47 }
0x1ce5   :  { %v2232_v24 = vpop.permute.xlu1 %2231 }
0x1ce6   :  { %6075 = vmatpush3.bf16.msra.mxu0 %v2232_v24 }
0x1ce7   :  { %6080 = vmatprep.subr.bf16.mxu0 %v6444_v15 }
0x1ce9   :  { %v2284_v33 = vpop.permute.xlu1 %2283 }
0x1cea   :  { %v2291_v34 = vsel %vm321_vm5, %v2290_v61, %v2284_v33 }
0x1cec   :  { %v6561_v25 = vpop.eup %6560 }
0x1ced   :  { %v2227_v26 = vmul.f32 %v6561_v25, %v6559_v52  ;;  %v7421_v52 = vld [vmem:[%s8165_s1 + $0x10] sm:$0xff] }
0x1cef   :  { %v2228_v28 = vpack.c.bf16 %v2227_v26, %v2227_v26 }
0x1cf1   :  { %6077 = vmatmul.mubr.msk.bf16.vlgmr.msra.gmra.mrb[56].mxu0 %vm117_vm3, %v2228_v28 }
0x1cf2   :  { %6084 = vmatprep.mubr.msk.bf16.mxu0 %vm117_vm3, %v2330_v30  ;;  %6081 = vmatpush3.bf16.msra.mxu0 %v6444_v15 }
0x1cf3   :  { %6082 = vmatprep.subr.bf16.mxu0 %v6445_v43 }
0x1cf6   :  { %6083 = vmatpush3.bf16.msra.mxu0 %v6445_v43 }
0x1dc4   :  { %v2272_v44 = vpop.f32.mrb[56].mxu0 }
0x1dc5   :  { %2287 = vrot.lane.b32.xlu0 %v2272_v44, %s6776_s22  ;;  %v6078_v57 = vpop.f32.mrb[57].mxu0 }
0x1dc6   :  { %v2275_v31 = vpop.f32.mrb[58].mxu0 }
0x1dc7   :  { %v6079_v32 = vpop.f32.mrb[59].mxu0 }
0x1e37   :  { %v2288_v35 = vpop.permute.xlu0 %2287 }
0x1e38   :  { %v2292_v36 = vsel %vm1591_vm10, %v2291_v34, %v2288_v35 }
0x1e39   :  { %v2293_v37 = vadd.f32 %v6746_v58, %v2292_v36 }
0x1e3b   :  { %v2296_v1 = vsel %vm707_vm9, %v2293_v37, 0.0 }
0x1e3c   :  { %2297 = vadd.xlane.f32.xlu1 %v2296_v1 }
0x1ec9   :  { %v2298_v38 = vpop.xlane.xlu1 %2297 }
0x1eca   :  { %v2299_v40 = vmul.f32 0.03125, %v2298_v38 }
0x1ecc   :  { %v2300_v62 = vsub.f32 %v2293_v37, %v2299_v40 }
0x1ece   :  { %v2301_v41 = vmul.f32 %v2300_v62, %v2300_v62 }
0x1ed0   :  { %v2302_v42 = vsel %vm707_vm9, %v2301_v41, 0.0 }
0x1ed1   :  { %2303 = vadd.xlane.f32.xlu0 %v2302_v42 }
0x1f5e   :  { %v2304_v56 = vpop.xlane.xlu0 %2303 }
0x1f5f   :  { %v2305_v46 = vmul.f32 0.03125, %v2304_v56 }
0x1f61   :  { %v2306_v48 = vadd.f32 1e-05, %v2305_v46 }
0x1f63   :  { %6562 = vrsqrt.f32 %v2306_v48 }
0x1f6d   :  { %v6563_v50 = vpop.eup %6562 }
0x1f6e   :  { %v2308_v4 = vmul.f32 %v6563_v50, %v2300_v62 }
0x1f70   :  { %v2315_v49 = vmul.f32 %v5532_v5, %v2308_v4 }
0x1f72   :  { %v2322_v6 = vadd.f32 %v5533_v7, %v2315_v49 }
0x1f74   :  { %2325 = vst.msk [vmem:[#allocation2 + $0x10] sm:$0xf] %vm707_vm9, %v2322_v6 }
0x1f7b   :  { %v7378_v59 = vld [vmem:[#allocation2 + $0x10] sm:$0xff] }
0x1f7c   :  { %v2331_v51 = vpack.c.bf16 %v7376_v17, %v7378_v59 }
0x1f7e   :  { %6085 = vmatmul.mubr.msk.bf16.vlgmr.msra.gmra.mrb[60].mxu0 %vm117_vm3, %v2331_v51 }
0x2051   :  { %v6086_v39 = vpop.f32.mrb[60].mxu0 }
0x2052   :  { %v2389_v53 = vpop.f32.mrb[61].mxu0 }
0x2053   :  { %v6087_v54 = vpop.f32.mrb[62].mxu0 }
0x2054   :  { %v7383_v55 = vpack.c.bf16 %v6087_v54, %v6086_v39  ;;  %v2392_v45 = vpop.f32.mrb[63].mxu0 }
0x2055   :  { %v7385_v63 = vpack.c.bf16 %v2392_v45, %v2389_v53 }
0x2056   :  { %2410 = vrot.lane.b32.xlu1 %v7383_v55, %s6763_s5 }
0x2057   :  { %2408 = vrot.lane.b32.xlu0 %v7385_v63, %s6763_s5  ;;  %6092 = vmatprep.mubr.msk.bf16.mxu1 %vm65_vm2, %v7385_v63 }
0x20c8   :  { %v2411_v8 = vpop.permute.xlu1 %2410 }
0x20c9   :  { %v2409_v2 = vpop.permute.xlu0 %2408  ;;  %v2422_v9 = vsel %vm65_vm2, %v2411_v8, 0 }
0x20ca   :  { %6392 = vmatprep.subr.msk.bf16.mxu1 %vm65_vm2, %v2409_v2  ;;  %v2419_v3 = vsel %vm65_vm2, %v2409_v2, 0 }
0x20cb   :  { %6089 = vmatpush3.bf16.xpose.msra.mxu1 %v2419_v3 }
0x20cc   :  { %6393 = vmatprep.subr.msk.bf16.mxu1 %vm65_vm2, %v2411_v8 }
0x20d3   :  { %6091 = vmatpush3.bf16.xpose.msra.mxu1 %v2422_v9 }
0x20da   :  { %6093 = vmatmul.mubr.msk.bf16.vlgmr.msra.gmra.mrb[60].mxu1 %vm65_vm2, %v7383_v55 }
0x21ad   :  { %v6094_v10 = vpop.f32.mrb[60].mxu1 }
0x21ae   :  { %v2458_v11 = vpop.f32.mrb[61].mxu1  ;;  %v2467_v23 = vadd.f32 %v7421_v52, %v6094_v10 }
0x21af   :  { %v2459_v13 = vadd.f32 %v7402_v12, %v2458_v11  ;;  %v6095_v14 = vpop.f32.mrb[62].mxu1 }
0x21b0   :  { %v2461_v16 = vpop.f32.mrb[63].mxu1  ;;  %v2470_v19 = vadd.f32 %v7408_v18, %v6095_v14  ;;  %v2479_v25 = vsel %vm117_vm3, %v2467_v23, -inf }
0x21b1   :  { %v2462_v21 = vadd.f32 %v7414_v20, %v2461_v16  ;;  %v2473_v22 = vsel %vm117_vm3, %v2459_v13, -inf }
0x21b2   :  { %2474 = vmax.xlane.f32.xlu1 %v2473_v22  ;;  %v2482_v24 = vsel %vm117_vm3, %v2470_v19, -inf }
0x21b3   :  { %v2476_v47 = vsel %vm117_vm3, %v2462_v21, -inf }
0x21b4   :  { %2477 = vmax.xlane.f32.xlu0 %v2476_v47 }
0x21b6   :  { %2483 = vmax.xlane.f32.xlu1 %v2482_v24 }
0x21b8   :  { %2480 = vmax.xlane.f32.xlu0 %v2479_v25 }
0x21c7   :  { %2521 = vrot.lane.b32.xlu1 %v7383_v55, %s6762_s4 }
0x223f   :  { %v2475_v26 = vpop.xlane.xlu1 %2474 }
0x2240   :  { %v2485_v57 = vsub.f32 %v2459_v13, %v2475_v26 }
0x2241   :  { %v2478_v28 = vpop.xlane.xlu0 %2477 }
0x2242   :  { %v2486_v30 = vsub.f32 %v2462_v21, %v2478_v28  ;;  %v2489_v34 = vmul.f32 1.442695, %v2485_v57 }
0x2243   :  { %v2484_v44 = vpop.xlane.xlu1 %2483 }
0x2244   :  { %v2488_v31 = vsub.f32 %v2470_v19, %v2484_v44  ;;  %v2491_v32 = vmul.f32 1.442695, %v2486_v30 }
0x2245   :  { %v2481_v60 = vpop.xlane.xlu0 %2480 }
0x2246   :  { %v2495_v33 = vmul.f32 1.442695, %v2488_v31  ;;  %v2487_v61 = vsub.f32 %v2467_v23, %v2481_v60 }
0x2247   :  { %v2522_v42 = vpop.permute.xlu1 %2521 }
0x2248   :  { %6564 = vpow2.f32 %v2495_v33  ;;  %v2493_v35 = vmul.f32 1.442695, %v2487_v61 }
0x2249   :  { %6566 = vpow2.f32 %v2491_v32 }
0x224a   :  { %6568 = vpow2.f32 %v2493_v35 }
0x224b   :  { %6570 = vpow2.f32 %v2489_v34 }
0x2252   :  { %v6565_v36 = vpop.eup %6564 }
0x2253   :  { %v6567_v58 = vpop.eup %6566  ;;  %v2506_v37 = vsel %vm117_vm3, %v6565_v36, 0.0 }
0x2254   :  { %v6569_v1 = vpop.eup %6568  ;;  %2507 = vadd.xlane.f32.xlu1 %v2506_v37  ;;  %v2500_v62 = vsel %vm117_vm3, %v6567_v58, 0.0 }
0x2255   :  { %v2503_v38 = vsel %vm117_vm3, %v6569_v1, 0.0  ;;  %v6571_v40 = vpop.eup %6570 }
0x2256   :  { %2504 = vadd.xlane.f32.xlu0 %v2503_v38  ;;  %v2497_v41 = vsel %vm117_vm3, %v6571_v40, 0.0 }
0x2258   :  { %2501 = vadd.xlane.f32.xlu1 %v2500_v62 }
0x225a   :  { %2498 = vadd.xlane.f32.xlu0 %v2497_v41 }
0x2269   :  { %2584 = vrot.lane.b32.xlu1 %v7385_v63, %s6765_s25 }
0x226d   :  { %2580 = vrot.lane.b32.xlu1 %v7385_v63, %s6766_s26 }
0x2270   :  { %2519 = vrot.lane.b32.xlu0 %v7385_v63, %s6762_s4 }
0x2274   :  { %2586 = vrot.lane.b32.xlu0 %v7383_v55, %s6765_s25 }
0x2278   :  { %2582 = vrot.lane.b32.xlu0 %v7383_v55, %s6766_s26 }
0x22e1   :  { %v2508_v15 = vpop.xlane.xlu1 %2507 }
0x22e3   :  { %v2505_v43 = vpop.xlane.xlu0 %2504 }
0x22e4   :  { %6572 = vrcp.f32 %v2505_v43 }
0x22e5   :  { %v2502_v56 = vpop.xlane.xlu1 %2501 }
0x22e6   :  { %6574 = vrcp.f32 %v2502_v56 }
0x22e7   :  { %6576 = vrcp.f32 %v2508_v15  ;;  %v2499_v46 = vpop.xlane.xlu0 %2498 }
0x22e8   :  { %6578 = vrcp.f32 %v2499_v46 }
0x22e9   :  { %v2585_v7 = vpop.permute.xlu1 %2584 }
0x22ea   :  { %v2595_v3 = vsel %vm65_vm2, %v2585_v7, 0 }
0x22eb   :  { %v2520_v48 = vpop.permute.xlu0 %2519 }
0x22ec   :  { %6096 = vmatprep.subr.bf16.mxu0 %v2520_v48 }
0x22ed   :  { %6097 = vmatpush3.bf16.msra.mxu0 %v2520_v48  ;;  %v2581_v2 = vpop.permute.xlu1 %2580 }
0x22ee   :  { %6098 = vmatprep.subr.bf16.mxu0 %v2522_v42  ;;  %v6573_v50 = vpop.eup %6572 }
0x22ef   :  { %v2515_v6 = vmul.f32 %v6573_v50, %v6569_v1  ;;  %v2587_v8 = vpop.permute.xlu0 %2586 }
0x22f0   :  { %v6575_v5 = vpop.eup %6574  ;;  %v2598_v9 = vsel %vm65_vm2, %v2587_v8, 0 }
0x22f1   :  { %v6577_v4 = vpop.eup %6576  ;;  %6099 = vmatpush3.bf16.msra.mxu0 %v2522_v42  ;;  %v2514_v39 = vmul.f32 %v6575_v5, %v6567_v58 }
0x22f2   :  { %v6579_v49 = vpop.eup %6578  ;;  %6394 = vmatprep.subr.msk.bf16.mxu0 %vm65_vm2, %v2585_v7  ;;  %v2516_v53 = vmul.f32 %v6577_v4, %v6565_v36 }
0x22f3   :  { %v2513_v51 = vmul.f32 %v6579_v49, %v6571_v40  ;;  %v2583_v10 = vpop.permute.xlu0 %2582 }
0x22f4   :  { %v2518_v45 = vpack.c.bf16 %v2516_v53, %v2515_v6 }
0x22f5   :  { %v2517_v54 = vpack.c.bf16 %v2514_v39, %v2513_v51 }
0x22f7   :  { %6100 = vmatprep.mubr.msk.bf16.mxu0 %vm117_vm3, %v2517_v54 }
0x22f8   :  { %6101 = vmatmul.mubr.msk.bf16.vlgmr.msra.gmra.mrb[64].mxu0 %vm117_vm3, %v2518_v45 }
0x22f9   :  { %6108 = vmatprep.mubr.msk.bf16.mxu0 %vm65_vm2, %v2581_v2 }
0x22fa   :  { %6105 = vmatpush3.bf16.xpose.msra.mxu0 %v2595_v3 }
0x22fb   :  { %6395 = vmatprep.subr.msk.bf16.mxu0 %vm65_vm2, %v2587_v8 }
0x2302   :  { %6107 = vmatpush3.bf16.xpose.msra.mxu0 %v2598_v9 }
0x2309   :  { %6109 = vmatmul.mubr.msk.bf16.vlgmr.msra.gmra.mrb[68].mxu0 %vm65_vm2, %v2583_v10 }
0x23cb   :  { %v7451_v11 = vpop.f32.mrb[64].mxu0 }
0x23cc   :  { %v7453_v13 = vpop.f32.mrb[65].mxu0 }
0x23cd   :  { %v7455_v14 = vpop.f32.mrb[66].mxu0 }
0x23ce   :  { %v7457_v16 = vpop.f32.mrb[67].mxu0 }
0x23dc   :  { %v6110_v19 = vpop.f32.mrb[68].mxu0 }
0x23dd   :  { %v2634_v21 = vpop.f32.mrb[69].mxu0  ;;  %v2643_v28 = vadd.f32 %v7421_v52, %v6110_v19 }
0x23de   :  { %v2635_v22 = vadd.f32 %v7402_v12, %v2634_v21  ;;  %v6111_v23 = vpop.f32.mrb[70].mxu0 }
0x23df   :  { %v2637_v47 = vpop.f32.mrb[71].mxu0  ;;  %v2646_v24 = vadd.f32 %v7408_v18, %v6111_v23  ;;  %v2655_v57 = vsel %vm117_vm3, %v2643_v28, -inf }
0x23e0   :  { %v2638_v25 = vadd.f32 %v7414_v20, %v2637_v47  ;;  %v2649_v26 = vsel %vm117_vm3, %v2635_v22, -inf }
0x23e1   :  { %2650 = vmax.xlane.f32.xlu1 %v2649_v26  ;;  %v2658_v44 = vsel %vm117_vm3, %v2646_v24, -inf }
0x23e2   :  { %v2652_v30 = vsel %vm117_vm3, %v2638_v25, -inf }
0x23e3   :  { %2653 = vmax.xlane.f32.xlu0 %v2652_v30 }
0x23e5   :  { %2659 = vmax.xlane.f32.xlu1 %v2658_v44 }
0x23e7   :  { %2656 = vmax.xlane.f32.xlu0 %v2655_v57 }
0x23f6   :  { %2697 = vrot.lane.b32.xlu1 %v7383_v55, %s6767_s27 }
0x246e   :  { %v2651_v31 = vpop.xlane.xlu1 %2650 }
0x246f   :  { %v2661_v61 = vsub.f32 %v2635_v22, %v2651_v31 }
0x2470   :  { %v2654_v32 = vpop.xlane.xlu0 %2653 }
0x2471   :  { %v2662_v60 = vsub.f32 %v2638_v25, %v2654_v32  ;;  %v2665_v1 = vmul.f32 1.442695, %v2661_v61 }
0x2472   :  { %v2660_v33 = vpop.xlane.xlu1 %2659 }
0x2473   :  { %v2664_v34 = vsub.f32 %v2646_v24, %v2660_v33  ;;  %v2667_v35 = vmul.f32 1.442695, %v2662_v60 }
0x2474   :  { %v2657_v36 = vpop.xlane.xlu0 %2656 }
0x2475   :  { %v2671_v58 = vmul.f32 1.442695, %v2664_v34  ;;  %v2663_v37 = vsub.f32 %v2643_v28, %v2657_v36 }
0x2476   :  { %v2698_v48 = vpop.permute.xlu1 %2697 }
0x2477   :  { %6580 = vpow2.f32 %v2671_v58  ;;  %v2669_v38 = vmul.f32 1.442695, %v2663_v37 }
0x2478   :  { %6582 = vpow2.f32 %v2667_v35 }
0x2479   :  { %6584 = vpow2.f32 %v2669_v38 }
0x247a   :  { %6586 = vpow2.f32 %v2665_v1 }
0x2481   :  { %v6581_v40 = vpop.eup %6580 }
0x2482   :  { %v6583_v62 = vpop.eup %6582  ;;  %v2682_v41 = vsel %vm117_vm3, %v6581_v40, 0.0 }
0x2483   :  { %v6585_v42 = vpop.eup %6584  ;;  %2683 = vadd.xlane.f32.xlu1 %v2682_v41  ;;  %v2676_v56 = vsel %vm117_vm3, %v6583_v62, 0.0 }
0x2484   :  { %v2679_v15 = vsel %vm117_vm3, %v6585_v42, 0.0  ;;  %v6587_v43 = vpop.eup %6586 }
0x2485   :  { %2680 = vadd.xlane.f32.xlu0 %v2679_v15  ;;  %v2673_v46 = vsel %vm117_vm3, %v6587_v43, 0.0 }
0x2487   :  { %2677 = vadd.xlane.f32.xlu1 %v2676_v56 }
0x2489   :  { %2674 = vadd.xlane.f32.xlu0 %v2673_v46 }
0x2498   :  { %2760 = vrot.lane.b32.xlu1 %v7385_v63, %s6768_s28 }
0x249c   :  { %2756 = vrot.lane.b32.xlu1 %v7385_v63, %s6769_s29 }
0x249f   :  { %2695 = vrot.lane.b32.xlu0 %v7385_v63, %s6767_s27 }
0x24a3   :  { %2762 = vrot.lane.b32.xlu0 %v7383_v55, %s6768_s28 }
0x24a7   :  { %2758 = vrot.lane.b32.xlu0 %v7383_v55, %s6769_s29 }
0x2510   :  { %v2684_v50 = vpop.xlane.xlu1 %2683 }
0x2512   :  { %v2681_v5 = vpop.xlane.xlu0 %2680 }
0x2513   :  { %6588 = vrcp.f32 %v2681_v5 }
0x2514   :  { %v2678_v4 = vpop.xlane.xlu1 %2677 }
0x2515   :  { %6590 = vrcp.f32 %v2678_v4 }
0x2516   :  { %6592 = vrcp.f32 %v2684_v50  ;;  %v2675_v7 = vpop.xlane.xlu0 %2674 }
0x2517   :  { %6594 = vrcp.f32 %v2675_v7 }
0x2518   :  { %v2761_v53 = vpop.permute.xlu1 %2760 }
0x2519   :  { %v2771_v21 = vsel %vm65_vm2, %v2761_v53, 0 }
0x251a   :  { %v2696_v49 = vpop.permute.xlu0 %2695 }
0x251b   :  { %6112 = vmatprep.subr.bf16.mxu1 %v2696_v49 }
0x251c   :  { %6113 = vmatpush3.bf16.msra.mxu1 %v2696_v49  ;;  %v2757_v19 = vpop.permute.xlu1 %2756 }
0x251d   :  { %6114 = vmatprep.subr.bf16.mxu1 %v2698_v48  ;;  %v6589_v6 = vpop.eup %6588 }
0x251e   :  { %v2691_v45 = vmul.f32 %v6589_v6, %v6585_v42  ;;  %v2763_v22 = vpop.permute.xlu0 %2762 }
0x251f   :  { %v6591_v51 = vpop.eup %6590  ;;  %v2774_v23 = vsel %vm65_vm2, %v2763_v22, 0 }
0x2520   :  { %v6593_v39 = vpop.eup %6592  ;;  %6115 = vmatpush3.bf16.msra.mxu1 %v2698_v48  ;;  %v2690_v3 = vmul.f32 %v6591_v51, %v6583_v62 }
0x2521   :  { %v6595_v54 = vpop.eup %6594  ;;  %6396 = vmatprep.subr.msk.bf16.mxu1 %vm65_vm2, %v2761_v53  ;;  %v2692_v8 = vmul.f32 %v6593_v39, %v6581_v40 }
0x2522   :  { %v2689_v2 = vmul.f32 %v6595_v54, %v6587_v43  ;;  %v2759_v47 = vpop.permute.xlu0 %2758 }
0x2523   :  { %v2694_v10 = vpack.c.bf16 %v2692_v8, %v2691_v45 }
0x2524   :  { %v2693_v9 = vpack.c.bf16 %v2690_v3, %v2689_v2 }
0x2526   :  { %6116 = vmatprep.mubr.msk.bf16.mxu1 %vm117_vm3, %v2693_v9 }
0x2527   :  { %6117 = vmatmul.mubr.msk.bf16.vlgmr.msra.gmra.mrb[64].mxu1 %vm117_vm3, %v2694_v10 }
0x2528   :  { %6124 = vmatprep.mubr.msk.bf16.mxu1 %vm65_vm2, %v2757_v19 }
0x2529   :  { %6121 = vmatpush3.bf16.xpose.msra.mxu1 %v2771_v21 }
0x252a   :  { %6397 = vmatprep.subr.msk.bf16.mxu1 %vm65_vm2, %v2763_v22 }
0x2531   :  { %6123 = vmatpush3.bf16.xpose.msra.mxu1 %v2774_v23 }
0x2538   :  { %6125 = vmatmul.mubr.msk.bf16.vlgmr.msra.gmra.mrb[68].mxu1 %vm65_vm2, %v2759_v47 }
0x25fa   :  { %v7491_v24 = vpop.f32.mrb[64].mxu1 }
0x25fb   :  { %v7493_v25 = vpop.f32.mrb[65].mxu1 }
0x25fc   :  { %v7495_v26 = vpop.f32.mrb[66].mxu1 }
0x25fd   :  { %v7497_v28 = vpop.f32.mrb[67].mxu1 }
0x260b   :  { %v6126_v30 = vpop.f32.mrb[68].mxu1 }
0x260c   :  { %v2810_v44 = vpop.f32.mrb[69].mxu1  ;;  %v2819_v34 = vadd.f32 %v7421_v52, %v6126_v30 }
0x260d   :  { %v2811_v57 = vadd.f32 %v7402_v12, %v2810_v44  ;;  %v6127_v31 = vpop.f32.mrb[70].mxu1 }
0x260e   :  { %v2813_v32 = vpop.f32.mrb[71].mxu1  ;;  %v2822_v60 = vadd.f32 %v7408_v18, %v6127_v31  ;;  %v2831_v58 = vsel %vm117_vm3, %v2819_v34, -inf }
0x260f   :  { %v2814_v33 = vadd.f32 %v7414_v20, %v2813_v32  ;;  %v2825_v61 = vsel %vm117_vm3, %v2811_v57, -inf }
0x2610   :  { %2826 = vmax.xlane.f32.xlu1 %v2825_v61  ;;  %v2834_v36 = vsel %vm117_vm3, %v2822_v60, -inf }
0x2611   :  { %v2828_v35 = vsel %vm117_vm3, %v2814_v33, -inf }
0x2612   :  { %2829 = vmax.xlane.f32.xlu0 %v2828_v35 }
0x2614   :  { %2835 = vmax.xlane.f32.xlu1 %v2834_v36 }
0x2616   :  { %2832 = vmax.xlane.f32.xlu0 %v2831_v58 }
0x2625   :  { %2873 = vrot.lane.b32.xlu1 %v7383_v55, %s6770_s30 }
0x269d   :  { %v2827_v37 = vpop.xlane.xlu1 %2826 }
0x269e   :  { %v2837_v62 = vsub.f32 %v2811_v57, %v2827_v37 }
0x269f   :  { %v2830_v1 = vpop.xlane.xlu0 %2829 }
0x26a0   :  { %v2838_v38 = vsub.f32 %v2814_v33, %v2830_v1  ;;  %v2841_v46 = vmul.f32 1.442695, %v2837_v62 }
0x26a1   :  { %v2836_v40 = vpop.xlane.xlu1 %2835 }
0x26a2   :  { %v2840_v41 = vsub.f32 %v2822_v60, %v2836_v40  ;;  %v2843_v42 = vmul.f32 1.442695, %v2838_v38 }
0x26a3   :  { %v2833_v15 = vpop.xlane.xlu0 %2832 }
0x26a4   :  { %v2847_v43 = vmul.f32 1.442695, %v2840_v41  ;;  %v2839_v56 = vsub.f32 %v2819_v34, %v2833_v15 }
0x26a5   :  { %v2874_v53 = vpop.permute.xlu1 %2873 }
0x26a6   :  { %6596 = vpow2.f32 %v2847_v43  ;;  %v2845_v48 = vmul.f32 1.442695, %v2839_v56 }
0x26a7   :  { %6598 = vpow2.f32 %v2843_v42 }
0x26a8   :  { %6600 = vpow2.f32 %v2845_v48 }
0x26a9   :  { %6602 = vpow2.f32 %v2841_v46 }
0x26b0   :  { %v6597_v50 = vpop.eup %6596 }
0x26b1   :  { %v6599_v5 = vpop.eup %6598  ;;  %v2858_v4 = vsel %vm117_vm3, %v6597_v50, 0.0 }
0x26b2   :  { %v6601_v7 = vpop.eup %6600  ;;  %2859 = vadd.xlane.f32.xlu1 %v2858_v4  ;;  %v2852_v51 = vsel %vm117_vm3, %v6599_v5, 0.0 }
0x26b3   :  { %v2855_v49 = vsel %vm117_vm3, %v6601_v7, 0.0  ;;  %v6603_v6 = vpop.eup %6602 }
0x26b4   :  { %2856 = vadd.xlane.f32.xlu0 %v2855_v49  ;;  %v2849_v39 = vsel %vm117_vm3, %v6603_v6, 0.0 }
0x26b6   :  { %2853 = vadd.xlane.f32.xlu1 %v2852_v51 }
0x26b8   :  { %2850 = vadd.xlane.f32.xlu0 %v2849_v39 }
0x26c7   :  { %2936 = vrot.lane.b32.xlu1 %v7385_v63, %s6771_s3 }
0x26cb   :  { %2932 = vrot.lane.b32.xlu1 %v7385_v63, %s6772_s0 }
0x26ce   :  { %2871 = vrot.lane.b32.xlu0 %v7385_v63, %s6770_s30 }
0x26d2   :  { %2938 = vrot.lane.b32.xlu0 %v7383_v55, %s6771_s3 }
0x26d6   :  { %2934 = vrot.lane.b32.xlu0 %v7383_v55, %s6772_s0 }
0x273f   :  { %v2860_v54 = vpop.xlane.xlu1 %2859 }
0x2741   :  { %v2857_v45 = vpop.xlane.xlu0 %2856 }
0x2742   :  { %6604 = vrcp.f32 %v2857_v45 }
0x2743   :  { %v2854_v2 = vpop.xlane.xlu1 %2853 }
0x2744   :  { %6606 = vrcp.f32 %v2854_v2 }
0x2745   :  { %6608 = vrcp.f32 %v2860_v54  ;;  %v2851_v3 = vpop.xlane.xlu0 %2850 }
0x2746   :  { %6610 = vrcp.f32 %v2851_v3 }
0x2747   :  { %v2937_v21 = vpop.permute.xlu1 %2936 }
0x2748   :  { %v2947_v60 = vsel %vm65_vm2, %v2937_v21, 0 }
0x2749   :  { %v2872_v8 = vpop.permute.xlu0 %2871 }
0x274a   :  { %6128 = vmatprep.subr.bf16.mxu0 %v2872_v8 }
0x274b   :  { %6129 = vmatpush3.bf16.msra.mxu0 %v2872_v8  ;;  %v2933_v32 = vpop.permute.xlu1 %2932 }
0x274c   :  { %6130 = vmatprep.subr.bf16.mxu0 %v2874_v53  ;;  %v6605_v9 = vpop.eup %6604 }
0x274d   :  { %v2867_v23 = vmul.f32 %v6605_v9, %v6601_v7  ;;  %v2939_v33 = vpop.permute.xlu0 %2938 }
0x274e   :  { %v6607_v10 = vpop.eup %6606  ;;  %v2950_v61 = vsel %vm65_vm2, %v2939_v33, 0 }
0x274f   :  { %v6609_v19 = vpop.eup %6608  ;;  %6131 = vmatpush3.bf16.msra.mxu0 %v2874_v53  ;;  %v2866_v30 = vmul.f32 %v6607_v10, %v6599_v5 }
0x2750   :  { %v6611_v22 = vpop.eup %6610  ;;  %6398 = vmatprep.subr.msk.bf16.mxu0 %vm65_vm2, %v2937_v21  ;;  %v2868_v44 = vmul.f32 %v6609_v19, %v6597_v50 }
0x2751   :  { %v2865_v47 = vmul.f32 %v6611_v22, %v6603_v6  ;;  %v2935_v34 = vpop.permute.xlu0 %2934 }
0x2752   :  { %v2870_v31 = vpack.c.bf16 %v2868_v44, %v2867_v23 }
0x2753   :  { %v2869_v57 = vpack.c.bf16 %v2866_v30, %v2865_v47 }
0x2755   :  { %6132 = vmatprep.mubr.msk.bf16.mxu0 %vm117_vm3, %v2869_v57 }
0x2756   :  { %6133 = vmatmul.mubr.msk.bf16.vlgmr.msra.gmra.mrb[72].mxu0 %vm117_vm3, %v2870_v31 }
0x2757   :  { %6140 = vmatprep.mubr.msk.bf16.mxu0 %vm65_vm2, %v2933_v32 }
0x2758   :  { %6137 = vmatpush3.bf16.xpose.msra.mxu0 %v2947_v60  ;;  %v6446_v60 = vld [vmem:[%s8166_s12 + $0x10] sm:$0xff]  }
0x2759   :  { %6399 = vmatprep.subr.msk.bf16.mxu0 %vm65_vm2, %v2939_v33 }
0x2760   :  { %6139 = vmatpush3.bf16.xpose.msra.mxu0 %v2950_v61  ;;  %v6447_v61 = vld [vmem:[%s8166_s12 + $0x18] sm:$0xff]  }
0x2767   :  { %6141 = vmatmul.mubr.msk.bf16.vlgmr.msra.gmra.mrb[76].mxu0 %vm65_vm2, %v2935_v34  ;;  %v3250_v34 = vpack.c.bf16 %v7378_v59, %v7378_v59 }
0x2829   :  { %v6134_v35 = vpop.f32.mrb[72].mxu0 }
0x282a   :  { %v2917_v36 = vpop.f32.mrb[73].mxu0 }
0x282b   :  { %v6135_v58 = vpop.f32.mrb[74].mxu0 }
0x282c   :  { %v2920_v37 = vpop.f32.mrb[75].mxu0 }
0x283a   :  { %v6142_v1 = vpop.f32.mrb[76].mxu0 }
0x283b   :  { %v2986_v38 = vpop.f32.mrb[77].mxu0  ;;  %v2995_v56 = vadd.f32 %v7421_v52, %v6142_v1 }
0x283c   :  { %v2987_v40 = vadd.f32 %v7402_v12, %v2986_v38  ;;  %v6143_v62 = vpop.f32.mrb[78].mxu0 }
0x283d   :  { %v2989_v41 = vpop.f32.mrb[79].mxu0  ;;  %v2998_v42 = vadd.f32 %v7408_v18, %v6143_v62  ;;  %v3007_v50 = vsel %vm117_vm3, %v2995_v56, -inf }
0x283e   :  { %v2990_v15 = vadd.f32 %v7414_v20, %v2989_v41  ;;  %v3001_v43 = vsel %vm117_vm3, %v2987_v40, -inf }
0x283f   :  { %3002 = vmax.xlane.f32.xlu1 %v3001_v43  ;;  %v3010_v48 = vsel %vm117_vm3, %v2998_v42, -inf }
0x2840   :  { %v3004_v46 = vsel %vm117_vm3, %v2990_v15, -inf }
0x2841   :  { %3005 = vmax.xlane.f32.xlu0 %v3004_v46 }
0x2843   :  { %3011 = vmax.xlane.f32.xlu1 %v3010_v48 }
0x2845   :  { %3008 = vmax.xlane.f32.xlu0 %v3007_v50 }
0x28cc   :  { %v3003_v12 = vpop.xlane.xlu1 %3002 }
0x28cd   :  { %v3013_v7 = vsub.f32 %v2987_v40, %v3003_v12 }
0x28ce   :  { %v3006_v5 = vpop.xlane.xlu0 %3005 }
0x28cf   :  { %v3014_v4 = vsub.f32 %v2990_v15, %v3006_v5  ;;  %v3017_v52 = vmul.f32 1.442695, %v3013_v7 }
0x28d0   :  { %v3012_v18 = vpop.xlane.xlu1 %3011 }
0x28d1   :  { %v3016_v20 = vsub.f32 %v2998_v42, %v3012_v18  ;;  %v3019_v49 = vmul.f32 1.442695, %v3014_v4 }
0x28d2   :  { %v3009_v6 = vpop.xlane.xlu0 %3008 }
0x28d3   :  { %v3023_v51 = vmul.f32 1.442695, %v3016_v20  ;;  %v3015_v39 = vsub.f32 %v2995_v56, %v3009_v6 }
0x28d5   :  { %6612 = vpow2.f32 %v3023_v51  ;;  %v3021_v53 = vmul.f32 1.442695, %v3015_v39 }
0x28d6   :  { %6614 = vpow2.f32 %v3019_v49 }
0x28d7   :  { %6616 = vpow2.f32 %v3021_v53 }
0x28d8   :  { %6618 = vpow2.f32 %v3017_v52 }
0x28df   :  { %v6613_v54 = vpop.eup %6612 }
0x28e0   :  { %v6615_v45 = vpop.eup %6614  ;;  %v3034_v2 = vsel %vm117_vm3, %v6613_v54, 0.0 }
0x28e1   :  { %v6617_v3 = vpop.eup %6616  ;;  %3035 = vadd.xlane.f32.xlu1 %v3034_v2  ;;  %v3028_v10 = vsel %vm117_vm3, %v6615_v45, 0.0 }
0x28e2   :  { %v3031_v8 = vsel %vm117_vm3, %v6617_v3, 0.0  ;;  %v6619_v9 = vpop.eup %6618 }
0x28e3   :  { %3032 = vadd.xlane.f32.xlu0 %v3031_v8  ;;  %v3025_v19 = vsel %vm117_vm3, %v6619_v9, 0.0 }
0x28e5   :  { %3029 = vadd.xlane.f32.xlu1 %v3028_v10 }
0x28e7   :  { %3026 = vadd.xlane.f32.xlu0 %v3025_v19 }
0x28f6   :  { %3049 = vrot.lane.b32.xlu1 %v7383_v55, %s6773_s17 }
0x28fa   :  { %3112 = vrot.lane.b32.xlu1 %v7493_v25, %s6774_s18 }
0x28fd   :  { %3047 = vrot.lane.b32.xlu0 %v7385_v63, %s6773_s17 }
0x28fe   :  { %3116 = vrot.lane.b32.xlu1 %v7491_v24, %s6774_s18 }
0x2901   :  { %3114 = vrot.lane.b32.xlu0 %v7497_v28, %s6774_s18 }
0x2902   :  { %3128 = vrot.lane.b32.xlu1 %v2917_v36, %s6775_s19 }
0x2905   :  { %3118 = vrot.lane.b32.xlu0 %v7495_v26, %s6774_s18 }
0x2906   :  { %3132 = vrot.lane.b32.xlu1 %v6134_v35, %s6775_s19 }
0x2909   :  { %3130 = vrot.lane.b32.xlu0 %v2920_v37, %s6775_s19 }
0x290d   :  { %3134 = vrot.lane.b32.xlu0 %v6135_v58, %s6775_s19 }
0x296e   :  { %v3036_v55 = vpop.xlane.xlu1 %3035 }
0x2970   :  { %v3033_v25 = vpop.xlane.xlu0 %3032 }
0x2971   :  { %6620 = vrcp.f32 %v3033_v25 }
0x2972   :  { %v3030_v63 = vpop.xlane.xlu1 %3029 }
0x2973   :  { %6622 = vrcp.f32 %v3030_v63 }
0x2974   :  { %6624 = vrcp.f32 %v3036_v55  ;;  %v3027_v24 = vpop.xlane.xlu0 %3026 }
0x2975   :  { %6626 = vrcp.f32 %v3027_v24 }
0x2976   :  { %v3050_v21 = vpop.permute.xlu1 %3049 }
0x2978   :  { %v3048_v28 = vpop.permute.xlu0 %3047 }
0x2979   :  { %6144 = vmatprep.subr.bf16.mxu1 %v3048_v28 }
0x297a   :  { %6145 = vmatpush3.bf16.msra.mxu1 %v3048_v28  ;;  %v3113_v41 = vpop.permute.xlu1 %3112 }
0x297b   :  { %6146 = vmatprep.subr.bf16.mxu1 %v3050_v21  ;;  %v6621_v26 = vpop.eup %6620  ;;  %v3156_v12 = vsel %vm65_vm2, %v7453_v13, %v3113_v41 }
0x297c   :  { %v3043_v30 = vmul.f32 %v6621_v26, %v6617_v3  ;;  %v3115_v42 = vpop.permute.xlu0 %3114 }
0x297d   :  { %v6623_v22 = vpop.eup %6622  ;;  %v3157_v18 = vsel %vm65_vm2, %v7457_v16, %v3115_v42 }
0x297e   :  { %v6625_v23 = vpop.eup %6624  ;;  %6147 = vmatpush3.bf16.msra.mxu1 %v3050_v21  ;;  %v3042_v57 = vmul.f32 %v6623_v22, %v6615_v45  ;;  %v3117_v15 = vpop.permute.xlu1 %3116 }
0x297f   :  { %v6627_v47 = vpop.eup %6626  ;;  %6152 = vmatprep.subr.bf16.mxu1 %v6759_v0  ;;  %v3044_v31 = vmul.f32 %v6625_v23, %v6613_v54  ;;  %v3158_v51 = vsel %vm65_vm2, %v7451_v11, %v3117_v15 }
0x2980   :  { %v3041_v44 = vmul.f32 %v6627_v47, %v6619_v9  ;;  %v3119_v43 = vpop.permute.xlu0 %3118 }
0x2981   :  { %v3046_v33 = vpack.c.bf16 %v3044_v31, %v3043_v30  ;;  %v3159_v16 = vsel %vm65_vm2, %v7455_v14, %v3119_v43 }
0x2982   :  { %v3045_v32 = vpack.c.bf16 %v3042_v57, %v3041_v44  ;;  %v3129_v56 = vpop.permute.xlu1 %3128 }
0x2983   :  { %v3160_v5 = vsel %vm321_vm5, %v3156_v12, %v3129_v56  ;;  %v5561_v12 = vld [vmem:[%s8169_s11 + $0x1] ss:$0 sm:$0xff] }
0x2984   :  { %6148 = vmatprep.mubr.msk.bf16.mxu1 %vm117_vm3, %v3045_v32  ;;  %v3131_v46 = vpop.permute.xlu0 %3130 }
0x2985   :  { %6149 = vmatmul.mubr.msk.bf16.vlgmr.msra.gmra.mrb[72].mxu1 %vm117_vm3, %v3046_v33  ;;  %v3161_v20 = vsel %vm321_vm5, %v3157_v18, %v3131_v46  ;;  %v6448_v33 = vld [vmem:[%s8167_s13 + $0x10] sm:$0xff]   ;;  %v5560_v46 = vld [vmem:[%s8168_s10 + $0x1] ss:$0 sm:$0xff] }
0x2986   :  { %6153 = vmatpush3.bf16.msra.mxu1 %v6446_v60  ;;  %6156 = vmatprep.mubr.msk.bf16.mxu1 %vm6760_vm1, %v6759_v0  ;;  %v3133_v48 = vpop.permute.xlu1 %3132 }
0x2987   :  { %6154 = vmatprep.subr.bf16.mxu1 %v6759_v0  ;;  %v3162_v13 = vsel %vm321_vm5, %v3158_v51, %v3133_v48  ;;  %6160 = vmatprep.subr.bf16.mxu0 %v6448_v33 }
0x2988   :  { %v3135_v50 = vpop.permute.xlu0 %3134  ;;  %6161 = vmatpush3.bf16.msra.mxu0 %v6448_v33 }
0x298a   :  { %6155 = vmatpush3.bf16.msra.mxu1 %v6447_v61  ;;  %v6449_v61 = vld [vmem:[%s8167_s13 + $0x18] sm:$0xff]  }
0x298b   :  { %6168 = vmatprep.subr.bf16.mxu1 %v6759_v0  ;;  %6162 = vmatprep.subr.bf16.mxu0 %v6449_v61 }
0x298c   :  { %6163 = vmatpush3.bf16.msra.mxu0 %v6449_v61 }
0x298d   :  { %6157 = vmatmul.mubr.msk.bf16.vlgmr.msra.gmra.mrb[76].mxu1 %vm117_vm3, %v3250_v34  ;;  %6176 = vmatprep.subr.bf16.mxu0 %v6759_v0 }
0x298e   :  { %6172 = vmatprep.mubr.msk.bf16.mxu1 %vm6760_vm1, %v6759_v0 }
0x2a58   :  { %v6150_v35 = vpop.f32.mrb[72].mxu1 }
0x2a59   :  { %v3093_v36 = vpop.f32.mrb[73].mxu1 }
0x2a5a   :  { %3144 = vrot.lane.b32.xlu1 %v3093_v36, %s6776_s22  ;;  %v6151_v58 = vpop.f32.mrb[74].mxu1 }
0x2a5b   :  { %v3096_v37 = vpop.f32.mrb[75].mxu1 }
0x2a5c   :  { %3146 = vrot.lane.b32.xlu0 %v3096_v37, %s6776_s22 }
0x2a5e   :  { %3148 = vrot.lane.b32.xlu1 %v6150_v35, %s6776_s22 }
0x2a60   :  { %3150 = vrot.lane.b32.xlu0 %v6151_v58, %s6776_s22  ;;  %v7581_v1 = vpop.f32.mrb[76].mxu1 }
0x2a61   :  { %v6158_v38 = vpop.f32.mrb[77].mxu1 }
0x2a62   :  { %v3308_v40 = vpop.f32.mrb[78].mxu1 }
0x2a63   :  { %v6159_v62 = vpop.f32.mrb[79].mxu1 }
0x2acc   :  { %v3145_v4 = vpop.permute.xlu1 %3144 }
0x2acd   :  { %v3164_v7 = vsel %vm1591_vm10, %v3160_v5, %v3145_v4 }
0x2ace   :  { %v3168_v49 = vadd.f32 %v3164_v7, %v7350_v29  ;;  %v3147_v6 = vpop.permute.xlu0 %3146  ;;  %v3163_v29 = vsel %vm321_vm5, %v3159_v16, %v3135_v50 }
0x2acf   :  { %v3165_v39 = vsel %vm1591_vm10, %v3161_v20, %v3147_v6 }
0x2ad0   :  { %v3169_v52 = vadd.f32 %v3165_v39, %v7348_v27  ;;  %v3149_v53 = vpop.permute.xlu1 %3148  ;;  %v3176_v54 = vsel %vm117_vm3, %v3168_v49, 0.0 }
0x2ad1   :  { %v3166_v45 = vsel %vm1591_vm10, %v3162_v13, %v3149_v53  ;;  %3177 = vadd.xlane.f32.xlu1 %v3176_v54 }
0x2ad2   :  { %v3170_v2 = vadd.f32 %v3166_v45, %v7378_v59  ;;  %v3151_v11 = vpop.permute.xlu0 %3150  ;;  %v3179_v3 = vsel %vm117_vm3, %v3169_v52, 0.0 }
0x2ad3   :  { %v3167_v8 = vsel %vm1591_vm10, %v3163_v29, %v3151_v11  ;;  %3180 = vadd.xlane.f32.xlu0 %v3179_v3 }
0x2ad4   :  { %v3171_v27 = vadd.f32 %v3167_v8, %v7376_v17  ;;  %v3182_v10 = vsel %vm117_vm3, %v3170_v2, 0.0 }
0x2ad6   :  { %v3185_v9 = vsel %vm117_vm3, %v3171_v27, 0.0 }
0x2ad7   :  { %3186 = vadd.xlane.f32.xlu1 %v3185_v9  ;;  %3183 = vadd.xlane.f32.xlu0 %v3182_v10 }
0x2b5e   :  { %v3178_v14 = vpop.xlane.xlu1 %3177 }
0x2b5f   :  { %v3188_v19 = vmul.f32 0.03125, %v3178_v14  ;;  %v7644_v14 = vpack.c.bf16 %v7581_v1, %v7581_v1 }
0x2b60   :  { %v3181_v55 = vpop.xlane.xlu0 %3180 }
0x2b61   :  { %v3192_v25 = vsub.f32 %v3168_v49, %v3188_v19  ;;  %v3189_v63 = vmul.f32 0.03125, %v3181_v55  ;;  %v7653_v55 = vld [vmem:[%s8170_s2] ss:$0 sm:$0xff] }
0x2b63   :  { %v3193_v59 = vsub.f32 %v3169_v52, %v3189_v63  ;;  %v3196_v24 = vmul.f32 %v3192_v25, %v3192_v25 }
0x2b64   :  { %v3184_v28 = vpop.xlane.xlu0 %3183  ;;  %v3187_v21 = vpop.xlane.xlu1 %3186 }
0x2b65   :  { %v3190_v26 = vmul.f32 0.03125, %v3184_v28  ;;  %v3191_v22 = vmul.f32 0.03125, %v3187_v21  ;;  %v3200_v23 = vsel %vm117_vm3, %v3196_v24, 0.0  ;;  %v3197_v17 = vmul.f32 %v3193_v59, %v3193_v59 }
0x2b66   :  { %3201 = vadd.xlane.f32.xlu0 %v3200_v23 }
0x2b67   :  { %v3194_v47 = vsub.f32 %v3170_v2, %v3190_v26  ;;  %v3195_v30 = vsub.f32 %v3171_v27, %v3191_v22  ;;  %v3203_v44 = vsel %vm117_vm3, %v3197_v17, 0.0 }
0x2b68   :  { %3204 = vadd.xlane.f32.xlu1 %v3203_v44 }
0x2b69   :  { %v3198_v57 = vmul.f32 %v3194_v47, %v3194_v47  ;;  %v3199_v31 = vmul.f32 %v3195_v30, %v3195_v30 }
0x2b6b   :  { %v3206_v32 = vsel %vm117_vm3, %v3198_v57, 0.0  ;;  %v3209_v60 = vsel %vm117_vm3, %v3199_v31, 0.0 }
0x2b6c   :  { %3207 = vadd.xlane.f32.xlu0 %v3206_v32  ;;  %3210 = vadd.xlane.f32.xlu1 %v3209_v60 }
0x2bf3   :  { %v3202_v34 = vpop.xlane.xlu0 %3201 }
0x2bf4   :  { %v3212_v35 = vmul.f32 0.03125, %v3202_v34 }
0x2bf5   :  { %v3205_v36 = vpop.xlane.xlu1 %3204 }
0x2bf6   :  { %v3216_v58 = vadd.f32 1e-05, %v3212_v35  ;;  %v3213_v37 = vmul.f32 0.03125, %v3205_v36 }
0x2bf8   :  { %6628 = vrsqrt.f32 %v3216_v58  ;;  %v3217_v38 = vadd.f32 1e-05, %v3213_v37 }
0x2bf9   :  { %v3208_v40 = vpop.xlane.xlu0 %3207  ;;  %v3211_v62 = vpop.xlane.xlu1 %3210 }
0x2bfa   :  { %6630 = vrsqrt.f32 %v3217_v38  ;;  %v3214_v41 = vmul.f32 0.03125, %v3208_v40  ;;  %v3215_v42 = vmul.f32 0.03125, %v3211_v62 }
0x2bfc   :  { %v3218_v15 = vadd.f32 1e-05, %v3214_v41  ;;  %v3219_v43 = vadd.f32 1e-05, %v3215_v42 }
0x2bfe   :  { %6632 = vrsqrt.f32 %v3218_v15 }
0x2bff   :  { %6634 = vrsqrt.f32 %v3219_v43 }
0x2c02   :  { %v6629_v56 = vpop.eup %6628 }
0x2c03   :  { %v3224_v48 = vmul.f32 %v6629_v56, %v3192_v25 }
0x2c04   :  { %v6631_v50 = vpop.eup %6630 }
0x2c05   :  { %v3225_v5 = vmul.f32 %v6631_v50, %v3193_v59  ;;  %v3234_v4 = vmul.f32 %v5560_v46, %v3224_v48 }
0x2c07   :  { %v3235_v18 = vmul.f32 %v5560_v46, %v3225_v5  ;;  %v3244_v7 = vadd.f32 %v5561_v12, %v3234_v4 }
0x2c08   :  { %v6633_v20 = vpop.eup %6632 }
0x2c09   :  { %v6635_v49 = vpop.eup %6634  ;;  %v3226_v6 = vmul.f32 %v6633_v20, %v3194_v47  ;;  %v3245_v51 = vadd.f32 %v5561_v12, %v3235_v18  ;;  %3894 = vst.msk [vmem:[#allocation2] sm:$0xff] %vm117_vm3, %v3244_v7 }
0x2c0a   :  { %v3227_v39 = vmul.f32 %v6635_v49, %v3195_v30 }
0x2c0b   :  { %v3248_v13 = vpack.c.bf16 %v3245_v51, %v3244_v7  ;;  %3895 = vst.msk [vmem:[#allocation2 + $0x8] sm:$0xff] %vm117_vm3, %v3245_v51  ;;  %v3236_v52 = vmul.f32 %v5560_v46, %v3226_v6 }
0x2c0c   :  { %v3237_v53 = vmul.f32 %v5560_v46, %v3227_v39 }
0x2c0d   :  { %6164 = vmatprep.mubr.msk.bf16.mxu0 %vm117_vm3, %v3248_v13  ;;  %v3246_v54 = vadd.f32 %v5561_v12, %v3236_v52 }
0x2c0e   :  { %v3247_v16 = vadd.f32 %v5561_v12, %v3237_v53 }
0x2c10   :  { %v3249_v45 = vpack.c.bf16 %v3247_v16, %v3246_v54 }
0x2c12   :  { %6165 = vmatmul.mubr.msk.bf16.vlgmr.msra.gmra.mrb[80].mxu0 %vm117_vm3, %v3249_v45 }
0x2c13   :  { %6180 = vmatprep.mubr.msk.bf16.mxu0 %vm6760_vm1, %v6759_v0 }
0x2ce5   :  { %v6166_v29 = vpop.f32.mrb[80].mxu0 }
0x2ce6   :  { %v3369_v2 = vpop.f32.mrb[81].mxu0 }
0x2ce7   :  { %v6167_v11 = vpop.f32.mrb[82].mxu0 }
0x2ce8   :  { %v7630_v3 = vpack.c.bf16 %v6167_v11, %v6166_v29  ;;  %v3372_v8 = vpop.f32.mrb[83].mxu0 }
0x2ce9   :  { %v7632_v27 = vpack.c.bf16 %v3372_v8, %v3369_v2 }
0x2cea   :  { %3451 = vrot.lane.b32.xlu1 %v7630_v3, %s6763_s5  ;;  %v3393_v10 = vsel %vm65_vm2, %v7630_v3, 0 }
0x2ceb   :  { %v3390_v9 = vsel %vm65_vm2, %v7632_v27, 0 }
0x2cec   :  { %6169 = vmatpush3.bf16.xpose.msra.mxu1 %v3390_v9 }
0x2ced   :  { %6170 = vmatprep.subr.bf16.mxu1 %v6759_v0 }
0x2cf4   :  { %6171 = vmatpush3.bf16.xpose.msra.mxu1 %v3393_v10 }
0x2cf5   :  { %6192 = vmatprep.subr.bf16.mxu1 %v6759_v0 }
0x2cfb   :  { %6173 = vmatmul.mubr.msk.bf16.vlgmr.msra.gmra.mrb[80].mxu1 %vm65_vm2, %v7644_v14 }
0x2cfc   :  { %6196 = vmatprep.mubr.msk.bf16.mxu1 %vm6760_vm1, %v6759_v0 }
0x2d5c   :  { %v3452_v23 = vpop.permute.xlu1 %3451 }
0x2dce   :  { %v3429_v19 = vpop.f32.mrb[80].mxu1 }
0x2dcf   :  { %v3430_v25 = vadd.f32 %v7653_v55, %v3429_v19  ;;  %v6174_v63 = vpop.f32.mrb[81].mxu1 }
0x2dd0   :  { %v3432_v59 = vpop.f32.mrb[82].mxu1 }
0x2dd1   :  { %v6175_v24 = vpop.f32.mrb[83].mxu1  ;;  %v3435_v1 = vsel %vm707_vm9, %v3430_v25, -inf }
0x2dd2   :  { %3436 = vmax.xlane.f32.xlu0 %v3435_v1 }
0x2de8   :  { %3449 = vrot.lane.b32.xlu0 %v7632_v27, %s6763_s5 }
0x2dec   :  { %3503 = vrot.lane.b32.xlu0 %v7630_v3, %s6766_s26 }
0x2e5f   :  { %v3437_v28 = vpop.xlane.xlu0 %3436 }
0x2e60   :  { %v3438_v21 = vsub.f32 %v3430_v25, %v3437_v28 }
0x2e62   :  { %v3439_v26 = vmul.f32 1.442695, %v3438_v21 }
0x2e63   :  { %v3450_v22 = vpop.permute.xlu0 %3449 }
0x2e64   :  { %6636 = vpow2.f32 %v3439_v26  ;;  %6177 = vmatpush3.bf16.msra.mxu0 %v3450_v22 }
0x2e65   :  { %6178 = vmatprep.subr.bf16.mxu0 %v6759_v0 }
0x2e67   :  { %v3504_v33 = vpop.permute.xlu0 %3503 }
0x2e68   :  { %6179 = vmatpush3.bf16.msra.mxu0 %v3452_v23  ;;  %v3512_v61 = vsel %vm65_vm2, %v3504_v33, 0 }
0x2e69   :  { %6184 = vmatprep.subr.bf16.mxu0 %v6759_v0 }
0x2e6e   :  { %v6637_v17 = vpop.eup %6636 }
0x2e6f   :  { %v3441_v47 = vsel %vm707_vm9, %v6637_v17, 0.0 }
0x2e70   :  { %3442 = vadd.xlane.f32.xlu1 %v3441_v47 }
0x2e81   :  { %3501 = vrot.lane.b32.xlu1 %v7632_v27, %s6766_s26 }
0x2e85   :  { %3499 = vrot.lane.b32.xlu1 %v7644_v14, %s6766_s26 }
0x2e89   :  { %3568 = vrot.lane.b32.xlu1 %v7630_v3, %s6765_s25 }
0x2efd   :  { %v3443_v30 = vpop.xlane.xlu1 %3442 }
0x2efe   :  { %6638 = vrcp.f32 %v3443_v30 }
0x2f01   :  { %v3502_v31 = vpop.permute.xlu1 %3501 }
0x2f02   :  { %v3509_v60 = vsel %vm65_vm2, %v3502_v31, 0 }
0x2f05   :  { %v3500_v34 = vpop.permute.xlu1 %3499 }
0x2f08   :  { %v6639_v44 = vpop.eup %6638 }
0x2f09   :  { %v3445_v57 = vmul.f32 %v6639_v44, %v6637_v17  ;;  %v3569_v50 = vpop.permute.xlu1 %3568 }
0x2f0b   :  { %v3446_v32 = vpack.c.bf16 %v3445_v57, %v3445_v57 }
0x2f0d   :  { %6181 = vmatmul.mubr.msk.bf16.vlgmr.msra.gmra.mrb[84].mxu0 %vm117_vm3, %v3446_v32 }
0x2f0e   :  { %6185 = vmatpush3.bf16.xpose.msra.mxu0 %v3509_v60  ;;  %6188 = vmatprep.mubr.msk.bf16.mxu0 %vm6760_vm1, %v6759_v0 }
0x2f0f   :  { %6186 = vmatprep.subr.bf16.mxu0 %v6759_v0 }
0x2f16   :  { %6187 = vmatpush3.bf16.xpose.msra.mxu0 %v3512_v61 }
0x2f17   :  { %6208 = vmatprep.subr.bf16.mxu0 %v6759_v0 }
0x2f1d   :  { %6189 = vmatmul.mubr.msk.bf16.vlgmr.msra.gmra.mrb[88].mxu0 %vm65_vm2, %v3500_v34 }
0x2f1e   :  { %6212 = vmatprep.mubr.msk.bf16.mxu0 %vm6760_vm1, %v6759_v0 }
0x2fe0   :  { %v7680_v35 = vpop.f32.mrb[84].mxu0 }
0x2fe1   :  { %v6182_v36 = vpop.f32.mrb[85].mxu0 }
0x2fe2   :  { %v3495_v58 = vpop.f32.mrb[86].mxu0 }
0x2fe3   :  { %v6183_v37 = vpop.f32.mrb[87].mxu0 }
0x2ff0   :  { %v3548_v38 = vpop.f32.mrb[88].mxu0 }
0x2ff1   :  { %v3549_v40 = vadd.f32 %v7653_v55, %v3548_v38  ;;  %v6190_v62 = vpop.f32.mrb[89].mxu0 }
0x2ff2   :  { %v3551_v41 = vpop.f32.mrb[90].mxu0 }
0x2ff3   :  { %v6191_v42 = vpop.f32.mrb[91].mxu0  ;;  %v3554_v15 = vsel %vm707_vm9, %v3549_v40, -inf }
0x2ff4   :  { %3555 = vmax.xlane.f32.xlu0 %v3554_v15 }
0x300a   :  { %3566 = vrot.lane.b32.xlu0 %v7632_v27, %s6765_s25 }
0x300e   :  { %3617 = vrot.lane.b32.xlu0 %v7632_v27, %s6769_s29 }
0x3012   :  { %3615 = vrot.lane.b32.xlu0 %v7644_v14, %s6769_s29 }
0x3081   :  { %v3556_v43 = vpop.xlane.xlu0 %3555 }
0x3082   :  { %v3557_v56 = vsub.f32 %v3549_v40, %v3556_v43 }
0x3084   :  { %v3558_v46 = vmul.f32 1.442695, %v3557_v56  ;;  %v7737_v56 = vld [vmem:[#allocation2 + $0x8] sm:$0xff] }
0x3085   :  { %v3567_v48 = vpop.permute.xlu0 %3566 }
0x3086   :  { %6640 = vpow2.f32 %v3558_v46  ;;  %6193 = vmatpush3.bf16.msra.mxu1 %v3567_v48  ;;  %v7739_v48 = vld [vmem:[#allocation2] sm:$0xff] }
0x3087   :  { %6194 = vmatprep.subr.bf16.mxu1 %v6759_v0 }
0x3089   :  { %v3618_v20 = vpop.permute.xlu0 %3617 }
0x308a   :  { %6195 = vmatpush3.bf16.msra.mxu1 %v3569_v50  ;;  %v3625_v6 = vsel %vm65_vm2, %v3618_v20, 0  ;;  %v3901_v50 = vpack.c.bf16 %v7737_v56, %v7739_v48 }
0x308b   :  { %6200 = vmatprep.subr.bf16.mxu1 %v6759_v0 }
0x308d   :  { %v3616_v13 = vpop.permute.xlu0 %3615 }
0x3090   :  { %v6641_v12 = vpop.eup %6640 }
0x3091   :  { %v3560_v5 = vsel %vm707_vm9, %v6641_v12, 0.0 }
0x3092   :  { %3561 = vadd.xlane.f32.xlu1 %v3560_v5 }
0x30a3   :  { %3619 = vrot.lane.b32.xlu1 %v7630_v3, %s6769_s29 }
0x311f   :  { %v3562_v4 = vpop.xlane.xlu1 %3561 }
0x3120   :  { %6642 = vrcp.f32 %v3562_v4 }
0x3123   :  { %v3620_v51 = vpop.permute.xlu1 %3619 }
0x3124   :  { %v3628_v39 = vsel %vm65_vm2, %v3620_v51, 0 }
0x312a   :  { %v6643_v18 = vpop.eup %6642 }
0x312b   :  { %v3564_v7 = vmul.f32 %v6643_v18, %v6641_v12 }
0x312d   :  { %v3565_v49 = vpack.c.bf16 %v3564_v7, %v3564_v7 }
0x312f   :  { %6197 = vmatmul.mubr.msk.bf16.vlgmr.msra.gmra.mrb[84].mxu1 %vm117_vm3, %v3565_v49 }
0x3130   :  { %6201 = vmatpush3.bf16.xpose.msra.mxu1 %v3625_v6  ;;  %6204 = vmatprep.mubr.msk.bf16.mxu1 %vm6760_vm1, %v6759_v0 }
0x3131   :  { %6202 = vmatprep.subr.bf16.mxu1 %v6759_v0 }
0x3138   :  { %6203 = vmatpush3.bf16.xpose.msra.mxu1 %v3628_v39  ;;  %v6752_v39 = vld [vmem:[#allocation2 + $0x10] sm:$0xff] }
0x3139   :  { %6224 = vmatprep.subr.bf16.mxu1 %v6759_v0 }
0x313f   :  { %6205 = vmatmul.mubr.msk.bf16.vlgmr.msra.gmra.mrb[88].mxu1 %vm65_vm2, %v3616_v13 }
0x3140   :  { %6228 = vmatprep.mubr.msk.bf16.mxu1 %vm6760_vm1, %v6759_v0 }
0x3202   :  { %v3609_v52 = vpop.f32.mrb[84].mxu1 }
0x3203   :  { %v6198_v53 = vpop.f32.mrb[85].mxu1 }
0x3204   :  { %v3612_v54 = vpop.f32.mrb[86].mxu1 }
0x3205   :  { %v6199_v16 = vpop.f32.mrb[87].mxu1 }
0x3212   :  { %v3664_v45 = vpop.f32.mrb[88].mxu1 }
0x3213   :  { %v3665_v29 = vadd.f32 %v7653_v55, %v3664_v45  ;;  %v6206_v2 = vpop.f32.mrb[89].mxu1 }
0x3214   :  { %v3667_v11 = vpop.f32.mrb[90].mxu1  ;;  %v6451_v2 = vld [vmem:[%s8162_s9 + $0x28] sm:$0xff]  }
0x3215   :  { %v6207_v8 = vpop.f32.mrb[91].mxu1  ;;  %v3670_v9 = vsel %vm707_vm9, %v3665_v29, -inf }
0x3216   :  { %3671 = vmax.xlane.f32.xlu1 %v3670_v9 }
0x3227   :  { %3684 = vrot.lane.b32.xlu1 %v7630_v3, %s6768_s28 }
0x322b   :  { %3733 = vrot.lane.b32.xlu1 %v7632_v27, %s6772_s0 }
0x322f   :  { %3731 = vrot.lane.b32.xlu1 %v7644_v14, %s6772_s0 }
0x32a3   :  { %v3672_v10 = vpop.xlane.xlu1 %3671 }
0x32a4   :  { %v3673_v19 = vsub.f32 %v3665_v29, %v3672_v10 }
0x32a6   :  { %v3674_v25 = vmul.f32 1.442695, %v3673_v19  ;;  %v5587_v19 = vld [vmem:[%s8171_s14 + $0x1] ss:$0 sm:$0xff] }
0x32a7   :  { %v3685_v14 = vpop.permute.xlu1 %3684 }
0x32a8   :  { %6644 = vpow2.f32 %v3674_v25 }
0x32ab   :  { %v3734_v26 = vpop.permute.xlu1 %3733 }
0x32ac   :  { %v3741_v23 = vsel %vm65_vm2, %v3734_v26, 0 }
0x32af   :  { %v3732_v30 = vpop.permute.xlu1 %3731 }
0x32b2   :  { %v6645_v63 = vpop.eup %6644 }
0x32b3   :  { %v3676_v59 = vsel %vm707_vm9, %v6645_v63, 0.0 }
0x32b4   :  { %3677 = vadd.xlane.f32.xlu0 %v3676_v59 }
0x32ca   :  { %3682 = vrot.lane.b32.xlu0 %v7632_v27, %s6768_s28 }
0x32ce   :  { %3735 = vrot.lane.b32.xlu0 %v7630_v3, %s6772_s0 }
0x3341   :  { %v3678_v24 = vpop.xlane.xlu0 %3677 }
0x3342   :  { %6646 = vrcp.f32 %v3678_v24 }
0x3345   :  { %v3683_v1 = vpop.permute.xlu0 %3682 }
0x3346   :  { %6209 = vmatpush3.bf16.msra.mxu0 %v3683_v1  ;;  %v7765_v1 = vld [vmem:[#allocation2 + $0x18] sm:$0xff] }
0x3347   :  { %6210 = vmatprep.subr.bf16.mxu0 %v6759_v0 }
0x3349   :  { %v3736_v17 = vpop.permute.xlu0 %3735 }
0x334a   :  { %6211 = vmatpush3.bf16.msra.mxu0 %v3685_v14  ;;  %v3744_v47 = vsel %vm65_vm2, %v3736_v17, 0 }
0x334b   :  { %6216 = vmatprep.subr.bf16.mxu0 %v6759_v0 }
0x334c   :  { %v6647_v28 = vpop.eup %6646 }
0x334d   :  { %v3680_v21 = vmul.f32 %v6647_v28, %v6645_v63  ;;  %v5588_v63 = vld [vmem:[%s8172_s15 + $0x1] ss:$0 sm:$0xff] }
0x334f   :  { %v3681_v22 = vpack.c.bf16 %v3680_v21, %v3680_v21 }
0x3351   :  { %6213 = vmatmul.mubr.msk.bf16.vlgmr.msra.gmra.mrb[92].mxu0 %vm117_vm3, %v3681_v22 }
0x3352   :  { %6220 = vmatprep.mubr.msk.bf16.mxu0 %vm6760_vm1, %v6759_v0 }
0x3353   :  { %6217 = vmatpush3.bf16.xpose.msra.mxu0 %v3741_v23 }
0x3354   :  { %6218 = vmatprep.subr.bf16.mxu0 %v6759_v0 }
0x335b   :  { %6219 = vmatpush3.bf16.xpose.msra.mxu0 %v3744_v47 }
0x3362   :  { %6221 = vmatmul.mubr.msk.bf16.vlgmr.msra.gmra.mrb[96].mxu0 %vm65_vm2, %v3732_v30 }
0x3424   :  { %v3725_v44 = vpop.f32.mrb[92].mxu0 }
0x3425   :  { %v6214_v57 = vpop.f32.mrb[93].mxu0 }
0x3426   :  { %v3728_v31 = vpop.f32.mrb[94].mxu0 }
0x3427   :  { %v6215_v32 = vpop.f32.mrb[95].mxu0 }
0x3435   :  { %v3780_v60 = vpop.f32.mrb[96].mxu0 }
0x3436   :  { %v3781_v33 = vadd.f32 %v7653_v55, %v3780_v60  ;;  %v6222_v61 = vpop.f32.mrb[97].mxu0 }
0x3437   :  { %v3783_v34 = vpop.f32.mrb[98].mxu0 }
0x3438   :  { %v6223_v36 = vpop.f32.mrb[99].mxu0  ;;  %v3786_v58 = vsel %vm707_vm9, %v3781_v33, -inf }
0x3439   :  { %3787 = vmax.xlane.f32.xlu0 %v3786_v58  ;;  %v7797_v58 = vld [vmem:[%s8165_s1 + $0x18] sm:$0xff] }
0x344f   :  { %3798 = vrot.lane.b32.xlu0 %v7632_v27, %s6771_s3 }
0x3453   :  { %3848 = vrot.lane.b32.xlu0 %v3609_v52, %s6774_s18 }
0x34c6   :  { %v3788_v37 = vpop.xlane.xlu0 %3787 }
0x34c7   :  { %v3789_v38 = vsub.f32 %v3781_v33, %v3788_v37  ;;  %v7791_v33 = vld [vmem:[%s8165_s1] sm:$0xff] }
0x34c9   :  { %v3790_v40 = vmul.f32 1.442695, %v3789_v38  ;;  %v7803_v38 = vld [vmem:[%s8165_s1 + $0x8] sm:$0xff] }
0x34ca   :  { %v3799_v62 = vpop.permute.xlu0 %3798 }
0x34cb   :  { %6648 = vpow2.f32 %v3790_v40  ;;  %6225 = vmatpush3.bf16.msra.mxu1 %v3799_v62 }
0x34cc   :  { %6226 = vmatprep.subr.bf16.mxu1 %v6759_v0 }
0x34ce   :  { %v3849_v18 = vpop.permute.xlu0 %3848 }
0x34cf   :  { %v3859_v20 = vsel %vm65_vm2, %v7680_v35, %v3849_v18  ;;  %v6450_v35 = vld [vmem:[%s8162_s9 + $0x20] sm:$0xff]  }
0x34d5   :  { %v6649_v55 = vpop.eup %6648 }
0x34d6   :  { %v3792_v41 = vsel %vm707_vm9, %v6649_v55, 0.0 }
0x34d7   :  { %3793 = vadd.xlane.f32.xlu1 %v3792_v41 }
0x34e8   :  { %3800 = vrot.lane.b32.xlu1 %v7630_v3, %s6771_s3 }
0x34ec   :  { %3852 = vrot.lane.b32.xlu1 %v3725_v44, %s6775_s19 }
0x3564   :  { %v3794_v27 = vpop.xlane.xlu1 %3793 }
0x3565   :  { %6650 = vrcp.f32 %v3794_v27 }
0x3568   :  { %v3801_v42 = vpop.permute.xlu1 %3800 }
0x3569   :  { %6227 = vmatpush3.bf16.msra.mxu1 %v3801_v42 }
0x356a   :  { %6232 = vmatprep.subr.bf16.mxu1 %v6450_v35 }
0x356c   :  { %v3853_v7 = vpop.permute.xlu1 %3852 }
0x356d   :  { %v3860_v49 = vsel %vm321_vm5, %v3859_v20, %v3853_v7 }
0x356f   :  { %v6651_v15 = vpop.eup %6650 }
0x3570   :  { %v3796_v43 = vmul.f32 %v6651_v15, %v6649_v55  ;;  %v7810_v55 = vld [vmem:[%s8165_s1 + $0x10] sm:$0xff] }
0x3572   :  { %v3797_v46 = vpack.c.bf16 %v3796_v43, %v3796_v43 }
0x3574   :  { %6229 = vmatmul.mubr.msk.bf16.vlgmr.msra.gmra.mrb[92].mxu1 %vm117_vm3, %v3797_v46 }
0x3575   :  { %6236 = vmatprep.mubr.msk.bf16.mxu1 %vm117_vm3, %v3901_v50  ;;  %6233 = vmatpush3.bf16.msra.mxu1 %v6450_v35 }
0x3576   :  { %6234 = vmatprep.subr.bf16.mxu1 %v6451_v2 }
0x3579   :  { %6235 = vmatpush3.bf16.msra.mxu1 %v6451_v2 }
0x3647   :  { %v3841_v3 = vpop.f32.mrb[92].mxu1 }
0x3648   :  { %3856 = vrot.lane.b32.xlu0 %v3841_v3, %s6776_s22  ;;  %v6230_v12 = vpop.f32.mrb[93].mxu1 }
0x3649   :  { %v3844_v5 = vpop.f32.mrb[94].mxu1 }
0x364a   :  { %v6231_v4 = vpop.f32.mrb[95].mxu1 }
0x36ba   :  { %v3857_v6 = vpop.permute.xlu0 %3856 }
0x36bb   :  { %v3861_v51 = vsel %vm1591_vm10, %v3860_v49, %v3857_v6 }
0x36bc   :  { %v3862_v13 = vadd.f32 %v6752_v39, %v3861_v51 }
0x36be   :  { %v3867_v52 = vsel %vm707_vm9, %v3862_v13, 0.0 }
0x36bf   :  { %3868 = vadd.xlane.f32.xlu1 %v3867_v52 }
0x374c   :  { %v3869_v53 = vpop.xlane.xlu1 %3868 }
0x374d   :  { %v3870_v54 = vmul.f32 0.03125, %v3869_v53 }
0x374f   :  { %v3871_v16 = vsub.f32 %v3862_v13, %v3870_v54 }
0x3751   :  { %v3872_v45 = vmul.f32 %v3871_v16, %v3871_v16 }
0x3753   :  { %v3873_v29 = vsel %vm707_vm9, %v3872_v45, 0.0 }
0x3754   :  { %3874 = vadd.xlane.f32.xlu0 %v3873_v29 }
0x37e1   :  { %v3875_v11 = vpop.xlane.xlu0 %3874 }
0x37e2   :  { %v3876_v8 = vmul.f32 0.03125, %v3875_v11 }
0x37e4   :  { %v3877_v9 = vadd.f32 1e-05, %v3876_v8 }
0x37e6   :  { %6652 = vrsqrt.f32 %v3877_v9 }
0x37f0   :  { %v6653_v10 = vpop.eup %6652 }
0x37f1   :  { %v3879_v25 = vmul.f32 %v6653_v10, %v3871_v16 }
0x37f3   :  { %v3886_v59 = vmul.f32 %v5587_v19, %v3879_v25 }
0x37f5   :  { %v3893_v24 = vadd.f32 %v5588_v63, %v3886_v59 }
0x37f7   :  { %3896 = vst.msk [vmem:[#allocation2 + $0x10] sm:$0xf] %vm707_vm9, %v3893_v24 }
0x37fe   :  { %v7767_v14 = vld [vmem:[#allocation2 + $0x10] sm:$0xff] }
0x37ff   :  { %v3902_v28 = vpack.c.bf16 %v7765_v1, %v7767_v14 }
0x3801   :  { %6237 = vmatmul.mubr.msk.bf16.vlgmr.msra.gmra.mrb[96].mxu1 %vm117_vm3, %v3902_v28 }
0x38d4   :  { %v6238_v21 = vpop.f32.mrb[96].mxu1 }
0x38d5   :  { %v3960_v26 = vpop.f32.mrb[97].mxu1 }
0x38d6   :  { %v6239_v22 = vpop.f32.mrb[98].mxu1 }
0x38d7   :  { %v7772_v23 = vpack.c.bf16 %v6239_v22, %v6238_v21  ;;  %v3963_v17 = vpop.f32.mrb[99].mxu1 }
0x38d8   :  { %v7774_v47 = vpack.c.bf16 %v3963_v17, %v3960_v26 }
0x38d9   :  { %3981 = vrot.lane.b32.xlu1 %v7772_v23, %s6763_s5 }
0x38da   :  { %3979 = vrot.lane.b32.xlu0 %v7774_v47, %s6763_s5  ;;  %6244 = vmatprep.mubr.msk.bf16.mxu0 %vm65_vm2, %v7774_v47 }
0x394b   :  { %v3982_v57 = vpop.permute.xlu1 %3981 }
0x394c   :  { %v3980_v30 = vpop.permute.xlu0 %3979  ;;  %v3993_v31 = vsel %vm65_vm2, %v3982_v57, 0 }
0x394d   :  { %6400 = vmatprep.subr.msk.bf16.mxu0 %vm65_vm2, %v3980_v30  ;;  %v3990_v44 = vsel %vm65_vm2, %v3980_v30, 0 }
0x394e   :  { %6241 = vmatpush3.bf16.xpose.msra.mxu0 %v3990_v44 }
0x394f   :  { %6401 = vmatprep.subr.msk.bf16.mxu0 %vm65_vm2, %v3982_v57 }
0x3956   :  { %6243 = vmatpush3.bf16.xpose.msra.mxu0 %v3993_v31 }
0x395d   :  { %6245 = vmatmul.mubr.msk.bf16.vlgmr.msra.gmra.mrb[100].mxu0 %vm65_vm2, %v7772_v23 }
0x3a30   :  { %v6246_v32 = vpop.f32.mrb[100].mxu0 }
0x3a31   :  { %v4029_v60 = vpop.f32.mrb[101].mxu0  ;;  %v4038_v41 = vadd.f32 %v7810_v55, %v6246_v32 }
0x3a32   :  { %v4030_v61 = vadd.f32 %v7791_v33, %v4029_v60  ;;  %v6247_v34 = vpop.f32.mrb[102].mxu0 }
0x3a33   :  { %v4032_v36 = vpop.f32.mrb[103].mxu0  ;;  %v4041_v37 = vadd.f32 %v7797_v58, %v6247_v34  ;;  %v4050_v15 = vsel %vm117_vm3, %v4038_v41, -inf }
0x3a34   :  { %v4033_v40 = vadd.f32 %v7803_v38, %v4032_v36  ;;  %v4044_v62 = vsel %vm117_vm3, %v4030_v61, -inf }
0x3a35   :  { %4045 = vmax.xlane.f32.xlu1 %v4044_v62  ;;  %v4053_v42 = vsel %vm117_vm3, %v4041_v37, -inf }
0x3a36   :  { %v4047_v27 = vsel %vm117_vm3, %v4033_v40, -inf }
0x3a37   :  { %4048 = vmax.xlane.f32.xlu0 %v4047_v27 }
0x3a39   :  { %4054 = vmax.xlane.f32.xlu1 %v4053_v42 }
0x3a3b   :  { %4051 = vmax.xlane.f32.xlu0 %v4050_v15 }
0x3a4a   :  { %4092 = vrot.lane.b32.xlu1 %v7772_v23, %s6762_s4 }
0x3ac2   :  { %v4046_v43 = vpop.xlane.xlu1 %4045 }
0x3ac3   :  { %v4056_v12 = vsub.f32 %v4030_v61, %v4046_v43 }
0x3ac4   :  { %v4049_v46 = vpop.xlane.xlu0 %4048 }
0x3ac5   :  { %v4057_v50 = vsub.f32 %v4033_v40, %v4049_v46  ;;  %v4060_v49 = vmul.f32 1.442695, %v4056_v12 }
0x3ac6   :  { %v4055_v3 = vpop.xlane.xlu1 %4054 }
0x3ac7   :  { %v4059_v5 = vsub.f32 %v4041_v37, %v4055_v3  ;;  %v4062_v4 = vmul.f32 1.442695, %v4057_v50 }
0x3ac8   :  { %v4052_v18 = vpop.xlane.xlu0 %4051 }
0x3ac9   :  { %v4066_v7 = vmul.f32 1.442695, %v4059_v5  ;;  %v4058_v20 = vsub.f32 %v4038_v41, %v4052_v18 }
0x3aca   :  { %v4093_v29 = vpop.permute.xlu1 %4092 }
0x3acb   :  { %6654 = vpow2.f32 %v4066_v7  ;;  %v4064_v6 = vmul.f32 1.442695, %v4058_v20 }
0x3acc   :  { %6656 = vpow2.f32 %v4062_v4 }
0x3acd   :  { %6658 = vpow2.f32 %v4064_v6 }
0x3ace   :  { %6660 = vpow2.f32 %v4060_v49 }
0x3ad5   :  { %v6655_v51 = vpop.eup %6654 }
0x3ad6   :  { %v6657_v39 = vpop.eup %6656  ;;  %v4077_v13 = vsel %vm117_vm3, %v6655_v51, 0.0 }
0x3ad7   :  { %v6659_v52 = vpop.eup %6658  ;;  %4078 = vadd.xlane.f32.xlu1 %v4077_v13  ;;  %v4071_v16 = vsel %vm117_vm3, %v6657_v39, 0.0 }
0x3ad8   :  { %v4074_v53 = vsel %vm117_vm3, %v6659_v52, 0.0  ;;  %v6661_v54 = vpop.eup %6660 }
0x3ad9   :  { %4075 = vadd.xlane.f32.xlu0 %v4074_v53  ;;  %v4068_v45 = vsel %vm117_vm3, %v6661_v54, 0.0 }
0x3adb   :  { %4072 = vadd.xlane.f32.xlu1 %v4071_v16 }
0x3add   :  { %4069 = vadd.xlane.f32.xlu0 %v4068_v45 }
0x3aec   :  { %4155 = vrot.lane.b32.xlu1 %v7774_v47, %s6765_s25 }
0x3af0   :  { %4151 = vrot.lane.b32.xlu1 %v7774_v47, %s6766_s26 }
0x3af3   :  { %4090 = vrot.lane.b32.xlu0 %v7774_v47, %s6762_s4 }
0x3af7   :  { %4157 = vrot.lane.b32.xlu0 %v7772_v23, %s6765_s25 }
0x3afb   :  { %4153 = vrot.lane.b32.xlu0 %v7772_v23, %s6766_s26 }
0x3b64   :  { %v4079_v35 = vpop.xlane.xlu1 %4078 }
0x3b66   :  { %v4076_v2 = vpop.xlane.xlu0 %4075 }
0x3b67   :  { %6662 = vrcp.f32 %v4076_v2 }
0x3b68   :  { %v4073_v11 = vpop.xlane.xlu1 %4072 }
0x3b69   :  { %6664 = vrcp.f32 %v4073_v11 }
0x3b6a   :  { %6666 = vrcp.f32 %v4079_v35  ;;  %v4070_v8 = vpop.xlane.xlu0 %4069 }
0x3b6b   :  { %6668 = vrcp.f32 %v4070_v8 }
0x3b6c   :  { %v4156_v63 = vpop.permute.xlu1 %4155 }
0x3b6d   :  { %v4166_v44 = vsel %vm65_vm2, %v4156_v63, 0 }
0x3b6e   :  { %v4091_v9 = vpop.permute.xlu0 %4090 }
0x3b6f   :  { %6248 = vmatprep.subr.bf16.mxu1 %v4091_v9 }
0x3b70   :  { %6249 = vmatpush3.bf16.msra.mxu1 %v4091_v9  ;;  %v4152_v30 = vpop.permute.xlu1 %4151 }
0x3b71   :  { %6250 = vmatprep.subr.bf16.mxu1 %v4093_v29  ;;  %v6663_v10 = vpop.eup %6662 }
0x3b72   :  { %v4086_v24 = vmul.f32 %v6663_v10, %v6659_v52  ;;  %v4158_v57 = vpop.permute.xlu0 %4157 }
0x3b73   :  { %v6665_v19 = vpop.eup %6664  ;;  %v4169_v31 = vsel %vm65_vm2, %v4158_v57, 0 }
0x3b74   :  { %v6667_v25 = vpop.eup %6666  ;;  %6251 = vmatpush3.bf16.msra.mxu1 %v4093_v29  ;;  %v4085_v21 = vmul.f32 %v6665_v19, %v6657_v39 }
0x3b75   :  { %v6669_v59 = vpop.eup %6668  ;;  %6402 = vmatprep.subr.msk.bf16.mxu1 %vm65_vm2, %v4156_v63  ;;  %v4087_v26 = vmul.f32 %v6667_v25, %v6655_v51 }
0x3b76   :  { %v4084_v28 = vmul.f32 %v6669_v59, %v6661_v54  ;;  %v4154_v32 = vpop.permute.xlu0 %4153 }
0x3b77   :  { %v4089_v17 = vpack.c.bf16 %v4087_v26, %v4086_v24 }
0x3b78   :  { %v4088_v22 = vpack.c.bf16 %v4085_v21, %v4084_v28 }
0x3b7a   :  { %6252 = vmatprep.mubr.msk.bf16.mxu1 %vm117_vm3, %v4088_v22 }
0x3b7b   :  { %6253 = vmatmul.mubr.msk.bf16.vlgmr.msra.gmra.mrb[100].mxu1 %vm117_vm3, %v4089_v17 }
0x3b7c   :  { %6260 = vmatprep.mubr.msk.bf16.mxu1 %vm65_vm2, %v4152_v30 }
0x3b7d   :  { %6257 = vmatpush3.bf16.xpose.msra.mxu1 %v4166_v44 }
0x3b7e   :  { %6403 = vmatprep.subr.msk.bf16.mxu1 %vm65_vm2, %v4158_v57 }
0x3b85   :  { %6259 = vmatpush3.bf16.xpose.msra.mxu1 %v4169_v31 }
0x3b8c   :  { %6261 = vmatmul.mubr.msk.bf16.vlgmr.msra.gmra.mrb[104].mxu1 %vm65_vm2, %v4154_v32 }
0x3c4e   :  { %v7840_v60 = vpop.f32.mrb[100].mxu1 }
0x3c4f   :  { %v7842_v61 = vpop.f32.mrb[101].mxu1 }
0x3c50   :  { %v7844_v34 = vpop.f32.mrb[102].mxu1 }
0x3c51   :  { %v7846_v36 = vpop.f32.mrb[103].mxu1 }
0x3c5f   :  { %v6262_v37 = vpop.f32.mrb[104].mxu1 }
0x3c60   :  { %v4205_v40 = vpop.f32.mrb[105].mxu1  ;;  %v4214_v46 = vadd.f32 %v7810_v55, %v6262_v37 }
0x3c61   :  { %v4206_v62 = vadd.f32 %v7791_v33, %v4205_v40  ;;  %v6263_v41 = vpop.f32.mrb[106].mxu1 }
0x3c62   :  { %v4208_v27 = vpop.f32.mrb[107].mxu1  ;;  %v4217_v42 = vadd.f32 %v7797_v58, %v6263_v41  ;;  %v4226_v12 = vsel %vm117_vm3, %v4214_v46, -inf }
0x3c63   :  { %v4209_v15 = vadd.f32 %v7803_v38, %v4208_v27  ;;  %v4220_v43 = vsel %vm117_vm3, %v4206_v62, -inf }
0x3c64   :  { %4221 = vmax.xlane.f32.xlu1 %v4220_v43  ;;  %v4229_v3 = vsel %vm117_vm3, %v4217_v42, -inf }
0x3c65   :  { %v4223_v50 = vsel %vm117_vm3, %v4209_v15, -inf }
0x3c66   :  { %4224 = vmax.xlane.f32.xlu0 %v4223_v50 }
0x3c68   :  { %4230 = vmax.xlane.f32.xlu1 %v4229_v3 }
0x3c6a   :  { %4227 = vmax.xlane.f32.xlu0 %v4226_v12 }
0x3c79   :  { %4268 = vrot.lane.b32.xlu1 %v7772_v23, %s6767_s27 }
0x3cf1   :  { %v4222_v5 = vpop.xlane.xlu1 %4221 }
0x3cf2   :  { %v4232_v20 = vsub.f32 %v4206_v62, %v4222_v5 }
0x3cf3   :  { %v4225_v4 = vpop.xlane.xlu0 %4224 }
0x3cf4   :  { %v4233_v18 = vsub.f32 %v4209_v15, %v4225_v4  ;;  %v4236_v52 = vmul.f32 1.442695, %v4232_v20 }
0x3cf5   :  { %v4231_v7 = vpop.xlane.xlu1 %4230 }
0x3cf6   :  { %v4235_v49 = vsub.f32 %v4217_v42, %v4231_v7  ;;  %v4238_v6 = vmul.f32 1.442695, %v4233_v18 }
0x3cf7   :  { %v4228_v51 = vpop.xlane.xlu0 %4227 }
0x3cf8   :  { %v4242_v39 = vmul.f32 1.442695, %v4235_v49  ;;  %v4234_v13 = vsub.f32 %v4214_v46, %v4228_v51 }
0x3cf9   :  { %v4269_v9 = vpop.permute.xlu1 %4268 }
0x3cfa   :  { %6670 = vpow2.f32 %v4242_v39  ;;  %v4240_v53 = vmul.f32 1.442695, %v4234_v13 }
0x3cfb   :  { %6672 = vpow2.f32 %v4238_v6 }
0x3cfc   :  { %6674 = vpow2.f32 %v4240_v53 }
0x3cfd   :  { %6676 = vpow2.f32 %v4236_v52 }
0x3d04   :  { %v6671_v54 = vpop.eup %6670 }
0x3d05   :  { %v6673_v16 = vpop.eup %6672  ;;  %v4253_v45 = vsel %vm117_vm3, %v6671_v54, 0.0 }
0x3d06   :  { %v6675_v29 = vpop.eup %6674  ;;  %4254 = vadd.xlane.f32.xlu1 %v4253_v45  ;;  %v4247_v11 = vsel %vm117_vm3, %v6673_v16, 0.0 }
0x3d07   :  { %v4250_v35 = vsel %vm117_vm3, %v6675_v29, 0.0  ;;  %v6677_v2 = vpop.eup %6676 }
0x3d08   :  { %4251 = vadd.xlane.f32.xlu0 %v4250_v35  ;;  %v4244_v8 = vsel %vm117_vm3, %v6677_v2, 0.0 }
0x3d0a   :  { %4248 = vadd.xlane.f32.xlu1 %v4247_v11 }
0x3d0c   :  { %4245 = vadd.xlane.f32.xlu0 %v4244_v8 }
0x3d1b   :  { %4331 = vrot.lane.b32.xlu1 %v7774_v47, %s6768_s28 }
0x3d1f   :  { %4327 = vrot.lane.b32.xlu1 %v7774_v47, %s6769_s29 }
0x3d22   :  { %4266 = vrot.lane.b32.xlu0 %v7774_v47, %s6767_s27 }
0x3d26   :  { %4333 = vrot.lane.b32.xlu0 %v7772_v23, %s6768_s28 }
0x3d2a   :  { %4329 = vrot.lane.b32.xlu0 %v7772_v23, %s6769_s29 }
0x3d93   :  { %v4255_v10 = vpop.xlane.xlu1 %4254 }
0x3d95   :  { %v4252_v19 = vpop.xlane.xlu0 %4251 }
0x3d96   :  { %6678 = vrcp.f32 %v4252_v19 }
0x3d97   :  { %v4249_v25 = vpop.xlane.xlu1 %4248 }
0x3d98   :  { %6680 = vrcp.f32 %v4249_v25 }
0x3d99   :  { %6682 = vrcp.f32 %v4255_v10  ;;  %v4246_v63 = vpop.xlane.xlu0 %4245 }
0x3d9a   :  { %6684 = vrcp.f32 %v4246_v63 }
0x3d9b   :  { %v4332_v26 = vpop.permute.xlu1 %4331 }
0x3d9c   :  { %v4342_v40 = vsel %vm65_vm2, %v4332_v26, 0 }
0x3d9d   :  { %v4267_v59 = vpop.permute.xlu0 %4266 }
0x3d9e   :  { %6264 = vmatprep.subr.bf16.mxu0 %v4267_v59 }
0x3d9f   :  { %6265 = vmatpush3.bf16.msra.mxu0 %v4267_v59  ;;  %v4328_v37 = vpop.permute.xlu1 %4327 }
0x3da0   :  { %6266 = vmatprep.subr.bf16.mxu0 %v4269_v9  ;;  %v6679_v24 = vpop.eup %6678 }
0x3da1   :  { %v4262_v17 = vmul.f32 %v6679_v24, %v6675_v29  ;;  %v4334_v62 = vpop.permute.xlu0 %4333 }
0x3da2   :  { %v6681_v28 = vpop.eup %6680  ;;  %v4345_v41 = vsel %vm65_vm2, %v4334_v62, 0 }
0x3da3   :  { %v6683_v21 = vpop.eup %6682  ;;  %6267 = vmatpush3.bf16.msra.mxu0 %v4269_v9  ;;  %v4261_v44 = vmul.f32 %v6681_v28, %v6673_v16 }
0x3da4   :  { %v6685_v22 = vpop.eup %6684  ;;  %6404 = vmatprep.subr.msk.bf16.mxu0 %vm65_vm2, %v4332_v26  ;;  %v4263_v57 = vmul.f32 %v6683_v21, %v6671_v54 }
0x3da5   :  { %v4260_v30 = vmul.f32 %v6685_v22, %v6677_v2  ;;  %v4330_v27 = vpop.permute.xlu0 %4329 }
0x3da6   :  { %v4265_v32 = vpack.c.bf16 %v4263_v57, %v4262_v17 }
0x3da7   :  { %v4264_v31 = vpack.c.bf16 %v4261_v44, %v4260_v30 }
0x3da9   :  { %6268 = vmatprep.mubr.msk.bf16.mxu0 %vm117_vm3, %v4264_v31 }
0x3daa   :  { %6269 = vmatmul.mubr.msk.bf16.vlgmr.msra.gmra.mrb[104].mxu0 %vm117_vm3, %v4265_v32 }
0x3dab   :  { %6276 = vmatprep.mubr.msk.bf16.mxu0 %vm65_vm2, %v4328_v37 }
0x3dac   :  { %6273 = vmatpush3.bf16.xpose.msra.mxu0 %v4342_v40 }
0x3dad   :  { %6405 = vmatprep.subr.msk.bf16.mxu0 %vm65_vm2, %v4334_v62 }
0x3db4   :  { %6275 = vmatpush3.bf16.xpose.msra.mxu0 %v4345_v41 }
0x3dbb   :  { %6277 = vmatmul.mubr.msk.bf16.vlgmr.msra.gmra.mrb[108].mxu0 %vm65_vm2, %v4330_v27 }
0x3e7d   :  { %v7880_v42 = vpop.f32.mrb[104].mxu0 }
0x3e7e   :  { %v7882_v15 = vpop.f32.mrb[105].mxu0 }
0x3e7f   :  { %v7884_v43 = vpop.f32.mrb[106].mxu0 }
0x3e80   :  { %v7886_v46 = vpop.f32.mrb[107].mxu0 }
0x3e8e   :  { %v6278_v50 = vpop.f32.mrb[108].mxu0 }
0x3e8f   :  { %v4381_v3 = vpop.f32.mrb[109].mxu0  ;;  %v4390_v49 = vadd.f32 %v7810_v55, %v6278_v50 }
0x3e90   :  { %v4382_v12 = vadd.f32 %v7791_v33, %v4381_v3  ;;  %v6279_v5 = vpop.f32.mrb[110].mxu0 }
0x3e91   :  { %v4384_v4 = vpop.f32.mrb[111].mxu0  ;;  %v4393_v18 = vadd.f32 %v7797_v58, %v6279_v5  ;;  %v4402_v39 = vsel %vm117_vm3, %v4390_v49, -inf }
0x3e92   :  { %v4385_v7 = vadd.f32 %v7803_v38, %v4384_v4  ;;  %v4396_v20 = vsel %vm117_vm3, %v4382_v12, -inf }
0x3e93   :  { %4397 = vmax.xlane.f32.xlu1 %v4396_v20  ;;  %v4405_v51 = vsel %vm117_vm3, %v4393_v18, -inf }
0x3e94   :  { %v4399_v6 = vsel %vm117_vm3, %v4385_v7, -inf }
0x3e95   :  { %4400 = vmax.xlane.f32.xlu0 %v4399_v6 }
0x3e97   :  { %4406 = vmax.xlane.f32.xlu1 %v4405_v51 }
0x3e99   :  { %4403 = vmax.xlane.f32.xlu0 %v4402_v39 }
0x3ea8   :  { %4444 = vrot.lane.b32.xlu1 %v7772_v23, %s6770_s30 }
0x3f20   :  { %v4398_v13 = vpop.xlane.xlu1 %4397 }
0x3f21   :  { %v4408_v16 = vsub.f32 %v4382_v12, %v4398_v13 }
0x3f22   :  { %v4401_v52 = vpop.xlane.xlu0 %4400 }
0x3f23   :  { %v4409_v53 = vsub.f32 %v4385_v7, %v4401_v52  ;;  %v4412_v8 = vmul.f32 1.442695, %v4408_v16 }
0x3f24   :  { %v4407_v54 = vpop.xlane.xlu1 %4406 }
0x3f25   :  { %v4411_v45 = vsub.f32 %v4393_v18, %v4407_v54  ;;  %v4414_v29 = vmul.f32 1.442695, %v4409_v53 }
0x3f26   :  { %v4404_v35 = vpop.xlane.xlu0 %4403 }
0x3f27   :  { %v4418_v2 = vmul.f32 1.442695, %v4411_v45  ;;  %v4410_v11 = vsub.f32 %v4390_v49, %v4404_v35 }
0x3f28   :  { %v4445_v26 = vpop.permute.xlu1 %4444 }
0x3f29   :  { %6686 = vpow2.f32 %v4418_v2  ;;  %v4416_v9 = vmul.f32 1.442695, %v4410_v11 }
0x3f2a   :  { %6688 = vpow2.f32 %v4414_v29 }
0x3f2b   :  { %6690 = vpow2.f32 %v4416_v9 }
0x3f2c   :  { %6692 = vpow2.f32 %v4412_v8 }
0x3f33   :  { %v6687_v10 = vpop.eup %6686 }
0x3f34   :  { %v6689_v19 = vpop.eup %6688  ;;  %v4429_v25 = vsel %vm117_vm3, %v6687_v10, 0.0 }
0x3f35   :  { %v6691_v63 = vpop.eup %6690  ;;  %4430 = vadd.xlane.f32.xlu1 %v4429_v25  ;;  %v4423_v28 = vsel %vm117_vm3, %v6689_v19, 0.0 }
0x3f36   :  { %v4426_v59 = vsel %vm117_vm3, %v6691_v63, 0.0  ;;  %v6693_v24 = vpop.eup %6692 }
0x3f37   :  { %4427 = vadd.xlane.f32.xlu0 %v4426_v59  ;;  %v4420_v21 = vsel %vm117_vm3, %v6693_v24, 0.0 }
0x3f39   :  { %4424 = vadd.xlane.f32.xlu1 %v4423_v28 }
0x3f3b   :  { %4421 = vadd.xlane.f32.xlu0 %v4420_v21 }
0x3f4a   :  { %4507 = vrot.lane.b32.xlu1 %v7774_v47, %s6771_s3 }
0x3f4e   :  { %4503 = vrot.lane.b32.xlu1 %v7774_v47, %s6772_s0 }
0x3f51   :  { %4442 = vrot.lane.b32.xlu0 %v7774_v47, %s6770_s30 }
0x3f55   :  { %4509 = vrot.lane.b32.xlu0 %v7772_v23, %s6771_s3 }
0x3f59   :  { %4505 = vrot.lane.b32.xlu0 %v7772_v23, %s6772_s0 }
0x3fc2   :  { %v4431_v22 = vpop.xlane.xlu1 %4430 }
0x3fc4   :  { %v4428_v17 = vpop.xlane.xlu0 %4427 }
0x3fc5   :  { %6694 = vrcp.f32 %v4428_v17 }
0x3fc6   :  { %v4425_v30 = vpop.xlane.xlu1 %4424 }
0x3fc7   :  { %6696 = vrcp.f32 %v4425_v30 }
0x3fc8   :  { %6698 = vrcp.f32 %v4431_v22  ;;  %v4422_v44 = vpop.xlane.xlu0 %4421 }
0x3fc9   :  { %6700 = vrcp.f32 %v4422_v44 }
0x3fca   :  { %v4508_v40 = vpop.permute.xlu1 %4507 }
0x3fcb   :  { %v4518_v18 = vsel %vm65_vm2, %v4508_v40, 0 }
0x3fcc   :  { %v4443_v57 = vpop.permute.xlu0 %4442 }
0x3fcd   :  { %6280 = vmatprep.subr.bf16.mxu1 %v4443_v57 }
0x3fce   :  { %6281 = vmatpush3.bf16.msra.mxu1 %v4443_v57  ;;  %v4504_v4 = vpop.permute.xlu1 %4503 }
0x3fcf   :  { %6282 = vmatprep.subr.bf16.mxu1 %v4445_v26  ;;  %v6695_v31 = vpop.eup %6694 }
0x3fd0   :  { %v4438_v41 = vmul.f32 %v6695_v31, %v6691_v63  ;;  %v4510_v7 = vpop.permute.xlu0 %4509 }
0x3fd1   :  { %v6697_v32 = vpop.eup %6696  ;;  %v4521_v20 = vsel %vm65_vm2, %v4510_v7, 0 }
0x3fd2   :  { %v6699_v37 = vpop.eup %6698  ;;  %6283 = vmatpush3.bf16.msra.mxu1 %v4445_v26  ;;  %v4437_v50 = vmul.f32 %v6697_v32, %v6689_v19 }
0x3fd3   :  { %v6701_v62 = vpop.eup %6700  ;;  %6406 = vmatprep.subr.msk.bf16.mxu1 %vm65_vm2, %v4508_v40  ;;  %v4439_v3 = vmul.f32 %v6699_v37, %v6687_v10 }
0x3fd4   :  { %v4436_v27 = vmul.f32 %v6701_v62, %v6693_v24  ;;  %v4506_v49 = vpop.permute.xlu0 %4505 }
0x3fd5   :  { %v4441_v5 = vpack.c.bf16 %v4439_v3, %v4438_v41 }
0x3fd6   :  { %v4440_v12 = vpack.c.bf16 %v4437_v50, %v4436_v27 }
0x3fd8   :  { %6284 = vmatprep.mubr.msk.bf16.mxu1 %vm117_vm3, %v4440_v12 }
0x3fd9   :  { %6285 = vmatmul.mubr.msk.bf16.vlgmr.msra.gmra.mrb[108].mxu1 %vm117_vm3, %v4441_v5 }
0x3fda   :  { %6292 = vmatprep.mubr.msk.bf16.mxu1 %vm65_vm2, %v4504_v4 }
0x3fdb   :  { %6289 = vmatpush3.bf16.xpose.msra.mxu1 %v4518_v18  ;;  %v6452_v18 = vld [vmem:[%s8166_s12 + $0x20] sm:$0xff]  }
0x3fdc   :  { %6407 = vmatprep.subr.msk.bf16.mxu1 %vm65_vm2, %v4510_v7 }
0x3fe3   :  { %6291 = vmatpush3.bf16.xpose.msra.mxu1 %v4521_v20  ;;  %v6453_v20 = vld [vmem:[%s8166_s12 + $0x28] sm:$0xff]  }
0x3fea   :  { %6293 = vmatmul.mubr.msk.bf16.vlgmr.msra.gmra.mrb[112].mxu1 %vm65_vm2, %v4506_v49  ;;  %v4821_v49 = vpack.c.bf16 %v7767_v14, %v7767_v14 }
0x40ac   :  { %v6286_v6 = vpop.f32.mrb[108].mxu1 }
0x40ad   :  { %v4488_v51 = vpop.f32.mrb[109].mxu1 }
0x40ae   :  { %v6287_v39 = vpop.f32.mrb[110].mxu1 }
0x40af   :  { %v4491_v13 = vpop.f32.mrb[111].mxu1 }
0x40bd   :  { %v6294_v52 = vpop.f32.mrb[112].mxu1 }
0x40be   :  { %v4557_v53 = vpop.f32.mrb[113].mxu1  ;;  %v4566_v11 = vadd.f32 %v7810_v55, %v6294_v52 }
0x40bf   :  { %v4558_v54 = vadd.f32 %v7791_v33, %v4557_v53  ;;  %v6295_v16 = vpop.f32.mrb[114].mxu1 }
0x40c0   :  { %v4560_v45 = vpop.f32.mrb[115].mxu1  ;;  %v4569_v29 = vadd.f32 %v7797_v58, %v6295_v16  ;;  %v4578_v10 = vsel %vm117_vm3, %v4566_v11, -inf }
0x40c1   :  { %v4561_v35 = vadd.f32 %v7803_v38, %v4560_v45  ;;  %v4572_v2 = vsel %vm117_vm3, %v4558_v54, -inf }
0x40c2   :  { %4573 = vmax.xlane.f32.xlu1 %v4572_v2  ;;  %v4581_v9 = vsel %vm117_vm3, %v4569_v29, -inf }
0x40c3   :  { %v4575_v8 = vsel %vm117_vm3, %v4561_v35, -inf }
0x40c4   :  { %4576 = vmax.xlane.f32.xlu0 %v4575_v8 }
0x40c6   :  { %4582 = vmax.xlane.f32.xlu1 %v4581_v9 }
0x40c8   :  { %4579 = vmax.xlane.f32.xlu0 %v4578_v10 }
0x414f   :  { %v4574_v33 = vpop.xlane.xlu1 %4573 }
0x4150   :  { %v4584_v63 = vsub.f32 %v4558_v54, %v4574_v33 }
0x4151   :  { %v4577_v19 = vpop.xlane.xlu0 %4576 }
0x4152   :  { %v4585_v25 = vsub.f32 %v4561_v35, %v4577_v19  ;;  %v4588_v55 = vmul.f32 1.442695, %v4584_v63 }
0x4153   :  { %v4583_v58 = vpop.xlane.xlu1 %4582 }
0x4154   :  { %v4587_v38 = vsub.f32 %v4569_v29, %v4583_v58  ;;  %v4590_v59 = vmul.f32 1.442695, %v4585_v25 }
0x4155   :  { %v4580_v24 = vpop.xlane.xlu0 %4579 }
0x4156   :  { %v4594_v28 = vmul.f32 1.442695, %v4587_v38  ;;  %v4586_v21 = vsub.f32 %v4566_v11, %v4580_v24 }
0x4158   :  { %6702 = vpow2.f32 %v4594_v28  ;;  %v4592_v26 = vmul.f32 1.442695, %v4586_v21 }
0x4159   :  { %6704 = vpow2.f32 %v4590_v59 }
0x415a   :  { %6706 = vpow2.f32 %v4592_v26 }
0x415b   :  { %6708 = vpow2.f32 %v4588_v55 }
0x4162   :  { %v6703_v22 = vpop.eup %6702 }
0x4163   :  { %v6705_v17 = vpop.eup %6704  ;;  %v4605_v30 = vsel %vm117_vm3, %v6703_v22, 0.0 }
0x4164   :  { %v6707_v44 = vpop.eup %6706  ;;  %4606 = vadd.xlane.f32.xlu1 %v4605_v30  ;;  %v4599_v32 = vsel %vm117_vm3, %v6705_v17, 0.0 }
0x4165   :  { %v4602_v57 = vsel %vm117_vm3, %v6707_v44, 0.0  ;;  %v6709_v31 = vpop.eup %6708 }
0x4166   :  { %4603 = vadd.xlane.f32.xlu0 %v4602_v57  ;;  %v4596_v37 = vsel %vm117_vm3, %v6709_v31, 0.0 }
0x4168   :  { %4600 = vadd.xlane.f32.xlu1 %v4599_v32 }
0x416a   :  { %4597 = vadd.xlane.f32.xlu0 %v4596_v37 }
0x4179   :  { %4620 = vrot.lane.b32.xlu1 %v7772_v23, %s6773_s17 }
0x417d   :  { %4683 = vrot.lane.b32.xlu1 %v7882_v15, %s6774_s18 }
0x4180   :  { %4618 = vrot.lane.b32.xlu0 %v7774_v47, %s6773_s17 }
0x4181   :  { %4687 = vrot.lane.b32.xlu1 %v7880_v42, %s6774_s18 }
0x4184   :  { %4685 = vrot.lane.b32.xlu0 %v7886_v46, %s6774_s18 }
0x4185   :  { %4699 = vrot.lane.b32.xlu1 %v4488_v51, %s6775_s19 }
0x4188   :  { %4689 = vrot.lane.b32.xlu0 %v7884_v43, %s6774_s18 }
0x4189   :  { %4703 = vrot.lane.b32.xlu1 %v6286_v6, %s6775_s19 }
0x418c   :  { %4701 = vrot.lane.b32.xlu0 %v4491_v13, %s6775_s19 }
0x4190   :  { %4705 = vrot.lane.b32.xlu0 %v6287_v39, %s6775_s19 }
0x41f1   :  { %v4607_v23 = vpop.xlane.xlu1 %4606 }
0x41f3   :  { %v4604_v15 = vpop.xlane.xlu0 %4603 }
0x41f4   :  { %6710 = vrcp.f32 %v4604_v15 }
0x41f5   :  { %v4601_v47 = vpop.xlane.xlu1 %4600 }
0x41f6   :  { %6712 = vrcp.f32 %v4601_v47 }
0x41f7   :  { %6714 = vrcp.f32 %v4607_v23  ;;  %v4598_v42 = vpop.xlane.xlu0 %4597 }
0x41f8   :  { %6716 = vrcp.f32 %v4598_v42 }
0x41f9   :  { %v4621_v40 = vpop.permute.xlu1 %4620 }
0x41fb   :  { %v4619_v46 = vpop.permute.xlu0 %4618 }
0x41fc   :  { %6296 = vmatprep.subr.bf16.mxu0 %v4619_v46 }
0x41fd   :  { %6297 = vmatpush3.bf16.msra.mxu0 %v4619_v46  ;;  %v4684_v45 = vpop.permute.xlu1 %4683 }
0x41fe   :  { %6298 = vmatprep.subr.bf16.mxu0 %v4621_v40  ;;  %v6711_v43 = vpop.eup %6710  ;;  %v4727_v33 = vsel %vm65_vm2, %v7842_v61, %v4684_v45 }
0x41ff   :  { %v4614_v50 = vmul.f32 %v6711_v43, %v6707_v44  ;;  %v4686_v29 = vpop.permute.xlu0 %4685 }
0x4200   :  { %v6713_v62 = vpop.eup %6712  ;;  %v4728_v58 = vsel %vm65_vm2, %v7846_v36, %v4686_v29 }
0x4201   :  { %v6715_v41 = vpop.eup %6714  ;;  %6299 = vmatpush3.bf16.msra.mxu0 %v4621_v40  ;;  %v4613_v12 = vmul.f32 %v6713_v62, %v6705_v17  ;;  %v4688_v35 = vpop.permute.xlu1 %4687 }
0x4202   :  { %v6717_v27 = vpop.eup %6716  ;;  %6304 = vmatprep.subr.bf16.mxu0 %v6759_v0  ;;  %v4615_v5 = vmul.f32 %v6715_v41, %v6703_v22  ;;  %v4729_v28 = vsel %vm65_vm2, %v7840_v60, %v4688_v35 }
0x4203   :  { %v4612_v3 = vmul.f32 %v6717_v27, %v6709_v31  ;;  %v4690_v2 = vpop.permute.xlu0 %4689 }
0x4204   :  { %v4617_v7 = vpack.c.bf16 %v4615_v5, %v4614_v50  ;;  %v4730_v36 = vsel %vm65_vm2, %v7844_v34, %v4690_v2 }
0x4205   :  { %v4616_v4 = vpack.c.bf16 %v4613_v12, %v4612_v3  ;;  %v4700_v11 = vpop.permute.xlu1 %4699 }
0x4206   :  { %v4731_v19 = vsel %vm321_vm5, %v4727_v33, %v4700_v11  ;;  %v5616_v33 = vld [vmem:[%s8169_s11 + $0x2] ss:$0 sm:$0xff] }
0x4207   :  { %6300 = vmatprep.mubr.msk.bf16.mxu0 %vm117_vm3, %v4616_v4  ;;  %v4702_v8 = vpop.permute.xlu0 %4701 }
0x4208   :  { %6301 = vmatmul.mubr.msk.bf16.vlgmr.msra.gmra.mrb[112].mxu0 %vm117_vm3, %v4617_v7  ;;  %v4732_v38 = vsel %vm321_vm5, %v4728_v58, %v4702_v8  ;;  %v6454_v7 = vld [vmem:[%s8167_s13 + $0x20] sm:$0xff]  }
0x4209   :  { %6305 = vmatpush3.bf16.msra.mxu0 %v6452_v18  ;;  %6308 = vmatprep.mubr.msk.bf16.mxu0 %vm6760_vm1, %v6759_v0  ;;  %v4704_v9 = vpop.permute.xlu1 %4703  ;;  %v5615_v8 = vld [vmem:[%s8168_s10 + $0x2] ss:$0 sm:$0xff] }
0x420a   :  { %6306 = vmatprep.subr.bf16.mxu0 %v6759_v0  ;;  %v4733_v61 = vsel %vm321_vm5, %v4729_v28, %v4704_v9  ;;  %6312 = vmatprep.subr.bf16.mxu1 %v6454_v7 }
0x420b   :  { %v4706_v10 = vpop.permute.xlu0 %4705  ;;  %6313 = vmatpush3.bf16.msra.mxu1 %v6454_v7 }
0x420d   :  { %6307 = vmatpush3.bf16.msra.mxu0 %v6453_v20  ;;  %v6455_v20 = vld [vmem:[%s8167_s13 + $0x28] sm:$0xff]  }
0x420e   :  { %6320 = vmatprep.subr.bf16.mxu0 %v6759_v0  ;;  %6314 = vmatprep.subr.bf16.mxu1 %v6455_v20 }
0x420f   :  { %6315 = vmatpush3.bf16.msra.mxu1 %v6455_v20 }
0x4210   :  { %6309 = vmatmul.mubr.msk.bf16.vlgmr.msra.gmra.mrb[116].mxu0 %vm117_vm3, %v4821_v49  ;;  %6328 = vmatprep.subr.bf16.mxu1 %v6759_v0 }
0x4211   :  { %6324 = vmatprep.mubr.msk.bf16.mxu0 %vm6760_vm1, %v6759_v0 }
0x42db   :  { %v6302_v6 = vpop.f32.mrb[112].mxu0 }
0x42dc   :  { %v4664_v51 = vpop.f32.mrb[113].mxu0 }
0x42dd   :  { %4715 = vrot.lane.b32.xlu1 %v4664_v51, %s6776_s22  ;;  %v6303_v39 = vpop.f32.mrb[114].mxu0 }
0x42de   :  { %v4667_v13 = vpop.f32.mrb[115].mxu0 }
0x42df   :  { %4717 = vrot.lane.b32.xlu0 %v4667_v13, %s6776_s22 }
0x42e1   :  { %4719 = vrot.lane.b32.xlu1 %v6302_v6, %s6776_s22 }
0x42e3   :  { %4721 = vrot.lane.b32.xlu0 %v6303_v39, %s6776_s22  ;;  %v7970_v52 = vpop.f32.mrb[116].mxu0 }
0x42e4   :  { %v6310_v53 = vpop.f32.mrb[117].mxu0 }
0x42e5   :  { %v4879_v54 = vpop.f32.mrb[118].mxu0 }
0x42e6   :  { %v6311_v16 = vpop.f32.mrb[119].mxu0 }
0x434f   :  { %v4716_v25 = vpop.permute.xlu1 %4715 }
0x4350   :  { %v4735_v63 = vsel %vm1591_vm10, %v4731_v19, %v4716_v25 }
0x4351   :  { %v4739_v59 = vadd.f32 %v4735_v63, %v7739_v48  ;;  %v4718_v24 = vpop.permute.xlu0 %4717  ;;  %v4734_v48 = vsel %vm321_vm5, %v4730_v36, %v4706_v10 }
0x4352   :  { %v4736_v21 = vsel %vm1591_vm10, %v4732_v38, %v4718_v24 }
0x4353   :  { %v4740_v55 = vadd.f32 %v4736_v21, %v7737_v56  ;;  %v4720_v26 = vpop.permute.xlu1 %4719  ;;  %v4747_v22 = vsel %vm117_vm3, %v4739_v59, 0.0 }
0x4354   :  { %v4737_v17 = vsel %vm1591_vm10, %v4733_v61, %v4720_v26  ;;  %4748 = vadd.xlane.f32.xlu1 %v4747_v22 }
0x4355   :  { %v4741_v30 = vadd.f32 %v4737_v17, %v7767_v14  ;;  %v4722_v60 = vpop.permute.xlu0 %4721  ;;  %v4750_v44 = vsel %vm117_vm3, %v4740_v55, 0.0 }
0x4356   :  { %v4738_v57 = vsel %vm1591_vm10, %v4734_v48, %v4722_v60  ;;  %4751 = vadd.xlane.f32.xlu0 %v4750_v44 }
0x4357   :  { %v4742_v56 = vadd.f32 %v4738_v57, %v7765_v1  ;;  %v4753_v32 = vsel %vm117_vm3, %v4741_v30, 0.0 }
0x4359   :  { %v4756_v31 = vsel %vm117_vm3, %v4742_v56, 0.0 }
0x435a   :  { %4757 = vadd.xlane.f32.xlu1 %v4756_v31  ;;  %4754 = vadd.xlane.f32.xlu0 %v4753_v32 }
0x43e1   :  { %v4749_v34 = vpop.xlane.xlu1 %4748 }
0x43e2   :  { %v4759_v37 = vmul.f32 0.03125, %v4749_v34  ;;  %v8045_v34 = vpack.c.bf16 %v7970_v52, %v7970_v52 }
0x43e3   :  { %v4752_v23 = vpop.xlane.xlu0 %4751 }
0x43e4   :  { %v4763_v15 = vsub.f32 %v4739_v59, %v4759_v37  ;;  %v4760_v47 = vmul.f32 0.03125, %v4752_v23  ;;  %v8054_v23 = vld [vmem:[%s8170_s2] ss:$0 sm:$0xff] }
0x43e6   :  { %v4764_v14 = vsub.f32 %v4740_v55, %v4760_v47  ;;  %v4767_v42 = vmul.f32 %v4763_v15, %v4763_v15 }
0x43e7   :  { %v4755_v46 = vpop.xlane.xlu0 %4754  ;;  %v4758_v40 = vpop.xlane.xlu1 %4757 }
0x43e8   :  { %v4761_v43 = vmul.f32 0.03125, %v4755_v46  ;;  %v4762_v62 = vmul.f32 0.03125, %v4758_v40  ;;  %v4771_v41 = vsel %vm117_vm3, %v4767_v42, 0.0  ;;  %v4768_v1 = vmul.f32 %v4764_v14, %v4764_v14 }
0x43e9   :  { %4772 = vadd.xlane.f32.xlu0 %v4771_v41 }
0x43ea   :  { %v4765_v27 = vsub.f32 %v4741_v30, %v4761_v43  ;;  %v4766_v50 = vsub.f32 %v4742_v56, %v4762_v62  ;;  %v4774_v3 = vsel %vm117_vm3, %v4768_v1, 0.0 }
0x43eb   :  { %4775 = vadd.xlane.f32.xlu1 %v4774_v3 }
0x43ec   :  { %v4769_v12 = vmul.f32 %v4765_v27, %v4765_v27  ;;  %v4770_v5 = vmul.f32 %v4766_v50, %v4766_v50 }
0x43ee   :  { %v4777_v4 = vsel %vm117_vm3, %v4769_v12, 0.0  ;;  %v4780_v18 = vsel %vm117_vm3, %v4770_v5, 0.0 }
0x43ef   :  { %4778 = vadd.xlane.f32.xlu0 %v4777_v4  ;;  %4781 = vadd.xlane.f32.xlu1 %v4780_v18 }
0x4476   :  { %v4773_v49 = vpop.xlane.xlu0 %4772 }
0x4477   :  { %v4783_v6 = vmul.f32 0.03125, %v4773_v49 }
0x4478   :  { %v4776_v51 = vpop.xlane.xlu1 %4775 }
0x4479   :  { %v4787_v39 = vadd.f32 1e-05, %v4783_v6  ;;  %v4784_v13 = vmul.f32 0.03125, %v4776_v51 }
0x447b   :  { %6718 = vrsqrt.f32 %v4787_v39  ;;  %v4788_v53 = vadd.f32 1e-05, %v4784_v13 }
0x447c   :  { %v4779_v54 = vpop.xlane.xlu0 %4778  ;;  %v4782_v16 = vpop.xlane.xlu1 %4781 }
0x447d   :  { %6720 = vrsqrt.f32 %v4788_v53  ;;  %v4785_v45 = vmul.f32 0.03125, %v4779_v54  ;;  %v4786_v29 = vmul.f32 0.03125, %v4782_v16 }
0x447f   :  { %v4789_v35 = vadd.f32 1e-05, %v4785_v45  ;;  %v4790_v2 = vadd.f32 1e-05, %v4786_v29 }
0x4481   :  { %6722 = vrsqrt.f32 %v4789_v35 }
0x4482   :  { %6724 = vrsqrt.f32 %v4790_v2 }
0x4485   :  { %v6719_v11 = vpop.eup %6718 }
0x4486   :  { %v4795_v9 = vmul.f32 %v6719_v11, %v4763_v15 }
0x4487   :  { %v6721_v10 = vpop.eup %6720 }
0x4488   :  { %v4796_v19 = vmul.f32 %v6721_v10, %v4764_v14  ;;  %v4805_v25 = vmul.f32 %v5615_v8, %v4795_v9 }
0x448a   :  { %v4806_v58 = vmul.f32 %v5615_v8, %v4796_v19  ;;  %v4815_v63 = vadd.f32 %v5616_v33, %v4805_v25 }
0x448b   :  { %v6723_v38 = vpop.eup %6722 }
0x448c   :  { %v6725_v59 = vpop.eup %6724  ;;  %v4797_v24 = vmul.f32 %v6723_v38, %v4765_v27  ;;  %v4816_v28 = vadd.f32 %v5616_v33, %v4806_v58  ;;  %5465 = vst.msk [vmem:[#allocation2] sm:$0xff] %vm117_vm3, %v4815_v63  ;;  %5468 = vst.msk [vmem:[%s8173_s16] sm:$0xff] %vm117_vm3, %v4815_v63 }
0x448d   :  { %v4798_v21 = vmul.f32 %v6725_v59, %v4766_v50 }
0x448e   :  { %v4807_v61 = vmul.f32 %v5615_v8, %v4797_v24  ;;  %v4819_v55 = vpack.c.bf16 %v4816_v28, %v4815_v63  ;;  %5466 = vst.msk [vmem:[#allocation2 + $0x8] sm:$0xff] %vm117_vm3, %v4816_v28  ;;  %5469 = vst.msk [vmem:[%s8173_s16 + $0x8] sm:$0xff] %vm117_vm3, %v4816_v28 }
0x448f   :  { %v4808_v26 = vmul.f32 %v5615_v8, %v4798_v21 }
0x4490   :  { %6316 = vmatprep.mubr.msk.bf16.mxu1 %vm117_vm3, %v4819_v55  ;;  %v4817_v22 = vadd.f32 %v5616_v33, %v4807_v61 }
0x4491   :  { %v4818_v36 = vadd.f32 %v5616_v33, %v4808_v26 }
0x4492   :  { %5470 = vst.msk [vmem:[%s8173_s16 + $0x10] sm:$0xf] %vm707_vm9, %v4817_v22 }
0x4493   :  { %v4820_v17 = vpack.c.bf16 %v4818_v36, %v4817_v22 }
0x4495   :  { %6317 = vmatmul.mubr.msk.bf16.vlgmr.msra.gmra.mrb[116].mxu1 %vm117_vm3, %v4820_v17 }
0x4496   :  { %6332 = vmatprep.mubr.msk.bf16.mxu1 %vm6760_vm1, %v6759_v0 }
0x4568   :  { %v6318_v48 = vpop.f32.mrb[116].mxu1 }
0x4569   :  { %v4940_v30 = vpop.f32.mrb[117].mxu1 }
0x456a   :  { %v6319_v60 = vpop.f32.mrb[118].mxu1 }
0x456b   :  { %v8031_v44 = vpack.c.bf16 %v6319_v60, %v6318_v48  ;;  %v4943_v57 = vpop.f32.mrb[119].mxu1 }
0x456c   :  { %v8033_v56 = vpack.c.bf16 %v4943_v57, %v4940_v30 }
0x456d   :  { %5022 = vrot.lane.b32.xlu1 %v8031_v44, %s6763_s5  ;;  %v4964_v32 = vsel %vm65_vm2, %v8031_v44, 0 }
0x456e   :  { %v4961_v31 = vsel %vm65_vm2, %v8033_v56, 0 }
0x456f   :  { %6321 = vmatpush3.bf16.xpose.msra.mxu0 %v4961_v31 }
0x4570   :  { %6322 = vmatprep.subr.bf16.mxu0 %v6759_v0 }
0x4577   :  { %6323 = vmatpush3.bf16.xpose.msra.mxu0 %v4964_v32 }
0x4578   :  { %6344 = vmatprep.subr.bf16.mxu0 %v6759_v0 }
0x457e   :  { %6325 = vmatmul.mubr.msk.bf16.vlgmr.msra.gmra.mrb[120].mxu0 %vm65_vm2, %v8045_v34 }
0x457f   :  { %6348 = vmatprep.mubr.msk.bf16.mxu0 %vm6760_vm1, %v6759_v0 }
0x45df   :  { %v5023_v41 = vpop.permute.xlu1 %5022 }
0x4651   :  { %v5000_v37 = vpop.f32.mrb[120].mxu0 }
0x4652   :  { %v5001_v15 = vadd.f32 %v8054_v23, %v5000_v37  ;;  %v6326_v47 = vpop.f32.mrb[121].mxu0 }
0x4653   :  { %v5003_v14 = vpop.f32.mrb[122].mxu0 }
0x4654   :  { %v6327_v42 = vpop.f32.mrb[123].mxu0  ;;  %v5006_v52 = vsel %vm707_vm9, %v5001_v15, -inf }
0x4655   :  { %5007 = vmax.xlane.f32.xlu0 %v5006_v52 }
0x466b   :  { %5020 = vrot.lane.b32.xlu0 %v8033_v56, %s6763_s5 }
0x466f   :  { %5074 = vrot.lane.b32.xlu0 %v8031_v44, %s6766_s26 }
0x46e2   :  { %v5008_v46 = vpop.xlane.xlu0 %5007 }
0x46e3   :  { %v5009_v40 = vsub.f32 %v5001_v15, %v5008_v46 }
0x46e5   :  { %v5010_v43 = vmul.f32 1.442695, %v5009_v40 }
0x46e6   :  { %v5021_v62 = vpop.permute.xlu0 %5020 }
0x46e7   :  { %6726 = vpow2.f32 %v5010_v43  ;;  %6329 = vmatpush3.bf16.msra.mxu1 %v5021_v62 }
0x46e8   :  { %6330 = vmatprep.subr.bf16.mxu1 %v6759_v0 }
0x46ea   :  { %v5075_v7 = vpop.permute.xlu0 %5074 }
0x46eb   :  { %6331 = vmatpush3.bf16.msra.mxu1 %v5023_v41  ;;  %v5083_v20 = vsel %vm65_vm2, %v5075_v7, 0 }
0x46ec   :  { %6336 = vmatprep.subr.bf16.mxu1 %v6759_v0 }
0x46f1   :  { %v6727_v1 = vpop.eup %6726 }
0x46f2   :  { %v5012_v27 = vsel %vm707_vm9, %v6727_v1, 0.0 }
0x46f3   :  { %5013 = vadd.xlane.f32.xlu1 %v5012_v27 }
0x4704   :  { %5072 = vrot.lane.b32.xlu1 %v8033_v56, %s6766_s26 }
0x4708   :  { %5070 = vrot.lane.b32.xlu1 %v8045_v34, %s6766_s26 }
0x470c   :  { %5139 = vrot.lane.b32.xlu1 %v8031_v44, %s6765_s25 }
0x4780   :  { %v5014_v50 = vpop.xlane.xlu1 %5013 }
0x4781   :  { %6728 = vrcp.f32 %v5014_v50 }
0x4784   :  { %v5073_v5 = vpop.permute.xlu1 %5072 }
0x4785   :  { %v5080_v18 = vsel %vm65_vm2, %v5073_v5, 0 }
0x4788   :  { %v5071_v49 = vpop.permute.xlu1 %5070 }
0x478b   :  { %v6729_v3 = vpop.eup %6728 }
0x478c   :  { %v5016_v12 = vmul.f32 %v6729_v3, %v6727_v1  ;;  %v5140_v10 = vpop.permute.xlu1 %5139 }
0x478e   :  { %v5017_v4 = vpack.c.bf16 %v5016_v12, %v5016_v12 }
0x4790   :  { %6333 = vmatmul.mubr.msk.bf16.vlgmr.msra.gmra.mrb[120].mxu1 %vm117_vm3, %v5017_v4 }
0x4791   :  { %6337 = vmatpush3.bf16.xpose.msra.mxu1 %v5080_v18  ;;  %6340 = vmatprep.mubr.msk.bf16.mxu1 %vm6760_vm1, %v6759_v0 }
0x4792   :  { %6338 = vmatprep.subr.bf16.mxu1 %v6759_v0 }
0x4799   :  { %6339 = vmatpush3.bf16.xpose.msra.mxu1 %v5083_v20 }
0x479a   :  { %6360 = vmatprep.subr.bf16.mxu1 %v6759_v0 }
0x47a0   :  { %6341 = vmatmul.mubr.msk.bf16.vlgmr.msra.gmra.mrb[124].mxu1 %vm65_vm2, %v5071_v49 }
0x47a1   :  { %6364 = vmatprep.mubr.msk.bf16.mxu1 %vm6760_vm1, %v6759_v0 }
0x4863   :  { %v8081_v6 = vpop.f32.mrb[120].mxu1 }
0x4864   :  { %v6334_v51 = vpop.f32.mrb[121].mxu1 }
0x4865   :  { %v5066_v39 = vpop.f32.mrb[122].mxu1 }
0x4866   :  { %v6335_v13 = vpop.f32.mrb[123].mxu1 }
0x4873   :  { %v5119_v53 = vpop.f32.mrb[124].mxu1 }
0x4874   :  { %v5120_v54 = vadd.f32 %v8054_v23, %v5119_v53  ;;  %v6342_v16 = vpop.f32.mrb[125].mxu1 }
0x4875   :  { %v5122_v45 = vpop.f32.mrb[126].mxu1 }
0x4876   :  { %v6343_v29 = vpop.f32.mrb[127].mxu1  ;;  %v5125_v35 = vsel %vm707_vm9, %v5120_v54, -inf }
0x4877   :  { %5126 = vmax.xlane.f32.xlu0 %v5125_v35 }
0x488d   :  { %5137 = vrot.lane.b32.xlu0 %v8033_v56, %s6765_s25 }
0x4891   :  { %5188 = vrot.lane.b32.xlu0 %v8033_v56, %s6769_s29 }
0x4895   :  { %5186 = vrot.lane.b32.xlu0 %v8045_v34, %s6769_s29 }
0x4904   :  { %v5127_v2 = vpop.xlane.xlu0 %5126 }
0x4905   :  { %v5128_v11 = vsub.f32 %v5120_v54, %v5127_v2 }
0x4907   :  { %v5129_v8 = vmul.f32 1.442695, %v5128_v11 }
0x4908   :  { %v5138_v9 = vpop.permute.xlu0 %5137 }
0x4909   :  { %6730 = vpow2.f32 %v5129_v8  ;;  %6345 = vmatpush3.bf16.msra.mxu0 %v5138_v9 }
0x490a   :  { %6346 = vmatprep.subr.bf16.mxu0 %v6759_v0 }
0x490c   :  { %v5189_v38 = vpop.permute.xlu0 %5188 }
0x490d   :  { %6347 = vmatpush3.bf16.msra.mxu0 %v5140_v10  ;;  %v5196_v24 = vsel %vm65_vm2, %v5189_v38, 0  ;;  %v6758_v38 = vld [vmem:[#allocation2 + $0x10] sm:$0xff] }
0x490e   :  { %6352 = vmatprep.subr.bf16.mxu0 %v6759_v0 }
0x4910   :  { %v5187_v61 = vpop.permute.xlu0 %5186 }
0x4913   :  { %v6731_v33 = vpop.eup %6730 }
0x4914   :  { %v5131_v19 = vsel %vm707_vm9, %v6731_v33, 0.0 }
0x4915   :  { %5132 = vadd.xlane.f32.xlu1 %v5131_v19 }
0x4926   :  { %5190 = vrot.lane.b32.xlu1 %v8031_v44, %s6769_s29 }
0x49a2   :  { %v5133_v25 = vpop.xlane.xlu1 %5132 }
0x49a3   :  { %6732 = vrcp.f32 %v5133_v25 }
0x49a6   :  { %v5191_v28 = vpop.permute.xlu1 %5190 }
0x49a7   :  { %v5199_v21 = vsel %vm65_vm2, %v5191_v28, 0 }
0x49ad   :  { %v6733_v58 = vpop.eup %6732 }
0x49ae   :  { %v5135_v63 = vmul.f32 %v6733_v58, %v6731_v33 }
0x49b0   :  { %v5136_v59 = vpack.c.bf16 %v5135_v63, %v5135_v63 }
0x49b2   :  { %6349 = vmatmul.mubr.msk.bf16.vlgmr.msra.gmra.mrb[124].mxu0 %vm117_vm3, %v5136_v59 }
0x49b3   :  { %6353 = vmatpush3.bf16.xpose.msra.mxu0 %v5196_v24  ;;  %6356 = vmatprep.mubr.msk.bf16.mxu0 %vm6760_vm1, %v6759_v0 }
0x49b4   :  { %6354 = vmatprep.subr.bf16.mxu0 %v6759_v0 }
0x49bb   :  { %6355 = vmatpush3.bf16.xpose.msra.mxu0 %v5199_v21 }
0x49bc   :  { %6376 = vmatprep.subr.bf16.mxu0 %v6759_v0 }
0x49c2   :  { %6357 = vmatmul.mubr.msk.bf16.vlgmr.msra.gmra.mrb[128].mxu0 %vm65_vm2, %v5187_v61 }
0x49c3   :  { %6380 = vmatprep.mubr.msk.bf16.mxu0 %vm6760_vm1, %v6759_v0 }
0x4a85   :  { %v5180_v55 = vpop.f32.mrb[124].mxu0 }
0x4a86   :  { %v6350_v26 = vpop.f32.mrb[125].mxu0 }
0x4a87   :  { %v5183_v22 = vpop.f32.mrb[126].mxu0 }
0x4a88   :  { %v6351_v36 = vpop.f32.mrb[127].mxu0 }
0x4a95   :  { %v5235_v17 = vpop.f32.mrb[128].mxu0 }
0x4a96   :  { %v5236_v48 = vadd.f32 %v8054_v23, %v5235_v17  ;;  %v6358_v30 = vpop.f32.mrb[129].mxu0 }
0x4a97   :  { %v5238_v60 = vpop.f32.mrb[130].mxu0 }
0x4a98   :  { %v6359_v57 = vpop.f32.mrb[131].mxu0  ;;  %v5241_v31 = vsel %vm707_vm9, %v5236_v48, -inf  ;;  %v5643_v60 = vld [vmem:[%s8172_s15 + $0x2] ss:$0 sm:$0xff] }
0x4a99   :  { %5242 = vmax.xlane.f32.xlu1 %v5241_v31 }
0x4aaa   :  { %5255 = vrot.lane.b32.xlu1 %v8031_v44, %s6768_s28 }
0x4aae   :  { %5304 = vrot.lane.b32.xlu1 %v8033_v56, %s6772_s0 }
0x4ab2   :  { %5302 = vrot.lane.b32.xlu1 %v8045_v34, %s6772_s0 }
0x4b26   :  { %v5243_v32 = vpop.xlane.xlu1 %5242 }
0x4b27   :  { %v5244_v37 = vsub.f32 %v5236_v48, %v5243_v32  ;;  %v5642_v48 = vld [vmem:[%s8171_s14 + $0x2] ss:$0 sm:$0xff] }
0x4b29   :  { %v5245_v15 = vmul.f32 1.442695, %v5244_v37 }
0x4b2a   :  { %v5256_v34 = vpop.permute.xlu1 %5255 }
0x4b2b   :  { %6734 = vpow2.f32 %v5245_v15 }
0x4b2e   :  { %v5305_v43 = vpop.permute.xlu1 %5304 }
0x4b2f   :  { %v5312_v41 = vsel %vm65_vm2, %v5305_v43, 0 }
0x4b32   :  { %v5303_v50 = vpop.permute.xlu1 %5302 }
0x4b35   :  { %v6735_v47 = vpop.eup %6734 }
0x4b36   :  { %v5247_v14 = vsel %vm707_vm9, %v6735_v47, 0.0 }
0x4b37   :  { %5248 = vadd.xlane.f32.xlu0 %v5247_v14 }
0x4b4d   :  { %5253 = vrot.lane.b32.xlu0 %v8033_v56, %s6768_s28 }
0x4b51   :  { %5306 = vrot.lane.b32.xlu0 %v8031_v44, %s6772_s0 }
0x4bc4   :  { %v5249_v42 = vpop.xlane.xlu0 %5248 }
0x4bc5   :  { %6736 = vrcp.f32 %v5249_v42 }
0x4bc8   :  { %v5254_v52 = vpop.permute.xlu0 %5253 }
0x4bc9   :  { %6361 = vmatpush3.bf16.msra.mxu1 %v5254_v52 }
0x4bca   :  { %6362 = vmatprep.subr.bf16.mxu1 %v6759_v0 }
0x4bcc   :  { %v5307_v1 = vpop.permute.xlu0 %5306 }
0x4bcd   :  { %6363 = vmatpush3.bf16.msra.mxu1 %v5256_v34  ;;  %v5315_v27 = vsel %vm65_vm2, %v5307_v1, 0 }
0x4bce   :  { %6368 = vmatprep.subr.bf16.mxu1 %v6759_v0 }
0x4bcf   :  { %v6737_v46 = vpop.eup %6736 }
0x4bd0   :  { %v5251_v40 = vmul.f32 %v6737_v46, %v6735_v47 }
0x4bd2   :  { %v5252_v62 = vpack.c.bf16 %v5251_v40, %v5251_v40 }
0x4bd4   :  { %6365 = vmatmul.mubr.msk.bf16.vlgmr.msra.gmra.mrb[128].mxu1 %vm117_vm3, %v5252_v62 }
0x4bd5   :  { %6372 = vmatprep.mubr.msk.bf16.mxu1 %vm6760_vm1, %v6759_v0 }
0x4bd6   :  { %6369 = vmatpush3.bf16.xpose.msra.mxu1 %v5312_v41 }
0x4bd7   :  { %6370 = vmatprep.subr.bf16.mxu1 %v6759_v0 }
0x4bde   :  { %6371 = vmatpush3.bf16.xpose.msra.mxu1 %v5315_v27 }
0x4be5   :  { %6373 = vmatmul.mubr.msk.bf16.vlgmr.msra.gmra.mrb[132].mxu1 %vm65_vm2, %v5303_v50 }
0x4ca7   :  { %v5296_v3 = vpop.f32.mrb[128].mxu1 }
0x4ca8   :  { %v6366_v12 = vpop.f32.mrb[129].mxu1 }
0x4ca9   :  { %v5299_v5 = vpop.f32.mrb[130].mxu1 }
0x4caa   :  { %v6367_v4 = vpop.f32.mrb[131].mxu1 }
0x4cb8   :  { %v5351_v18 = vpop.f32.mrb[132].mxu1 }
0x4cb9   :  { %v5352_v7 = vadd.f32 %v8054_v23, %v5351_v18  ;;  %v6374_v20 = vpop.f32.mrb[133].mxu1 }
0x4cba   :  { %v5354_v49 = vpop.f32.mrb[134].mxu1 }
0x4cbb   :  { %v6375_v51 = vpop.f32.mrb[135].mxu1  ;;  %v5357_v39 = vsel %vm707_vm9, %v5352_v7, -inf }
0x4cbc   :  { %5358 = vmax.xlane.f32.xlu0 %v5357_v39 }
0x4cd2   :  { %5369 = vrot.lane.b32.xlu0 %v8033_v56, %s6771_s3 }
0x4cd6   :  { %5419 = vrot.lane.b32.xlu0 %v5180_v55, %s6774_s18 }
0x4d49   :  { %v5359_v13 = vpop.xlane.xlu0 %5358 }
0x4d4a   :  { %v5360_v53 = vsub.f32 %v5352_v7, %v5359_v13 }
0x4d4c   :  { %v5361_v54 = vmul.f32 1.442695, %v5360_v53 }
0x4d4d   :  { %v5370_v16 = vpop.permute.xlu0 %5369 }
0x4d4e   :  { %6738 = vpow2.f32 %v5361_v54  ;;  %6377 = vmatpush3.bf16.msra.mxu0 %v5370_v16 }
0x4d4f   :  { %6378 = vmatprep.subr.bf16.mxu0 %v6759_v0 }
0x4d51   :  { %v5420_v33 = vpop.permute.xlu0 %5419 }
0x4d58   :  { %v6739_v23 = vpop.eup %6738 }
0x4d59   :  { %v5363_v45 = vsel %vm707_vm9, %v6739_v23, 0.0 }
0x4d5a   :  { %5364 = vadd.xlane.f32.xlu1 %v5363_v45 }
0x4d6b   :  { %5371 = vrot.lane.b32.xlu1 %v8031_v44, %s6771_s3  ;;  %v5430_v44 = vsel %vm65_vm2, %v8081_v6, %v5420_v33 }
0x4d6f   :  { %5423 = vrot.lane.b32.xlu1 %v5296_v3, %s6775_s19 }
0x4de7   :  { %v5365_v56 = vpop.xlane.xlu1 %5364 }
0x4de8   :  { %6740 = vrcp.f32 %v5365_v56 }
0x4deb   :  { %v5372_v29 = vpop.permute.xlu1 %5371 }
0x4dec   :  { %6379 = vmatpush3.bf16.msra.mxu0 %v5372_v29 }
0x4def   :  { %v5424_v19 = vpop.permute.xlu1 %5423 }
0x4df0   :  { %v5431_v25 = vsel %vm321_vm5, %v5430_v44, %v5424_v19 }
0x4df2   :  { %v6741_v35 = vpop.eup %6740 }
0x4df3   :  { %v5367_v2 = vmul.f32 %v6741_v35, %v6739_v23 }
0x4df5   :  { %v5368_v11 = vpack.c.bf16 %v5367_v2, %v5367_v2 }
0x4df7   :  { %6381 = vmatmul.mubr.msk.bf16.vlgmr.msra.gmra.mrb[132].mxu0 %vm117_vm3, %v5368_v11 }
0x4eca   :  { %v5412_v8 = vpop.f32.mrb[132].mxu0 }
0x4ecb   :  { %5427 = vrot.lane.b32.xlu0 %v5412_v8, %s6776_s22  ;;  %v6382_v0 = vpop.f32.mrb[133].mxu0 }
0x4ecc   :  { %v5415_v9 = vpop.f32.mrb[134].mxu0 }
0x4ecd   :  { %v6383_v10 = vpop.f32.mrb[135].mxu0 }
0x4f3d   :  { %v5428_v58 = vpop.permute.xlu0 %5427 }
0x4f3e   :  { %v5432_v63 = vsel %vm1591_vm10, %v5431_v25, %v5428_v58 }
0x4f3f   :  { %v5433_v59 = vadd.f32 %v6758_v38, %v5432_v63 }
0x4f41   :  { %v5438_v24 = vsel %vm707_vm9, %v5433_v59, 0.0 }
0x4f42   :  { %5439 = vadd.xlane.f32.xlu1 %v5438_v24 }
0x4fcf   :  { %v5440_v28 = vpop.xlane.xlu1 %5439 }
0x4fd0   :  { %v5441_v21 = vmul.f32 0.03125, %v5440_v28 }
0x4fd2   :  { %v5442_v61 = vsub.f32 %v5433_v59, %v5441_v21 }
0x4fd4   :  { %v5443_v55 = vmul.f32 %v5442_v61, %v5442_v61 }
0x4fd6   :  { %v5444_v26 = vsel %vm707_vm9, %v5443_v55, 0.0 }
0x4fd7   :  { %5445 = vadd.xlane.f32.xlu0 %v5444_v26 }
0x5064   :  { %v5446_v22 = vpop.xlane.xlu0 %5445 }
0x5065   :  { %v5447_v36 = vmul.f32 0.03125, %v5446_v22 }
0x5067   :  { %v5448_v6 = vadd.f32 1e-05, %v5447_v36 }
0x5069   :  { %6742 = vrsqrt.f32 %v5448_v6 }
0x5073   :  { %v6743_v17 = vpop.eup %6742 }
0x5074   :  { %v5450_v30 = vmul.f32 %v6743_v17, %v5442_v61 }
0x5076   :  { %v5457_v57 = vmul.f32 %v5642_v48, %v5450_v30 }
0x5078   :  { %v5464_v31 = vadd.f32 %v5643_v60, %v5457_v57 }
0x507a   :  { %5467 = vst.msk [vmem:[#allocation2 + $0x10] sm:$0xf] %vm707_vm9, %v5464_v31  ;;  %5471 = vst.msk [vmem:[%s8173_s16 + $0x14] sm:$0xf] %vm707_vm9, %v5464_v31 }

</bundles_post_ra>
